<compile_context>
chip_gen: v7x
topology: tpu7x:2x2x1
jax: 0.10.0
libtpu: 0.0.40
codegen_flags: <defaults>
</compile_context>

<pallas_src>
import functools

import jax
import jax.numpy as jnp
from jax import lax
from jax.experimental import pallas as pl
from jax.experimental.pallas import tpu as pltpu


def _round_up(x, m):
    return ((x + m - 1) // m) * m


def _infonce_kernel(s12_ref, s1tj_ref, s1t_ref, sqc_ref, sqrj_ref,
                    segj_ref, seg_ref, w2_ref, out_ref, scores_ref,
                    *, n_pad, c_pad, num_classes, tj):
    j = pl.program_id(0)
    nj = pl.num_programs(0)

    @pl.when(j == 0)
    def _init():
        scores_ref[...] = jnp.zeros_like(scores_ref)

    # ---- pairwise-distance column block: dist[:, j*TJ:(j+1)*TJ] -----------
    # native [N, D] @ [D, TJ] MXU pass (bf16 in, f32 accumulate)
    s1_rows = s12_ref[pl.ds(0, n_pad), :]                       # [N, D] bf16 (resident)
    gram = jnp.dot(s1_rows, s1tj_ref[...],
                   preferred_element_type=jnp.float32)          # [N, TJ] f32
    # hoisted row norms: [N,1] column + lane-dense [1,TJ] tile (host precomputed)
    d2 = sqc_ref[...] + sqrj_ref[...] - 2.0 * gram
    dist = jnp.sqrt(jnp.maximum(d2, 0.0))                       # [N, TJ] f32

    # per-class partial sums: scores[i, c] += sum_{r in tile, class(r)==c} dist[i, r]
    iota_c = lax.broadcasted_iota(jnp.int32, (tj, c_pad), 1)
    oh_j = (segj_ref[...] == iota_c).astype(jnp.bfloat16)       # [TJ, C] one-hot
    scores_ref[...] += jnp.dot(dist.astype(jnp.bfloat16), oh_j,
                               preferred_element_type=jnp.float32)

    # ---- finalize on the last column block --------------------------------
    @pl.when(j == nj - 1)
    def _finalize():
        # class membership one-hot (bool); padded rows carry a sentinel id
        iota_cN = lax.broadcasted_iota(jnp.int32, (n_pad, c_pad), 1)
        oh = seg_ref[...] == iota_cN                            # [N, C] bool

        # medoid per class: first-occurrence argmin of within-class distance sums
        masked = jnp.where(oh, scores_ref[...], 1e30)
        col_min = jnp.min(masked, axis=0, keepdims=True)        # [1, C]
        row_iota = lax.broadcasted_iota(jnp.int32, (n_pad, c_pad), 0)
        first_idx = jnp.min(jnp.where(masked <= col_min, row_iota, n_pad),
                            axis=0, keepdims=True)              # [1, C]
        sel = (row_iota == first_idx).astype(jnp.bfloat16)      # [N, C] medoid one-hot

        # centroids in [D, C] via the resident S1^T -> native dot, no transpose
        cent_dc = jnp.dot(s1t_ref[...], sel,
                          preferred_element_type=jnp.float32).astype(jnp.bfloat16)

        # fused local+global logits: single [2N, D] @ [D, C] MXU pass
        logits = jnp.dot(s12_ref[...], cent_dc,
                         preferred_element_type=jnp.float32) * (1.0 / 0.07)
        valid = lax.broadcasted_iota(jnp.int32, (1, c_pad), 1) < num_classes
        logits = jnp.where(valid, logits, -1e30)                # mask padded classes

        # cross entropy (reduction='none'); /N, 0.3/0.7, /2 folded into w2 on host
        m = jnp.max(logits, axis=1, keepdims=True)
        lse = m + jnp.log(jnp.sum(jnp.exp(logits - m), axis=1, keepdims=True))
        tgt_loc = jnp.sum(jnp.where(oh, logits[:n_pad, :], 0.0),
                          axis=1, keepdims=True)                # [N, 1]
        tgt_glb = jnp.sum(jnp.where(oh, logits[n_pad:, :], 0.0),
                          axis=1, keepdims=True)                # [N, 1]
        ce = lse - jnp.concatenate([tgt_loc, tgt_glb], axis=0)  # [2N, 1]

        # lane-dense weights: tiny [1, 2N] @ [2N, 1] pass -> scalar to SMEM
        out_ref[0, 0] = jnp.sum(jnp.dot(w2_ref[...], ce,
                                        preferred_element_type=jnp.float32))


def new_local_global_infonce(S1, S2, segmentation_map, similarity_matrix, num_classes):
    """JAX/Pallas equivalent of newLocalGlobalInfoNCE.forward (returns scalar loss)."""
    N, D = S1.shape
    C = int(num_classes)
    C_pad = _round_up(max(C, 1), 128)          # lane-dense class axis

    N128 = _round_up(max(N, 1), 128)
    TJ = min(512, N128)                        # column-block size
    N_pad = _round_up(N, TJ)
    # keep the [N_pad, TJ] f32 distance intermediate within a few MiB
    while TJ > 128 and N_pad * TJ * 4 > (8 << 20):
        TJ //= 2
        N_pad = _round_up(N, TJ)
    num_j = N_pad // TJ
    pad = N_pad - N

    f32 = jnp.float32
    S1b = jnp.pad(S1.astype(f32), ((0, pad), (0, 0))).astype(jnp.bfloat16)
    S2b = jnp.pad(S2.astype(f32), ((0, pad), (0, 0))).astype(jnp.bfloat16)
    S12 = jnp.concatenate([S1b, S2b], axis=0)                   # [2*N_pad, D] bf16
    S1T = jnp.transpose(S1b)                                    # [D, N_pad] bf16

    # loop-invariant row norms, computed from the same bf16-rounded values the
    # gram matmul sees (keeps a^2 + b^2 - 2ab consistent)
    s1f = S1b.astype(f32)
    sq = jnp.sum(s1f * s1f, axis=1)                             # [N_pad] f32
    sq_col = sq.reshape(N_pad, 1)
    sq_row = sq.reshape(1, N_pad)

    seg_flat = segmentation_map.reshape(-1).astype(jnp.int32)
    # sentinel id C_pad for padded rows -> all-zero one-hot, zero weight
    seg_col = jnp.pad(seg_flat, (0, pad), constant_values=C_pad).reshape(N_pad, 1)

    # per-sample weights with mean / 0.3 / 0.7 / final-halving constants folded in
    sim_w = similarity_matrix.mean(axis=2).reshape(-1).astype(f32)   # [N]
    w_local = jnp.pad(sim_w * ((1.0 - 0.7) / (2.0 * N)), (0, pad))
    w_global = jnp.pad(sim_w * (0.7 / (2.0 * N)), (0, pad))
    w2_row = jnp.concatenate([w_local, w_global], axis=0).reshape(1, 2 * N_pad)

    # TODO(synk): the in-place update of self.prototypes inside compute_centroid is a
    # training-time side effect that does not affect the returned loss; not reproduced.

    # VMEM budget from the actual buffers (inputs are double-buffered by Pallas);
    # clamp to stay under the smallest physical VMEM with headroom.
    lane_pad = 128
    vmem_needed = (
        (2 * N_pad) * D * 2 * 2            # S12 resident bf16
        + D * TJ * 2 * 2                   # S1^T column tile bf16
        + D * N_pad * 2 * 2                # S1^T resident bf16
        + N_pad * lane_pad * 4 * 2         # sq column (lane-padded)
        + 8 * TJ * 4 * 2                   # sq row tile (sublane-padded)
        + TJ * lane_pad * 4 * 2            # seg tile (lane-padded int32)
        + N_pad * lane_pad * 4 * 2         # seg resident
        + 8 * (2 * N_pad) * 4 * 2          # w2 row
        + N_pad * C_pad * 4                # scores scratch
        + 3 * N_pad * TJ * 4               # gram / d2 / dist intermediates
        + 4 * (2 * N_pad) * C_pad * 4      # finalize temporaries (logits, etc.)
    )
    vmem_limit = int(min(max(vmem_needed + (4 << 20), 32 << 20), 96 << 20))

    kernel = functools.partial(_infonce_kernel, n_pad=N_pad, c_pad=C_pad,
                               num_classes=C, tj=TJ)

    out = pl.pallas_call(
        kernel,
        out_shape=jax.ShapeDtypeStruct((1, 1), jnp.float32),
        grid=(num_j,),
        in_specs=[
            pl.BlockSpec((2 * N_pad, D), lambda j: (0, 0)),   # stacked [S1;S2], resident
            pl.BlockSpec((D, TJ), lambda j: (0, j)),          # S1^T column tile
            pl.BlockSpec((D, N_pad), lambda j: (0, 0)),       # S1^T resident (epilogue)
            pl.BlockSpec((N_pad, 1), lambda j: (0, 0)),       # row norms, column
            pl.BlockSpec((1, TJ), lambda j: (0, j)),          # row norms, lane-dense tile
            pl.BlockSpec((TJ, 1), lambda j: (j, 0)),          # seg ids, j tile
            pl.BlockSpec((N_pad, 1), lambda j: (0, 0)),       # seg ids, resident (epilogue)
            pl.BlockSpec((1, 2 * N_pad), lambda j: (0, 0)),   # folded weights, lane-dense
        ],
        out_specs=pl.BlockSpec(memory_space=pltpu.MemorySpace.SMEM),
        scratch_shapes=[pltpu.VMEM((N_pad, C_pad), jnp.float32)],
        compiler_params=pltpu.CompilerParams(
            dimension_semantics=("arbitrary",),
            vmem_limit_bytes=vmem_limit),
    )(S12, S1T, S1T, sq_col, sq_row, seg_col, seg_col, w2_row)
    return out[0, 0]


if __name__ == "__main__":
    key = jax.random.PRNGKey(0)
    k1, k2, k3, k4, k5 = jax.random.split(key, 5)

    B, P = 2, 8          # batch, patches  -> N = 16 samples
    D = 512              # feature dim (fixed by the module: prototypes are (28, 512))
    C = 4                # number of classes present in this example
    K = 8                # similarity_matrix last dim
    N = B * P

    # module parameters (deterministic init; not used in the returned loss value)
    learned_centroids = jax.random.normal(k4, (27 + 1, 512), dtype=jnp.float32)
    prototypes = jax.random.normal(k5, (27 + 1, 512), dtype=jnp.float32)

    S1 = jax.random.normal(k1, (N, D), dtype=jnp.float32)
    S2 = jax.random.normal(k2, (N, D), dtype=jnp.float32)
    # guarantee every class in {0..C-1} appears at least once
    seg = jnp.arange(N, dtype=jnp.int32) % C
    seg = jax.random.permutation(k3, seg).reshape(B, P)
    sim = jax.random.uniform(k3, (B, P, K), dtype=jnp.float32)

    loss = new_local_global_infonce(S1, S2, seg, sim, num_classes=C)
    jax.block_until_ready(loss)
    print("KERNEL_OK")
</pallas_src>

<mosaic_0001>
module attributes {stable_mosaic.version = 11 : i64} {
  func.func @_infonce_kernel(%arg0: i32, %arg1: memref<256x512xbf16, #tpu.memory_space<vmem>>, %arg2: memref<512x128xbf16, #tpu.memory_space<vmem>>, %arg3: memref<512x128xbf16, #tpu.memory_space<vmem>>, %arg4: memref<128x1xf32, #tpu.memory_space<vmem>>, %arg5: memref<1x128xf32, #tpu.memory_space<vmem>>, %arg6: memref<128x1xi32, #tpu.memory_space<vmem>>, %arg7: memref<128x1xi32, #tpu.memory_space<vmem>>, %arg8: memref<1x256xf32, #tpu.memory_space<vmem>>, %arg9: memref<1x1xf32, #tpu.memory_space<smem>>, %arg10: memref<128x128xf32, #tpu.memory_space<vmem>>) attributes {dimension_semantics = [#tpu.dimension_semantics<arbitrary>], iteration_bounds = array<i64: 1>, scalar_prefetch = 0 : i64, scratch_operands = 1 : i64, tpu.core_type = #tpu.core_type<tc>, window_params = [{pipeline_mode = #tpu.pipeline_mode<synchronous>, transform_indices = @transform_0, window_bounds = array<i64: 256, 512>}, {transform_indices = @transform_1, window_bounds = array<i64: 512, 128>}, {pipeline_mode = #tpu.pipeline_mode<synchronous>, transform_indices = @transform_2, window_bounds = array<i64: 512, 128>}, {pipeline_mode = #tpu.pipeline_mode<synchronous>, transform_indices = @transform_3, window_bounds = array<i64: 128, 1>}, {transform_indices = @transform_4, window_bounds = array<i64: 1, 128>}, {transform_indices = @transform_5, window_bounds = array<i64: 128, 1>}, {pipeline_mode = #tpu.pipeline_mode<synchronous>, transform_indices = @transform_6, window_bounds = array<i64: 128, 1>}, {pipeline_mode = #tpu.pipeline_mode<synchronous>, transform_indices = @transform_7, window_bounds = array<i64: 1, 256>}, {transform_indices = @transform_8, window_bounds = array<i64: 1, 1>}]} {
    %c0_i32 = arith.constant 0 : i32
    %0 = arith.cmpi eq, %arg0, %c0_i32 : i32
    %1 = arith.extui %0 : i1 to i32
    %c0_i32_0 = arith.constant 0 : i32
    %2 = arith.cmpi ne, %1, %c0_i32_0 : i32
    scf.if %2 {
      %cst_19 = arith.constant 0.000000e+00 : f32
      %32 = vector.broadcast %cst_19 : f32 to vector<128x128xf32>
      %c0_20 = arith.constant 0 : index
      %c0_21 = arith.constant 0 : index
      %33 = vector.load %arg10[%c0_20, %c0_21] : memref<128x128xf32, #tpu.memory_space<vmem>>, vector<128x128xf32>
      tpu.vector_store %arg10[%c0_20, %c0_21], %32 {strides = array<i32>} : memref<128x128xf32, #tpu.memory_space<vmem>>, vector<128x128xf32>,
    } else {
    }
    %c0 = arith.constant 0 : index
    %c0_1 = arith.constant 0 : index
    %3 = vector.load %arg1[%c0, %c0_1] : memref<256x512xbf16, #tpu.memory_space<vmem>>, vector<128x512xbf16>
    %c0_2 = arith.constant 0 : index
    %c0_3 = arith.constant 0 : index
    %4 = vector.load %arg2[%c0_2, %c0_3] : memref<512x128xbf16, #tpu.memory_space<vmem>>, vector<512x128xbf16>
    %cst = arith.constant dense<0.000000e+00> : vector<128x128xf32>
    %5 = tpu.matmul %3, %4, %cst {dimension_numbers = #tpu.dot_dimension_numbers<[1], [0], [0], [1], [0, 0, 1, 1], [], []>} : vector<128x512xbf16>, vector<512x128xbf16>, vector<128x128xf32> -> vector<128x128xf32>
    %c0_4 = arith.constant 0 : index
    %c0_5 = arith.constant 0 : index
    %6 = vector.load %arg4[%c0_4, %c0_5] : memref<128x1xf32, #tpu.memory_space<vmem>>, vector<128x1xf32>
    %c0_6 = arith.constant 0 : index
    %c0_7 = arith.constant 0 : index
    %7 = vector.load %arg5[%c0_6, %c0_7] : memref<1x128xf32, #tpu.memory_space<vmem>>, vector<1x128xf32>
    %8 = vector.broadcast %6 : vector<128x1xf32> to vector<128x128xf32>
    %9 = vector.broadcast %7 : vector<1x128xf32> to vector<128x128xf32>
    %10 = arith.addf %8, %9 : vector<128x128xf32>
    %cst_8 = arith.constant 2.000000e+00 : f32
    %11 = vector.broadcast %cst_8 : f32 to vector<128x128xf32>
    %12 = arith.mulf %11, %5 : vector<128x128xf32>
    %13 = arith.subf %10, %12 : vector<128x128xf32>
    %cst_9 = arith.constant 0.000000e+00 : f32
    %14 = vector.broadcast %cst_9 : f32 to vector<128x128xf32>
    %15 = arith.maximumf %13, %14 : vector<128x128xf32>
    %16 = math.sqrt %15 : vector<128x128xf32>
    %17 = tpu.iota {dimensions = array<i32: 1>} : vector<128x128xi32>
    %c0_10 = arith.constant 0 : index
    %c0_11 = arith.constant 0 : index
    %18 = vector.load %arg6[%c0_10, %c0_11] : memref<128x1xi32, #tpu.memory_space<vmem>>, vector<128x1xi32>
    %19 = vector.broadcast %18 : vector<128x1xi32> to vector<128x128xi32>
    %20 = arith.cmpi eq, %19, %17 : vector<128x128xi32>
    %21 = arith.extui %20 : vector<128x128xi1> to vector<128x128xi32>
    %22 = arith.sitofp %21 : vector<128x128xi32> to vector<128x128xf32>
    %23 = arith.truncf %22 : vector<128x128xf32> to vector<128x128xbf16>
    %c0_12 = arith.constant 0 : index
    %c0_13 = arith.constant 0 : index
    %24 = vector.load %arg10[%c0_12, %c0_13] : memref<128x128xf32, #tpu.memory_space<vmem>>, vector<128x128xf32>
    %25 = arith.truncf %16 : vector<128x128xf32> to vector<128x128xbf16>
    %cst_14 = arith.constant dense<0.000000e+00> : vector<128x128xf32>
    %26 = tpu.matmul %25, %23, %cst_14 {dimension_numbers = #tpu.dot_dimension_numbers<[1], [0], [0], [1], [0, 0, 1, 1], [], []>} : vector<128x128xbf16>, vector<128x128xbf16>, vector<128x128xf32> -> vector<128x128xf32>
    %27 = arith.addf %24, %26 : vector<128x128xf32>
    %c0_15 = arith.constant 0 : index
    %c0_16 = arith.constant 0 : index
    %28 = vector.load %arg10[%c0_15, %c0_16] : memref<128x128xf32, #tpu.memory_space<vmem>>, vector<128x128xf32>
    tpu.vector_store %arg10[%c0_15, %c0_16], %27 {strides = array<i32>} : memref<128x128xf32, #tpu.memory_space<vmem>>, vector<128x128xf32>,
    %c0_i32_17 = arith.constant 0 : i32
    %29 = arith.cmpi eq, %arg0, %c0_i32_17 : i32
    %30 = arith.extui %29 : i1 to i32
    %c0_i32_18 = arith.constant 0 : i32
    %31 = arith.cmpi ne, %30, %c0_i32_18 : i32
    scf.if %31 {
      %32 = tpu.iota {dimensions = array<i32: 1>} : vector<128x128xi32>
      %c0_19 = arith.constant 0 : index
      %c0_20 = arith.constant 0 : index
      %33 = vector.load %arg7[%c0_19, %c0_20] : memref<128x1xi32, #tpu.memory_space<vmem>>, vector<128x1xi32>
      %34 = vector.broadcast %33 : vector<128x1xi32> to vector<128x128xi32>
      %35 = arith.cmpi eq, %34, %32 : vector<128x128xi32>
      %c0_21 = arith.constant 0 : index
      %c0_22 = arith.constant 0 : index
      %36 = vector.load %arg10[%c0_21, %c0_22] : memref<128x128xf32, #tpu.memory_space<vmem>>, vector<128x128xf32>
      %cst_23 = arith.constant 1.000000e+30 : f32
      %37 = vector.broadcast %cst_23 : f32 to vector<128x128xf32>
      %38 = arith.select %35, %36, %37 : vector<128x128xi1>, vector<128x128xf32>
      %cst_24 = arith.constant dense<0x7F800000> : vector<128xf32>
      %39 = vector.multi_reduction <minimumf>, %38, %cst_24 [0] : vector<128x128xf32> to vector<128xf32>
      %40 = vector.shape_cast %39 : vector<128xf32> to vector<1x128xf32>
      %41 = tpu.iota {dimensions = array<i32: 0>} : vector<128x128xi32>
      %42 = vector.broadcast %40 : vector<1x128xf32> to vector<128x128xf32>
      %43 = arith.cmpf ole, %38, %42 : vector<128x128xf32>
      %c128_i32 = arith.constant 128 : i32
      %44 = vector.broadcast %c128_i32 : i32 to vector<128x128xi32>
      %45 = arith.select %43, %41, %44 : vector<128x128xi1>, vector<128x128xi32>
      %cst_25 = arith.constant dense<2147483647> : vector<128xi32>
      %46 = vector.multi_reduction <minsi>, %45, %cst_25 [0] : vector<128x128xi32> to vector<128xi32>
      %47 = vector.shape_cast %46 : vector<128xi32> to vector<1x128xi32>
      %48 = vector.broadcast %47 : vector<1x128xi32> to vector<128x128xi32>
      %49 = arith.cmpi eq, %41, %48 : vector<128x128xi32>
      %50 = arith.extui %49 : vector<128x128xi1> to vector<128x128xi32>
      %51 = arith.sitofp %50 : vector<128x128xi32> to vector<128x128xf32>
      %52 = arith.truncf %51 : vector<128x128xf32> to vector<128x128xbf16>
      %c0_26 = arith.constant 0 : index
      %c0_27 = arith.constant 0 : index
      %53 = vector.load %arg3[%c0_26, %c0_27] : memref<512x128xbf16, #tpu.memory_space<vmem>>, vector<512x128xbf16>
      %cst_28 = arith.constant dense<0.000000e+00> : vector<512x128xf32>
      %54 = tpu.matmul %53, %52, %cst_28 {dimension_numbers = #tpu.dot_dimension_numbers<[1], [0], [0], [1], [0, 0, 1, 1], [], []>} : vector<512x128xbf16>, vector<128x128xbf16>, vector<512x128xf32> -> vector<512x128xf32>
      %55 = arith.truncf %54 : vector<512x128xf32> to vector<512x128xbf16>
      %c0_29 = arith.constant 0 : index
      %c0_30 = arith.constant 0 : index
      %56 = vector.load %arg1[%c0_29, %c0_30] : memref<256x512xbf16, #tpu.memory_space<vmem>>, vector<256x512xbf16>
      %cst_31 = arith.constant dense<0.000000e+00> : vector<256x128xf32>
      %57 = tpu.matmul %56, %55, %cst_31 {dimension_numbers = #tpu.dot_dimension_numbers<[1], [0], [0], [1], [0, 0, 1, 1], [], []>} : vector<256x512xbf16>, vector<512x128xbf16>, vector<256x128xf32> -> vector<256x128xf32>
      %cst_32 = arith.constant 14.2857141 : f32
      %58 = vector.broadcast %cst_32 : f32 to vector<256x128xf32>
      %59 = arith.mulf %57, %58 : vector<256x128xf32>
      %60 = tpu.iota {dimensions = array<i32: 1>} : vector<1x128xi32>
      %c4_i32 = arith.constant 4 : i32
      %61 = vector.broadcast %c4_i32 : i32 to vector<1x128xi32>
      %62 = arith.cmpi slt, %60, %61 : vector<1x128xi32>
      %cst_33 = arith.constant -1.000000e+30 : f32
      %63 = vector.shape_cast %62 : vector<1x128xi1> to vector<1x128xi1>
      %64 = vector.broadcast %63 : vector<1x128xi1> to vector<256x128xi1>
      %65 = vector.broadcast %cst_33 : f32 to vector<256x128xf32>
      %66 = arith.select %64, %59, %65 : vector<256x128xi1>, vector<256x128xf32>
      %cst_34 = arith.constant dense<0xFF800000> : vector<256xf32>
      %67 = vector.multi_reduction <maximumf>, %66, %cst_34 [1] : vector<256x128xf32> to vector<256xf32>
      %68 = vector.shape_cast %67 : vector<256xf32> to vector<256x1xf32>
      %69 = vector.broadcast %68 : vector<256x1xf32> to vector<256x128xf32>
      %70 = arith.subf %66, %69 : vector<256x128xf32>
      %71 = math.exp %70 : vector<256x128xf32>
      %cst_35 = arith.constant dense<0.000000e+00> : vector<256xf32>
      %72 = vector.multi_reduction <add>, %71, %cst_35 [1] : vector<256x128xf32> to vector<256xf32>
      %73 = vector.shape_cast %72 : vector<256xf32> to vector<256x1xf32>
      %74 = math.log %73 : vector<256x1xf32>
      %75 = arith.addf %68, %74 : vector<256x1xf32>
      %76 = vector.extract_strided_slice %66 {offsets = [0, 0], sizes = [128, 128], strides = [1, 1]} : vector<256x128xf32> to vector<128x128xf32>
      %cst_36 = arith.constant 0.000000e+00 : f32
      %77 = vector.broadcast %cst_36 : f32 to vector<128x128xf32>
      %78 = arith.select %35, %76, %77 : vector<128x128xi1>, vector<128x128xf32>
      %cst_37 = arith.constant dense<0.000000e+00> : vector<128xf32>
      %79 = vector.multi_reduction <add>, %78, %cst_37 [1] : vector<128x128xf32> to vector<128xf32>
      %80 = vector.shape_cast %79 : vector<128xf32> to vector<128x1xf32>
      %81 = vector.extract_strided_slice %66 {offsets = [128, 0], sizes = [128, 128], strides = [1, 1]} : vector<256x128xf32> to vector<128x128xf32>
      %cst_38 = arith.constant 0.000000e+00 : f32
      %82 = vector.broadcast %cst_38 : f32 to vector<128x128xf32>
      %83 = arith.select %35, %81, %82 : vector<128x128xi1>, vector<128x128xf32>
      %cst_39 = arith.constant dense<0.000000e+00> : vector<128xf32>
      %84 = vector.multi_reduction <add>, %83, %cst_39 [1] : vector<128x128xf32> to vector<128xf32>
      %85 = vector.shape_cast %84 : vector<128xf32> to vector<128x1xf32>
      %86 = tpu.concatenate %80, %85 in 0 : vector<128x1xf32>, vector<128x1xf32> -> vector<256x1xf32>
      %87 = arith.subf %75, %86 : vector<256x1xf32>
      %c0_40 = arith.constant 0 : index
      %c0_41 = arith.constant 0 : index
      %88 = vector.load %arg8[%c0_40, %c0_41] : memref<1x256xf32, #tpu.memory_space<vmem>>, vector<1x256xf32>
      %cst_42 = arith.constant dense<0.000000e+00> : vector<1x1xf32>
      %89 = tpu.matmul %88, %87, %cst_42 {dimension_numbers = #tpu.dot_dimension_numbers<[1], [0], [0], [1], [0, 0, 1, 1], [], []>} : vector<1x256xf32>, vector<256x1xf32>, vector<1x1xf32> -> vector<1x1xf32>
      %90 = vector.shape_cast %89 : vector<1x1xf32> to vector<1x1x1xf32>
      %cst_43 = arith.constant dense<0.000000e+00> : vector<1xf32>
      %91 = vector.multi_reduction <add>, %90, %cst_43 [1, 2] : vector<1x1x1xf32> to vector<1xf32>
      %92 = vector.shape_cast %91 : vector<1xf32> to vector<1x1x1xf32>
      %93 = vector.extract %92[0, 0, 0] : f32 from vector<1x1x1xf32>
      %c0_44 = arith.constant 0 : index
      %c0_45 = arith.constant 0 : index
      %94 = memref.load %arg9[%c0_44, %c0_45] : memref<1x1xf32, #tpu.memory_space<smem>>
      memref.store %93, %arg9[%c0_44, %c0_45] : memref<1x1xf32, #tpu.memory_space<smem>>
    } else {
    }
    return
  }
  func.func @transform_0(%arg0: i32) -> (i32, i32) {
    %c0_i32 = arith.constant 0 : i32
    %c0_i32_0 = arith.constant 0 : i32
    %c0_i32_1 = arith.constant 0 : i32
    return %c0_i32, %c0_i32_0 : i32, i32
  }
  func.func @transform_1(%arg0: i32) -> (i32, i32) {
    %c0_i32 = arith.constant 0 : i32
    %c0_i32_0 = arith.constant 0 : i32
    return %c0_i32, %arg0 : i32, i32
  }
  func.func @transform_2(%arg0: i32) -> (i32, i32) {
    %c0_i32 = arith.constant 0 : i32
    %c0_i32_0 = arith.constant 0 : i32
    %c0_i32_1 = arith.constant 0 : i32
    return %c0_i32, %c0_i32_0 : i32, i32
  }
  func.func @transform_3(%arg0: i32) -> (i32, i32) {
    %c0_i32 = arith.constant 0 : i32
    %c0_i32_0 = arith.constant 0 : i32
    %c0_i32_1 = arith.constant 0 : i32
    return %c0_i32, %c0_i32_0 : i32, i32
  }
  func.func @transform_4(%arg0: i32) -> (i32, i32) {
    %c0_i32 = arith.constant 0 : i32
    %c0_i32_0 = arith.constant 0 : i32
    return %c0_i32, %arg0 : i32, i32
  }
  func.func @transform_5(%arg0: i32) -> (i32, i32) {
    %c0_i32 = arith.constant 0 : i32
    %c0_i32_0 = arith.constant 0 : i32
    return %arg0, %c0_i32 : i32, i32
  }
  func.func @transform_6(%arg0: i32) -> (i32, i32) {
    %c0_i32 = arith.constant 0 : i32
    %c0_i32_0 = arith.constant 0 : i32
    %c0_i32_1 = arith.constant 0 : i32
    return %c0_i32, %c0_i32_0 : i32, i32
  }
  func.func @transform_7(%arg0: i32) -> (i32, i32) {
    %c0_i32 = arith.constant 0 : i32
    %c0_i32_0 = arith.constant 0 : i32
    %c0_i32_1 = arith.constant 0 : i32
    return %c0_i32, %c0_i32_0 : i32, i32
  }
  func.func @transform_8(%arg0: i32) -> (i32, i32) {
    %c0_i32 = arith.constant 0 : i32
    %c0_i32_0 = arith.constant 0 : i32
    %c0_i32_1 = arith.constant 0 : i32
    return %c0_i32, %c0_i32_0 : i32, i32
  }
}

</mosaic_0001>

<bundles_post_ra>
// kernel: tpu_custom_call.1
= control target key start
LH: loop header
LB: loop body
LE: loop exit
PB: predicated region body
PF: predicated region fallthrough
CT: control target
= control target key end

     0   :  { %13 = vsyncpa [#allocation4], 0  ;;  %s6257_s0 = inlined_call_operand.hbm [shape: bf16[256,512], index: 0, kind: input, shape index: {}]   ;;  %s6258_s1 = inlined_call_operand.vmem [shape: bf16[512,128], index: 1, kind: input, shape index: {}]   ;;  %s6259_s2 = inlined_call_operand.hbm [shape: bf16[512,128], index: 2, kind: input, shape index: {}]   ;;  %s6260_s3 = inlined_call_operand.vmem [shape: f32[128,1], index: 3, kind: input, shape index: {}]   ;;  %s6261_s4 = inlined_call_operand.vmem [shape: f32[1,128], index: 4, kind: input, shape index: {}]   ;;  %s6262_s5 = inlined_call_operand.vmem [shape: s32[128,1], index: 5, kind: input, shape index: {}]   ;;  %s6263_s6 = inlined_call_operand.vmem [shape: s32[128,1], index: 6, kind: input, shape index: {}]   ;;  %s6264_s7 = inlined_call_operand.vmem [shape: f32[1,256], index: 7, kind: input, shape index: {}]   ;;  %s6265_s8 = inlined_call_operand.hbm [shape: f32[1,1], index: 8, kind: output, shape index: {}]  }
   0x1   :  { %14 = vsyncpa [#allocation7], 0 }
   0x2   :  { %15 = vsyncpa [#allocation5], 0  ;;  %s4723_s27 = smov [#allocation3]   ;;  %s4663_s9 = scalar_lea.hbm %s6257_s0, 8192 }
   0x3   :  { %s21_s28 = sshll.u32 %s4723_s27, 4  ;;  %p4664_p0 = scmp.ne.s32.totalorder %s6257_s0, %s4663_s9  ;;  %s22_s28 = int_to_ptr.vmem [resolvable:$true] %s21_s28 }
   0x4   :  { %p4667_p1 = scmp.lt.u32.totalorder %s4663_s9, %s6257_s0 }
   0x6   :  { %p4669_p2 = pnand %p4667_p1, %p4664_p0 }
   0x8   :  { %4672 = shalt.err (!%p4669_p2)
}
   0x9   :  { %s4673_s14 = scalar_lea.vmem %s22_s28, 8192  ;;  %p4678_p4 = scmp.lt.s32.totalorder %s22_s28, %s22_s28 }
   0xa   :  { %p4674_p3 = scmp.ne.s32.totalorder %s22_s28, %s4673_s14  ;;  %p4679_p5 = scmp.lt.s32.totalorder %s4673_s14, %s4673_s14 }
   0xc   :  { %p4680_p6 = por %p4679_p5, %p4678_p4 }
   0xe   :  { %p4681_p7 = pnand %p4680_p6, %p4674_p3 }
  0x10   :  { %4684 = shalt.err (!%p4681_p7)
}
  0x11   :  { %s4724_s15 = smov 256   ;;  %s4725_s16 = smov 16  }
  0x12   :  { %27 = dma.hbm_to_vmem [thread:$0]  %s6257_s0, 8192, %s22_s28, [#allocation4], %s4724_s15, %s4724_s15, %s4725_s16  }
  0x13   :  { %s4726_s19 = smov [#allocation6]   ;;  %s4685_s23 = scalar_lea.hbm %s6259_s2, 4096 }
  0x14   :  { %s35_s20 = sshll.u32 %s4726_s19, 4  ;;  %p4686_p8 = scmp.ne.s32.totalorder %s6259_s2, %s4685_s23  ;;  %s36_s20 = int_to_ptr.vmem [resolvable:$true] %s35_s20 }
  0x15   :  { %p4689_p9 = scmp.lt.u32.totalorder %s4685_s23, %s6259_s2 }
  0x17   :  { %p4691_p10 = pnand %p4689_p9, %p4686_p8 }
  0x19   :  { %4694 = shalt.err (!%p4691_p10)
}
  0x1a   :  { %s4695_s29 = scalar_lea.vmem %s36_s20, 4096  ;;  %p4700_p12 = scmp.lt.s32.totalorder %s36_s20, %s36_s20 }
  0x1b   :  { %p4696_p11 = scmp.ne.s32.totalorder %s36_s20, %s4695_s29  ;;  %p4701_p13 = scmp.lt.s32.totalorder %s4695_s29, %s4695_s29 }
  0x1d   :  { %p4702_p0 = por %p4701_p13, %p4700_p12 }
  0x1f   :  { %p4703_p1 = pnand %p4702_p0, %p4696_p11 }
  0x21   :  { %4706 = shalt.err (!%p4703_p1)
}
  0x22   :  { %s4727_s0 = smov 64   ;;  %s4728_s28 = smov 4  }
  0x23   :  { %41 = dma.hbm_to_vmem [thread:$0]  %s6259_s2, 4096, %s36_s20, [#allocation7], %s4727_s0, %s4727_s0, %s4728_s28  }
  0x24   :  { %4717 = dma.done.wait [#allocation4], 8192  }
  0x25   :  { %4718 = vsyncadd [#allocation4], 4294959104 }
  0x26   :  { %4719 = dma.done.wait [#allocation7], 4096  }
  0x27   :  { %4720 = vsyncadd [#allocation7], 4294963200  ;;  %v4729_v0 = vmov 0   ;;  %v4295_v1 = vld [vmem:[%s6258_s1 + $0x40] sm:$0xff]   ;;  %v4299_v5 = vld [vmem:[%s6258_s1 + $0x48] sm:$0xff]   ;;  %s4707_s21 = scalar_lea.hbm %s6265_s8, 16 }
  0x28   :  { %4294 = vset.pattern.permute.xlu1 %v4729_v0  ;;  %4293 = vset.pattern.permute.xlu0 %v4729_v0  ;;  %v4296_v2 = vld [vmem:[%s6258_s1 + $0xc0] sm:$0xff]   ;;  %v4300_v6 = vld [vmem:[%s6258_s1 + $0xc8] sm:$0xff]   ;;  %v4303_v9 = vld [vmem:[%s6258_s1 + $0x50] sm:$0xff]   ;;  %p4708_p2 = scmp.ne.s32.totalorder %s6265_s8, %s4707_s21  ;;  %p4711_p3 = scmp.lt.u32.totalorder %s4707_s21, %s6265_s8 }
  0x29   :  { %3679 = vmatprep.subr.bf16.mxu0 %v4295_v1  ;;  %v4297_v3 = vld [vmem:[%s6258_s1] sm:$0xff]   ;;  %3743 = vmatprep.subr.bf16.mxu1 %v4296_v2  ;;  %v4301_v7 = vld [vmem:[%s6258_s1 + $0x8] sm:$0xff]   ;;  %v4304_v10 = vld [vmem:[%s6258_s1 + $0xd0] sm:$0xff]  }
  0x2a   :  { %v4298_v4 = vld [vmem:[%s6258_s1 + $0x80] sm:$0xff]   ;;  %3680 = vmatpush3.bf16.msra.mxu0 %v4297_v3  ;;  %v4302_v8 = vld [vmem:[%s6258_s1 + $0x88] sm:$0xff]   ;;  %v4305_v11 = vld [vmem:[%s6258_s1 + $0x10] sm:$0xff]   ;;  %p4713_p4 = pnand %p4711_p3, %p4708_p2 }
  0x2b   :  { %3744 = vmatpush3.bf16.msra.mxu1 %v4298_v4  ;;  %3681 = vmatprep.subr.bf16.mxu0 %v4299_v5  ;;  %v4306_v12 = vld [vmem:[%s6258_s1 + $0x90] sm:$0xff]   ;;  %v4307_v13 = vld [vmem:[%s6258_s1 + $0x58] sm:$0xff]   ;;  %v4311_v17 = vld [vmem:[%s6258_s1 + $0x60] sm:$0xff]  }
  0x2c   :  { %3745 = vmatprep.subr.bf16.mxu1 %v4300_v6  ;;  %v4308_v14 = vld [vmem:[%s6258_s1 + $0xd8] sm:$0xff]   ;;  %v4312_v18 = vld [vmem:[%s6258_s1 + $0xe0] sm:$0xff]   ;;  %v4315_v21 = vld [vmem:[%s6258_s1 + $0x68] sm:$0xff]  }
  0x2d   :  { %v4309_v15 = vld [vmem:[%s6258_s1 + $0x18] sm:$0xff]   ;;  %v4313_v19 = vld [vmem:[%s6258_s1 + $0x20] sm:$0xff]   ;;  %v4316_v22 = vld [vmem:[%s6258_s1 + $0xe8] sm:$0xff]  }
  0x2e   :  { %3682 = vmatpush3.bf16.msra.mxu0 %v4301_v7  ;;  %v4310_v16 = vld [vmem:[%s6258_s1 + $0x98] sm:$0xff]   ;;  %v4314_v20 = vld [vmem:[%s6258_s1 + $0xa0] sm:$0xff]   ;;  %v4317_v23 = vld [vmem:[%s6258_s1 + $0x28] sm:$0xff]  }
  0x2f   :  { %3746 = vmatpush3.bf16.msra.mxu1 %v4302_v8  ;;  %3683 = vmatprep.subr.bf16.mxu0 %v4303_v9  ;;  %v4318_v24 = vld [vmem:[%s6258_s1 + $0xa8] sm:$0xff]   ;;  %v4319_v25 = vld [vmem:[%s6258_s1 + $0x70] sm:$0xff]   ;;  %v1002_v30 = vld [vmem:[%s6262_s5] sm:$0xff] }
  0x30   :  { %3747 = vmatprep.subr.bf16.mxu1 %v4304_v10  ;;  %v4320_v26 = vld [vmem:[%s6258_s1 + $0xf0] sm:$0xff]   ;;  %v4323_v31 = vld [vmem:[%s6258_s1 + $0x78] sm:$0xff]   ;;  %1019 = vperm.xlu0 %4293, %v1002_v30   ;;  %v1003_v36 = vld [vmem:[%s6262_s5 + $0x8] sm:$0xff] }
  0x31   :  { %v4321_v27 = vld [vmem:[%s6258_s1 + $0x30] sm:$0xff]   ;;  %v4324_v32 = vld [vmem:[%s6258_s1 + $0xf8] sm:$0xff]   ;;  %v1007_v41 = vld [vmem:[%s6262_s5 + $0x28] sm:$0xff] }
  0x32   :  { %3684 = vmatpush3.bf16.msra.mxu0 %v4305_v11  ;;  %v4322_v28 = vld [vmem:[%s6258_s1 + $0xb0] sm:$0xff]   ;;  %v4325_v33 = vld [vmem:[%s6258_s1 + $0x38] sm:$0xff]   ;;  %v1006_v42 = vld [vmem:[%s6262_s5 + $0x20] sm:$0xff] }
  0x33   :  { %3748 = vmatpush3.bf16.msra.mxu1 %v4306_v12  ;;  %3685 = vmatprep.subr.bf16.mxu0 %v4307_v13  ;;  %v1004_v29 = vld [vmem:[%s6262_s5 + $0x10] sm:$0xff]  ;;  %v4326_v34 = vld [vmem:[%s6258_s1 + $0xb8] sm:$0xff]   ;;  %v722_v44 = vld [vmem:[%s6260_s3 + $0x8] sm:$0xff] }
  0x34   :  { %3749 = vmatprep.subr.bf16.mxu1 %v4308_v14  ;;  %1025 = vperm.xlu1 %4294, %v1004_v29   ;;  %v1005_v35 = vld [vmem:[%s6262_s5 + $0x18] sm:$0xff]  ;;  %v4327_v37 = vld [vmem:[#allocation3] ss:$16 sps:$4 sm:$0xff]   ;;  %v4329_v38 = vld [vmem:[#allocation3 + $0x4] ss:$16 sps:$4 sm:$0xff]  }
  0x35   :  { %1022 = vperm.xlu0 %4293, %v1003_v36   ;;  %v4330_v39 = vld [vmem:[#allocation3 + $0x8] ss:$16 sps:$4 sm:$0xff]   ;;  %v4332_v40 = vld [vmem:[#allocation3 + $0xc] ss:$16 sps:$4 sm:$0xff]   ;;  %559 = vmatprep.mubr.bf16.mxu0 %v4329_v38  ;;  %v4333_v43 = vld [vmem:[#allocation3 + $0x24] ss:$16 sps:$4 sm:$0xff]  }
  0x36   :  { %3686 = vmatpush3.bf16.msra.mxu0 %v4309_v15  ;;  %656 = vmatprep.mubr.bf16.mxu1 %v4332_v40  ;;  %v4335_v45 = vld [vmem:[#allocation3 + $0x2c] ss:$16 sps:$4 sm:$0xff]   ;;  %v721_v46 = vld [vmem:[%s6260_s3] sm:$0xff]  ;;  %v4338_v48 = vld [vmem:[#allocation3 + $0x28] ss:$16 sps:$4 sm:$0xff]  }
  0x37   :  { %3750 = vmatpush3.bf16.msra.mxu1 %v4310_v16  ;;  %3687 = vmatprep.subr.bf16.mxu0 %v4311_v17  ;;  %v4337_v47 = vld [vmem:[#allocation3 + $0x20] ss:$16 sps:$4 sm:$0xff]   ;;  %v724_v49 = vld [vmem:[%s6260_s3 + $0x18] sm:$0xff]  ;;  %v4339_v50 = vld [vmem:[#allocation3 + $0x44] ss:$16 sps:$4 sm:$0xff]  }
  0x38   :  { %3751 = vmatprep.subr.bf16.mxu1 %v4312_v18  ;;  %1028 = vperm.xlu1 %4294, %v1005_v35   ;;  %v723_v51 = vld [vmem:[%s6260_s3 + $0x10] sm:$0xff]  ;;  %v4341_v52 = vld [vmem:[#allocation3 + $0x4c] ss:$16 sps:$4 sm:$0xff]   ;;  %v4344_v56 = vld [vmem:[#allocation3 + $0x48] ss:$16 sps:$4 sm:$0xff]  }
  0x39   :  { %1031 = vperm.xlu0 %4293, %v1006_v42   ;;  %v1009_v53 = vld [vmem:[%s6262_s5 + $0x38] sm:$0xff]  ;;  %v1008_v54 = vld [vmem:[%s6262_s5 + $0x30] sm:$0xff]  ;;  %v1011_v57 = vld [vmem:[%s6262_s5 + $0x48] sm:$0xff] }
  0x3a   :  { %3688 = vmatpush3.bf16.msra.mxu0 %v4313_v19  ;;  %v4343_v55 = vld [vmem:[#allocation3 + $0x40] ss:$16 sps:$4 sm:$0xff]   ;;  %v4345_v58 = vld [vmem:[#allocation3 + $0x64] ss:$16 sps:$4 sm:$0xff]   ;;  %v4347_v60 = vld [vmem:[#allocation3 + $0x6c] ss:$16 sps:$4 sm:$0xff]  }
  0x3b   :  { %3752 = vmatpush3.bf16.msra.mxu1 %v4314_v20  ;;  %3689 = vmatprep.subr.bf16.mxu0 %v4315_v21  ;;  %v1010_v59 = vld [vmem:[%s6262_s5 + $0x40] sm:$0xff]  ;;  %v726_v61 = vld [vmem:[%s6260_s3 + $0x28] sm:$0xff]  ;;  %v728_v1 = vld [vmem:[%s6260_s3 + $0x38] sm:$0xff] }
  0x3c   :  { %3753 = vmatprep.subr.bf16.mxu1 %v4316_v22  ;;  %1034 = vperm.xlu1 %4294, %v1007_v41   ;;  %v725_v62 = vld [vmem:[%s6260_s3 + $0x20] sm:$0xff]  ;;  %v4350_v0 = vld [vmem:[#allocation3 + $0x68] ss:$16 sps:$4 sm:$0xff]   ;;  %v727_v3 = vld [vmem:[%s6260_s3 + $0x30] sm:$0xff] }
  0x3d   :  { %740 = vperm.xlu0 %4293, %v721_v46   ;;  %v4349_v63 = vld [vmem:[#allocation3 + $0x60] ss:$16 sps:$4 sm:$0xff]   ;;  %v4351_v2 = vld [vmem:[#allocation3 + $0x84] ss:$16 sps:$4 sm:$0xff]   ;;  %v4353_v4 = vld [vmem:[#allocation3 + $0x8c] ss:$16 sps:$4 sm:$0xff]  }
  0x3e   :  { %3690 = vmatpush3.bf16.msra.mxu0 %v4317_v23  ;;  %v1013_v5 = vld [vmem:[%s6262_s5 + $0x58] sm:$0xff]  ;;  %v1012_v6 = vld [vmem:[%s6262_s5 + $0x50] sm:$0xff]  ;;  %v1015_v9 = vld [vmem:[%s6262_s5 + $0x68] sm:$0xff] }
  0x3f   :  { %3754 = vmatpush3.bf16.msra.mxu1 %v4318_v24  ;;  %3691 = vmatprep.subr.bf16.mxu0 %v4319_v25  ;;  %v4355_v7 = vld [vmem:[#allocation3 + $0x80] ss:$16 sps:$4 sm:$0xff]   ;;  %v4356_v8 = vld [vmem:[#allocation3 + $0x88] ss:$16 sps:$4 sm:$0xff]   ;;  %v4357_v10 = vld [vmem:[#allocation3 + $0xa4] ss:$16 sps:$4 sm:$0xff]  }
  0x40   :  { %3755 = vmatprep.subr.bf16.mxu1 %v4320_v26  ;;  %745 = vperm.xlu1 %4294, %v722_v44   ;;  %v1014_v11 = vld [vmem:[%s6262_s5 + $0x60] sm:$0xff]  ;;  %v4359_v12 = vld [vmem:[#allocation3 + $0xac] ss:$16 sps:$4 sm:$0xff]   ;;  %v4362_v16 = vld [vmem:[#allocation3 + $0xa8] ss:$16 sps:$4 sm:$0xff]  }
  0x41   :  { %750 = vperm.xlu0 %4293, %v723_v51   ;;  %v730_v13 = vld [vmem:[%s6260_s3 + $0x48] sm:$0xff]  ;;  %v729_v14 = vld [vmem:[%s6260_s3 + $0x40] sm:$0xff]  ;;  %v732_v17 = vld [vmem:[%s6260_s3 + $0x58] sm:$0xff] }
  0x42   :  { %3692 = vmatpush3.bf16.msra.mxu0 %v4321_v27  ;;  %v4361_v15 = vld [vmem:[#allocation3 + $0xa0] ss:$16 sps:$4 sm:$0xff]   ;;  %v4363_v18 = vld [vmem:[#allocation3 + $0xc4] ss:$16 sps:$4 sm:$0xff]   ;;  %v4365_v20 = vld [vmem:[#allocation3 + $0xcc] ss:$16 sps:$4 sm:$0xff]  }
  0x43   :  { %3756 = vmatpush3.bf16.msra.mxu1 %v4322_v28  ;;  %3693 = vmatprep.subr.bf16.mxu0 %v4323_v31  ;;  %v731_v19 = vld [vmem:[%s6260_s3 + $0x50] sm:$0xff]  ;;  %v1017_v21 = vld [vmem:[%s6262_s5 + $0x78] sm:$0xff]  ;;  %v734_v25 = vld [vmem:[%s6260_s3 + $0x68] sm:$0xff] }
  0x44   :  { %3757 = vmatprep.subr.bf16.mxu1 %v4324_v32  ;;  %755 = vperm.xlu1 %4294, %v724_v49   ;;  %v1016_v22 = vld [vmem:[%s6262_s5 + $0x70] sm:$0xff]  ;;  %v4368_v24 = vld [vmem:[#allocation3 + $0xc8] ss:$16 sps:$4 sm:$0xff]   ;;  %v733_v27 = vld [vmem:[%s6260_s3 + $0x60] sm:$0xff]  ;;  %v1000_v49 = vlaneseq }
  0x45   :  { %1037 = vperm.xlu0 %4293, %v1008_v54   ;;  %v4367_v23 = vld [vmem:[#allocation3 + $0xc0] ss:$16 sps:$4 sm:$0xff]   ;;  %v4369_v26 = vld [vmem:[#allocation3 + $0xe4] ss:$16 sps:$4 sm:$0xff]   ;;  %v4371_v28 = vld [vmem:[#allocation3 + $0xec] ss:$16 sps:$4 sm:$0xff]  }
  0x46   :  { %3694 = vmatpush3.bf16.msra.mxu0 %v4325_v33  ;;  %v736_v29 = vld [vmem:[%s6260_s3 + $0x78] sm:$0xff]  ;;  %v735_v30 = vld [vmem:[%s6260_s3 + $0x70] sm:$0xff]  ;;  %v1279_v33 = vld [vmem:[%s6263_s6 + $0x8] sm:$0xff] }
  0x47   :  { %3758 = vmatpush3.bf16.msra.mxu1 %v4326_v34  ;;  %v4373_v31 = vld [vmem:[#allocation3 + $0xe0] ss:$16 sps:$4 sm:$0xff]   ;;  %v4374_v32 = vld [vmem:[#allocation3 + $0xe8] ss:$16 sps:$4 sm:$0xff]  }
  0x48   :  { %1040 = vperm.xlu1 %4294, %v1009_v53   ;;  %v1278_v34 = vld [vmem:[%s6263_s6] sm:$0xff]  ;;  %v1281_v35 = vld [vmem:[%s6263_s6 + $0x18] sm:$0xff]  ;;  %v1280_v36 = vld [vmem:[%s6263_s6 + $0x10] sm:$0xff] }
  0x49   :  { %560 = vmatmul.mubr.bf16.vlgmr.msra.gmra.mrb[0].mxu0 %v4327_v37  ;;  %1043 = vperm.xlu0 %4293, %v1010_v59   ;;  %v1283_v37 = vld [vmem:[%s6263_s6 + $0x28] sm:$0xff]  ;;  %v1282_v38 = vld [vmem:[%s6263_s6 + $0x20] sm:$0xff]  ;;  %v1284_v40 = vld [vmem:[%s6263_s6 + $0x30] sm:$0xff] }
  0x4a   :  { %657 = vmatmul.mubr.bf16.vlgmr.msra.gmra.mrb[0].mxu1 %v4330_v39  ;;  %567 = vmatprep.mubr.bf16.mxu0 %v4333_v43  ;;  %v1285_v39 = vld [vmem:[%s6263_s6 + $0x38] sm:$0xff]  ;;  %v1287_v41 = vld [vmem:[%s6263_s6 + $0x48] sm:$0xff]  ;;  %v1286_v42 = vld [vmem:[%s6263_s6 + $0x40] sm:$0xff] }
  0x4b   :  { %664 = vmatprep.mubr.bf16.mxu1 %v4335_v45  ;;  %v1289_v43 = vld [vmem:[%s6263_s6 + $0x58] sm:$0xff]  ;;  %v1288_v44 = vld [vmem:[%s6263_s6 + $0x50] sm:$0xff]  ;;  %v1291_v45 = vld [vmem:[%s6263_s6 + $0x68] sm:$0xff] }
  0x4c   :  { %1046 = vperm.xlu1 %4294, %v1011_v57   ;;  %v1290_v46 = vld [vmem:[%s6263_s6 + $0x60] sm:$0xff] }
  0x4d   :  { %760 = vperm.xlu0 %4293, %v725_v62  }
  0x50   :  { %765 = vperm.xlu1 %4294, %v726_v61  }
  0x51   :  { %568 = vmatmul.mubr.bf16.gmra.mrb[4].mxu0 %v4337_v47  ;;  %770 = vperm.xlu0 %4293, %v727_v3   ;;  %v1293_v47 = vld [vmem:[%s6263_s6 + $0x78] sm:$0xff] }
  0x52   :  { %665 = vmatmul.mubr.bf16.gmra.mrb[4].mxu1 %v4338_v48  ;;  %575 = vmatprep.mubr.bf16.mxu0 %v4339_v50  ;;  %v1292_v48 = vld [vmem:[%s6263_s6 + $0x70] sm:$0xff]  ;;  %v5042_v50 = vand.u32 127, %v1000_v49 }
  0x53   :  { %672 = vmatprep.mubr.bf16.mxu1 %v4341_v52 }
  0x54   :  { %775 = vperm.xlu1 %4294, %v728_v1  }
  0x55   :  { %1049 = vperm.xlu0 %4293, %v1012_v6  }
  0x58   :  { %1052 = vperm.xlu1 %4294, %v1013_v5  }
  0x59   :  { %576 = vmatmul.mubr.bf16.gmra.mrb[8].mxu0 %v4343_v55  ;;  %1055 = vperm.xlu0 %4293, %v1014_v11   ;;  %v4730_v55 = vmov 1.0|1.0  }
  0x5a   :  { %673 = vmatmul.mubr.bf16.gmra.mrb[8].mxu1 %v4344_v56  ;;  %583 = vmatprep.mubr.bf16.mxu0 %v4345_v58 }
  0x5b   :  { %680 = vmatprep.mubr.bf16.mxu1 %v4347_v60 }
  0x5c   :  { %1058 = vperm.xlu1 %4294, %v1015_v9  }
  0x5d   :  { %780 = vperm.xlu0 %4293, %v729_v14  }
  0x60   :  { %785 = vperm.xlu1 %4294, %v730_v13  }
  0x61   :  { %584 = vmatmul.mubr.bf16.gmra.mrb[12].mxu0 %v4349_v63  ;;  %790 = vperm.xlu0 %4293, %v731_v19  }
  0x62   :  { %681 = vmatmul.mubr.bf16.gmra.mrb[12].mxu1 %v4350_v0  ;;  %591 = vmatprep.mubr.bf16.mxu0 %v4351_v2 }
  0x63   :  { %688 = vmatprep.mubr.bf16.mxu1 %v4353_v4 }
  0x64   :  { %795 = vperm.xlu1 %4294, %v732_v17  }
  0x65   :  { %1061 = vperm.xlu0 %4293, %v1016_v22  }
  0x68   :  { %1064 = vperm.xlu1 %4294, %v1017_v21  }
  0x69   :  { %592 = vmatmul.mubr.bf16.gmra.mrb[16].mxu0 %v4355_v7  ;;  %800 = vperm.xlu0 %4293, %v733_v27  }
  0x6a   :  { %689 = vmatmul.mubr.bf16.gmra.mrb[16].mxu1 %v4356_v8  ;;  %599 = vmatprep.mubr.bf16.mxu0 %v4357_v10 }
  0x6b   :  { %696 = vmatprep.mubr.bf16.mxu1 %v4359_v12 }
  0x6c   :  { %805 = vperm.xlu1 %4294, %v734_v25  }
  0x6d   :  { %810 = vperm.xlu0 %4293, %v735_v30  }
  0x70   :  { %815 = vperm.xlu1 %4294, %v736_v29  }
  0x71   :  { %600 = vmatmul.mubr.bf16.gmra.mrb[20].mxu0 %v4361_v15  ;;  %1295 = vperm.xlu0 %4293, %v1278_v34  }
  0x72   :  { %697 = vmatmul.mubr.bf16.gmra.mrb[20].mxu1 %v4362_v16  ;;  %607 = vmatprep.mubr.bf16.mxu0 %v4363_v18 }
  0x73   :  { %704 = vmatprep.mubr.bf16.mxu1 %v4365_v20 }
  0x74   :  { %1298 = vperm.xlu1 %4294, %v1279_v33  }
  0x75   :  { %1301 = vperm.xlu0 %4293, %v1280_v36  }
  0x78   :  { %1304 = vperm.xlu1 %4294, %v1281_v35  }
  0x79   :  { %608 = vmatmul.mubr.bf16.gmra.mrb[24].mxu0 %v4367_v23  ;;  %1307 = vperm.xlu0 %4293, %v1282_v38  }
  0x7a   :  { %705 = vmatmul.mubr.bf16.gmra.mrb[24].mxu1 %v4368_v24  ;;  %615 = vmatprep.mubr.bf16.mxu0 %v4369_v26  ;;  %v5101_v24 = vld [vmem:[%s6261_s4] ss:$0 sm:$0xff] }
  0x7b   :  { %712 = vmatprep.mubr.bf16.mxu1 %v4371_v28 }
  0x7c   :  { %1310 = vperm.xlu1 %4294, %v1283_v37  }
  0x7d   :  { %1313 = vperm.xlu0 %4293, %v1284_v40  }
  0x80   :  { %1316 = vperm.xlu1 %4294, %v1285_v39  }
  0x81   :  { %616 = vmatmul.mubr.bf16.gmra.mrb[28].mxu0 %v4373_v31  ;;  %1319 = vperm.xlu0 %4293, %v1286_v42  }
  0x82   :  { %713 = vmatmul.mubr.bf16.gmra.mrb[28].mxu1 %v4374_v32 }
  0x84   :  { %1322 = vperm.xlu1 %4294, %v1287_v41  }
  0x85   :  { %1325 = vperm.xlu0 %4293, %v1288_v44  }
  0x88   :  { %1328 = vperm.xlu1 %4294, %v1289_v43  }
  0x89   :  { %1331 = vperm.xlu0 %4293, %v1290_v46  }
  0x8c   :  { %1334 = vperm.xlu1 %4294, %v1291_v45  }
  0x8d   :  { %1337 = vperm.xlu0 %4293, %v1292_v48  }
  0x90   :  { %1340 = vperm.xlu1 %4294, %v1293_v47  }
  0xaf   :  { %v1020_v52 = vpop.permute.xlu0 %1019 }
  0xb0   :  { %vm1066_vm1 = vcmp.eq.s32.totalorder %v1020_v52, %v5042_v50 }
  0xb3   :  { %v1026_v51 = vpop.permute.xlu1 %1025 }
  0xb4   :  { %vm1068_vm0 = vcmp.eq.s32.totalorder %v1026_v51, %v5042_v50  ;;  %v1023_v54 = vpop.permute.xlu0 %1022 }
  0xb5   :  { %vm1067_vm4 = vcmp.eq.s32.totalorder %v1023_v54, %v5042_v50 }
  0xb6   :  { %vm3535_vm5 = vmpackc.low %vm1067_vm4, %vm1066_vm1 }
  0xb7   :  { %v1029_v53 = vpop.permute.xlu1 %1028  ;;  %4122 = vmatprep.subr.msk.bf16.mxu0 %vm3535_vm5, %v4730_v55 }
  0xb8   :  { %vm1069_vm2 = vcmp.eq.s32.totalorder %v1029_v53, %v5042_v50  ;;  %4123 = vmatpush3.bf16.msk.msra.mxu0 %vm3535_vm5, %v4730_v55  ;;  %v1032_v57 = vpop.permute.xlu0 %1031 }
  0xb9   :  { %vm3537_vm3 = vmpackc.low %vm1069_vm2, %vm1068_vm0  ;;  %vm1070_vm7 = vcmp.eq.s32.totalorder %v1032_v57, %v5042_v50 }
  0xba   :  { %4124 = vmatprep.subr.msk.bf16.mxu0 %vm3537_vm3, %v4730_v55 }
  0xbb   :  { %v1035_v56 = vpop.permute.xlu1 %1034 }
  0xbc   :  { %vm1071_vm6 = vcmp.eq.s32.totalorder %v1035_v56, %v5042_v50  ;;  %4125 = vmatpush3.bf16.msk.msra.mxu0 %vm3537_vm3, %v4730_v55  ;;  %v741_v59 = vpop.permute.xlu0 %740 }
  0xbd   :  { %vm3539_vm8 = vmpackc.low %vm1071_vm6, %vm1070_vm7  ;;  %v824_v30 = vadd.f32 %v5101_v24, %v741_v59 }
  0xbe   :  { %4126 = vmatprep.subr.msk.bf16.mxu0 %vm3539_vm8, %v4730_v55 }
  0xbf   :  { %v5053_v58 = vpop.permute.xlu1 %745 }
  0xc0   :  { %4127 = vmatpush3.bf16.msk.msra.mxu0 %vm3539_vm8, %v4730_v55  ;;  %v5060_v61 = vpop.permute.xlu0 %750  ;;  %v825_v37 = vadd.f32 %v5101_v24, %v5053_v58 }
  0xc1   :  { %v826_v54 = vadd.f32 %v5101_v24, %v5060_v61 }
  0xc3   :  { %v5057_v60 = vpop.permute.xlu1 %755 }
  0xc4   :  { %v1038_v63 = vpop.permute.xlu0 %1037  ;;  %v827_v59 = vadd.f32 %v5101_v24, %v5057_v60 }
  0xc5   :  { %vm1072_vm10 = vcmp.eq.s32.totalorder %v1038_v63, %v5042_v50 }
  0xc7   :  { %v1041_v62 = vpop.permute.xlu1 %1040 }
  0xc8   :  { %vm1073_vm9 = vcmp.eq.s32.totalorder %v1041_v62, %v5042_v50  ;;  %v1044_v1 = vpop.permute.xlu0 %1043 }
  0xc9   :  { %vm3541_vm11 = vmpackc.low %vm1073_vm9, %vm1072_vm10  ;;  %vm1074_vm13 = vcmp.eq.s32.totalorder %v1044_v1, %v5042_v50 }
  0xca   :  { %4128 = vmatprep.subr.msk.bf16.mxu0 %vm3541_vm11, %v4730_v55 }
  0xcb   :  { %v1047_v0 = vpop.permute.xlu1 %1046  ;;  %4129 = vmatpush3.bf16.msk.msra.mxu0 %vm3541_vm11, %v4730_v55 }
  0xcc   :  { %vm1075_vm12 = vcmp.eq.s32.totalorder %v1047_v0, %v5042_v50  ;;  %v5071_v3 = vpop.permute.xlu0 %760 }
  0xcd   :  { %vm3543_vm14 = vmpackc.low %vm1075_vm12, %vm1074_vm13 }
  0xce   :  { %4130 = vmatprep.subr.msk.bf16.mxu0 %vm3543_vm14, %v4730_v55 }
  0xcf   :  { %v5068_v2 = vpop.permute.xlu1 %765  ;;  %4131 = vmatpush3.bf16.msk.msra.mxu0 %vm3543_vm14, %v4730_v55 }
  0xd0   :  { %v5076_v5 = vpop.permute.xlu0 %770 }
  0xd3   :  { %v5074_v4 = vpop.permute.xlu1 %775 }
  0xd4   :  { %v1050_v7 = vpop.permute.xlu0 %1049 }
  0xd5   :  { %vm1076_vm0 = vcmp.eq.s32.totalorder %v1050_v7, %v5042_v50 }
  0xd7   :  { %v1053_v6 = vpop.permute.xlu1 %1052 }
  0xd8   :  { %vm1077_vm15 = vcmp.eq.s32.totalorder %v1053_v6, %v5042_v50  ;;  %v1056_v9 = vpop.permute.xlu0 %1055 }
  0xd9   :  { %vm3545_vm1 = vmpackc.low %vm1077_vm15, %vm1076_vm0  ;;  %vm1078_vm3 = vcmp.eq.s32.totalorder %v1056_v9, %v5042_v50 }
  0xda   :  { %4132 = vmatprep.subr.msk.bf16.mxu0 %vm3545_vm1, %v4730_v55 }
  0xdb   :  { %v1059_v8 = vpop.permute.xlu1 %1058  ;;  %4133 = vmatpush3.bf16.msk.msra.mxu0 %vm3545_vm1, %v4730_v55 }
  0xdc   :  { %vm1079_vm2 = vcmp.eq.s32.totalorder %v1059_v8, %v5042_v50  ;;  %v5087_v11 = vpop.permute.xlu0 %780 }
  0xdd   :  { %vm3547_vm4 = vmpackc.low %vm1079_vm2, %vm1078_vm3 }
  0xde   :  { %4134 = vmatprep.subr.msk.bf16.mxu0 %vm3547_vm4, %v4730_v55 }
  0xdf   :  { %v5084_v10 = vpop.permute.xlu1 %785  ;;  %4135 = vmatpush3.bf16.msk.msra.mxu0 %vm3547_vm4, %v4730_v55 }
  0xe0   :  { %v5092_v13 = vpop.permute.xlu0 %790 }
  0xe3   :  { %v5090_v12 = vpop.permute.xlu1 %795 }
  0xe4   :  { %v1062_v15 = vpop.permute.xlu0 %1061 }
  0xe5   :  { %vm1080_vm6 = vcmp.eq.s32.totalorder %v1062_v15, %v5042_v50 }
  0xe7   :  { %v1065_v14 = vpop.permute.xlu1 %1064 }
  0xe8   :  { %vm1081_vm5 = vcmp.eq.s32.totalorder %v1065_v14, %v5042_v50 }
  0xe9   :  { %vm3549_vm7 = vmpackc.low %vm1081_vm5, %vm1080_vm6 }
  0xea   :  { %4136 = vmatprep.subr.msk.bf16.mxu0 %vm3549_vm7, %v4730_v55 }
  0xeb   :  { %4137 = vmatpush3.bf16.msk.msra.mxu0 %vm3549_vm7, %v4730_v55 }
 0x11c   :  { %v3695_v16 = vpop.f32.mrb[0].mxu0 }
 0x11d   :  { %v3759_v17 = vpop.f32.mrb[0].mxu1  ;;  %v3696_v18 = vpop.f32.mrb[1].mxu0 }
 0x11e   :  { %v3697_v19 = vadd.f32 %v3696_v18, %v3695_v16  ;;  %v3760_v20 = vpop.f32.mrb[1].mxu1  ;;  %v3698_v21 = vpop.f32.mrb[2].mxu0 }
 0x11f   :  { %v3761_v22 = vadd.f32 %v3760_v20, %v3759_v17  ;;  %v3762_v23 = vpop.f32.mrb[2].mxu1  ;;  %v3699_v25 = vpop.f32.mrb[3].mxu0 }
 0x120   :  { %v3700_v27 = vadd.f32 %v3699_v25, %v3698_v21  ;;  %v3763_v28 = vpop.f32.mrb[3].mxu1 }
 0x121   :  { %v659_v26 = vadd.f32 %v3761_v22, %v3697_v19  ;;  %v3764_v29 = vadd.f32 %v3763_v28, %v3762_v23  ;;  %v828_v22 = vadd.f32 %v5101_v24, %v5071_v3  ;;  %v829_v28 = vadd.f32 %v5101_v24, %v5068_v2 }
 0x123   :  { %v840_v31 = vmul.f32 2.0, %v659_v26  ;;  %v662_v32 = vadd.f32 %v3764_v29, %v3700_v27 }
 0x124   :  { %v3701_v33 = vpop.f32.mrb[4].mxu0 }
 0x125   :  { %v856_v34 = vsub.f32 %v824_v30, %v840_v31  ;;  %v3765_v35 = vpop.f32.mrb[4].mxu1  ;;  %v3702_v36 = vpop.f32.mrb[5].mxu0  ;;  %v841_v38 = vmul.f32 2.0, %v662_v32 }
 0x126   :  { %v3703_v39 = vadd.f32 %v3702_v36, %v3701_v33  ;;  %v3766_v40 = vpop.f32.mrb[5].mxu1  ;;  %v3704_v41 = vpop.f32.mrb[6].mxu0 }
 0x127   :  { %v5106_v42 = vmax.f32 %v856_v34, 0.0  ;;  %v3767_v43 = vadd.f32 %v3766_v40, %v3765_v35  ;;  %v3768_v44 = vpop.f32.mrb[6].mxu1  ;;  %v3705_v45 = vpop.f32.mrb[7].mxu0  ;;  %v857_v46 = vsub.f32 %v825_v37, %v841_v38 }
 0x128   :  { %v3706_v47 = vadd.f32 %v3705_v45, %v3704_v41  ;;  %v3769_v48 = vpop.f32.mrb[7].mxu1 }
 0x129   :  { %v667_v51 = vadd.f32 %v3767_v43, %v3703_v39  ;;  %v3770_v52 = vadd.f32 %v3769_v48, %v3768_v44  ;;  %4503 = vrsqrt.f32 %v5106_v42  ;;  %v5109_v53 = vmax.f32 %v857_v46, 0.0 }
 0x12a   :  { %vm890_vm8 = vcmp.eq.f32.partialorder %v5106_v42, inf  ;;  %vm892_vm9 = vcmp.eq.f32.partialorder %v5106_v42, 0.0  ;;  %v893_v3 = vand.u32 2147483648, %v5106_v42 }
 0x12b   :  { %v842_v56 = vmul.f32 2.0, %v667_v51  ;;  %v670_v57 = vadd.f32 %v3770_v52, %v3706_v47  ;;  %4505 = vrsqrt.f32 %v5109_v53  ;;  %vm897_vm10 = vcmp.eq.f32.partialorder %v5109_v53, inf }
 0x12c   :  { %v3707_v58 = vpop.f32.mrb[8].mxu0  ;;  %v900_v46 = vand.u32 2147483648, %v5109_v53  ;;  %v830_v52 = vadd.f32 %v5101_v24, %v5076_v5  ;;  %vm899_vm11 = vcmp.eq.f32.partialorder %v5109_v53, 0.0 }
 0x12d   :  { %v858_v62 = vsub.f32 %v826_v54, %v842_v56  ;;  %v843_v63 = vmul.f32 2.0, %v670_v57  ;;  %v3771_v0 = vpop.f32.mrb[8].mxu1  ;;  %v3708_v1 = vpop.f32.mrb[9].mxu0 }
 0x12e   :  { %v3709_v6 = vadd.f32 %v3708_v1, %v3707_v58  ;;  %v3772_v7 = vpop.f32.mrb[9].mxu1  ;;  %v3710_v8 = vpop.f32.mrb[10].mxu0 }
 0x12f   :  { %v5116_v9 = vmax.f32 %v858_v62, 0.0  ;;  %v859_v14 = vsub.f32 %v827_v59, %v843_v63  ;;  %v3773_v15 = vadd.f32 %v3772_v7, %v3771_v0  ;;  %v3774_v61 = vpop.f32.mrb[10].mxu1  ;;  %v3711_v16 = vpop.f32.mrb[11].mxu0  ;;  %v831_v63 = vadd.f32 %v5101_v24, %v5074_v4 }
 0x130   :  { %v3712_v17 = vadd.f32 %v3711_v16, %v3710_v8  ;;  %v3775_v18 = vpop.f32.mrb[11].mxu1 }
 0x131   :  { %4507 = vrsqrt.f32 %v5116_v9  ;;  %v5119_v19 = vmax.f32 %v859_v14, 0.0  ;;  %v675_v60 = vadd.f32 %v3773_v15, %v3709_v6  ;;  %v3776_v20 = vadd.f32 %v3775_v18, %v3774_v61 }
 0x132   :  { %vm904_vm12 = vcmp.eq.f32.partialorder %v5116_v9, inf  ;;  %vm906_vm13 = vcmp.eq.f32.partialorder %v5116_v9, 0.0  ;;  %v907_v14 = vand.u32 2147483648, %v5116_v9 }
 0x133   :  { %v4504_v21 = vpop.eup %4503  ;;  %4509 = vrsqrt.f32 %v5119_v19  ;;  %v844_v23 = vmul.f32 2.0, %v675_v60  ;;  %v678_v25 = vadd.f32 %v3776_v20, %v3712_v17  ;;  %vm911_vm14 = vcmp.eq.f32.partialorder %v5119_v19, inf }
 0x134   :  { %v3713_v26 = vpop.f32.mrb[12].mxu0  ;;  %v889_v27 = vmul.f32 %v4504_v21, %v5106_v42  ;;  %vm913_vm15 = vcmp.eq.f32.partialorder %v5119_v19, 0.0 }
 0x135   :  { %v860_v29 = vsub.f32 %v828_v22, %v844_v23  ;;  %v845_v30 = vmul.f32 2.0, %v678_v25  ;;  %v3777_v31 = vpop.f32.mrb[12].mxu1  ;;  %v3714_v32 = vpop.f32.mrb[13].mxu0  ;;  %v914_v23 = vand.u32 2147483648, %v5119_v19 }
 0x136   :  { %v4506_v33 = vpop.eup %4505  ;;  %v3715_v34 = vadd.f32 %v3714_v32, %v3713_v26  ;;  %v3778_v35 = vpop.f32.mrb[13].mxu1  ;;  %v891_v41 = vsel %vm890_vm8, %v5106_v42, %v889_v27 }
 0x137   :  { %v3716_v36 = vpop.f32.mrb[14].mxu0  ;;  %v5130_v37 = vmax.f32 %v860_v29, 0.0  ;;  %v861_v38 = vsub.f32 %v829_v28, %v845_v30  ;;  %v3779_v39 = vadd.f32 %v3778_v35, %v3777_v31  ;;  %v3780_v40 = vpop.f32.mrb[14].mxu1  ;;  %v896_v45 = vmul.f32 %v4506_v33, %v5109_v53 }
 0x138   :  { %v3717_v2 = vpop.f32.mrb[15].mxu0  ;;  %v3781_v44 = vpop.f32.mrb[15].mxu1  ;;  %v894_v54 = vsel %vm892_vm9, %v893_v3, %v891_v41  ;;  %v832_v35 = vadd.f32 %v5101_v24, %v5087_v11 }
 0x139   :  { %v3718_v43 = vadd.f32 %v3717_v2, %v3716_v36  ;;  %v5136_v47 = vmax.f32 %v861_v38, 0.0  ;;  %v683_v48 = vadd.f32 %v3779_v39, %v3715_v34  ;;  %v3782_v51 = vadd.f32 %v3781_v44, %v3780_v40 }
 0x13a   :  { %4511 = vrsqrt.f32 %v5130_v37  ;;  %v898_v56 = vsel %vm897_vm10, %v5109_v53, %v896_v45  ;;  %vm918_vm0 = vcmp.eq.f32.partialorder %v5130_v37, inf  ;;  %vm920_vm1 = vcmp.eq.f32.partialorder %v5130_v37, 0.0 }
 0x13b   :  { %v4508_v57 = vpop.eup %4507  ;;  %v846_v58 = vmul.f32 2.0, %v683_v48  ;;  %v686_v59 = vadd.f32 %v3782_v51, %v3718_v43  ;;  %v901_v62 = vsel %vm899_vm11, %v900_v46, %v898_v56  ;;  %4513 = vrsqrt.f32 %v5136_v47 }
 0x13c   :  { %v1138_v0 = vpack.c.bf16 %v901_v62, %v894_v54  ;;  %v3719_v1 = vpop.f32.mrb[16].mxu0  ;;  %v903_v5 = vmul.f32 %v4508_v57, %v5116_v9  ;;  %v921_v11 = vand.u32 2147483648, %v5130_v37  ;;  %vm925_vm2 = vcmp.eq.f32.partialorder %v5136_v47, inf }
 0x13d   :  { %v4510_v42 = vpop.eup %4509  ;;  %v862_v6 = vsub.f32 %v830_v52, %v846_v58  ;;  %v847_v7 = vmul.f32 2.0, %v686_v59  ;;  %v3783_v8 = vpop.f32.mrb[16].mxu1  ;;  %v928_v58 = vand.u32 2147483648, %v5136_v47  ;;  %vm927_vm3 = vcmp.eq.f32.partialorder %v5136_v47, 0.0 }
 0x13e   :  { %v3720_v53 = vpop.f32.mrb[17].mxu0  ;;  %4138 = vmatprep.mubr.bf16.mxu0 %v1138_v0  ;;  %v3784_v61 = vpop.f32.mrb[17].mxu1  ;;  %v905_v4 = vsel %vm904_vm12, %v5116_v9, %v903_v5  ;;  %v910_v17 = vmul.f32 %v4510_v42, %v5119_v19  ;;  %v833_v9 = vadd.f32 %v5101_v24, %v5084_v10 }
 0x13f   :  { %v3721_v15 = vadd.f32 %v3720_v53, %v3719_v1  ;;  %v3722_v16 = vpop.f32.mrb[18].mxu0  ;;  %v5155_v18 = vmax.f32 %v862_v6, 0.0  ;;  %v863_v60 = vsub.f32 %v831_v63, %v847_v7  ;;  %v3785_v20 = vadd.f32 %v3784_v61, %v3783_v8  ;;  %v3786_v21 = vpop.f32.mrb[18].mxu1 }
 0x140   :  { %v3723_v22 = vpop.f32.mrb[19].mxu0  ;;  %v3787_v26 = vpop.f32.mrb[19].mxu1  ;;  %v908_v27 = vsel %vm906_vm13, %v907_v14, %v905_v4  ;;  %v912_v28 = vsel %vm911_vm14, %v5119_v19, %v910_v17  ;;  %v834_v8 = vadd.f32 %v5101_v24, %v5092_v13 }
 0x141   :  { %v3724_v25 = vadd.f32 %v3723_v22, %v3722_v16  ;;  %v5162_v29 = vmax.f32 %v863_v60, 0.0  ;;  %v691_v30 = vadd.f32 %v3785_v20, %v3721_v15  ;;  %v3788_v31 = vadd.f32 %v3787_v26, %v3786_v21 }
 0x142   :  { %v915_v32 = vsel %vm913_vm15, %v914_v23, %v912_v28  ;;  %4515 = vrsqrt.f32 %v5155_v18  ;;  %v835_v15 = vadd.f32 %v5101_v24, %v5090_v12  ;;  %vm932_vm4 = vcmp.eq.f32.partialorder %v5155_v18, inf }
 0x143   :  { %v1139_v33 = vpack.c.bf16 %v915_v32, %v908_v27  ;;  %v848_v36 = vmul.f32 2.0, %v691_v30  ;;  %v694_v3 = vadd.f32 %v3788_v31, %v3724_v25  ;;  %4517 = vrsqrt.f32 %v5162_v29 }
 0x144   :  { %v4512_v34 = vpop.eup %4511  ;;  %v3725_v19 = vpop.f32.mrb[20].mxu0  ;;  %vm934_vm5 = vcmp.eq.f32.partialorder %v5155_v18, 0.0  ;;  %v935_v20 = vand.u32 2147483648, %v5155_v18  ;;  %vm939_vm6 = vcmp.eq.f32.partialorder %v5162_v29, inf  ;;  %v942_v25 = vand.u32 2147483648, %v5162_v29 }
 0x145   :  { %4139 = vmatmul.mubr.bf16.vlgmr.msra.gmra.mrb[32].mxu0 %v1139_v33  ;;  %v917_v38 = vmul.f32 %v4512_v34, %v5130_v37  ;;  %v4514_v39 = vpop.eup %4513  ;;  %v864_v40 = vsub.f32 %v832_v35, %v848_v36  ;;  %v849_v2 = vmul.f32 2.0, %v694_v3  ;;  %v3789_v41 = vpop.f32.mrb[20].mxu1  ;;  %vm941_vm7 = vcmp.eq.f32.partialorder %v5162_v29, 0.0 }
 0x146   :  { %v3726_v43 = vpop.f32.mrb[21].mxu0  ;;  %v3790_v45 = vpop.f32.mrb[21].mxu1  ;;  %v924_v48 = vmul.f32 %v4514_v39, %v5136_v47 }
 0x147   :  { %v3727_v44 = vadd.f32 %v3726_v43, %v3725_v19  ;;  %v3728_v46 = vpop.f32.mrb[22].mxu0  ;;  %v919_v10 = vsel %vm918_vm0, %v5130_v37, %v917_v38  ;;  %v5177_v51 = vmax.f32 %v864_v40, 0.0  ;;  %v865_v52 = vsub.f32 %v833_v9, %v849_v2  ;;  %v3792_v56 = vpop.f32.mrb[22].mxu1 }
 0x148   :  { %v3791_v54 = vadd.f32 %v3790_v45, %v3789_v41  ;;  %v3729_v57 = vpop.f32.mrb[23].mxu0  ;;  %v3793_v62 = vpop.f32.mrb[23].mxu1  ;;  %v922_v63 = vsel %vm920_vm1, %v921_v11, %v919_v10  ;;  %v926_v0 = vsel %vm925_vm2, %v5136_v47, %v924_v48 }
 0x149   :  { %v3730_v59 = vadd.f32 %v3729_v57, %v3728_v46  ;;  %v5184_v1 = vmax.f32 %v865_v52, 0.0  ;;  %v3794_v42 = vadd.f32 %v3793_v62, %v3792_v56  ;;  %v929_v6 = vsel %vm927_vm3, %v928_v58, %v926_v0  ;;  %v801_v39 = vpop.permute.xlu0 %800  ;;  %v806_v2 = vpop.permute.xlu1 %805 }
 0x14a   :  { %v699_v5 = vadd.f32 %v3791_v54, %v3727_v44  ;;  %v1140_v7 = vpack.c.bf16 %v929_v6, %v922_v63  ;;  %4519 = vrsqrt.f32 %v5177_v51  ;;  %v836_v41 = vadd.f32 %v5101_v24, %v801_v39 }
 0x14b   :  { %v702_v14 = vadd.f32 %v3794_v42, %v3730_v59  ;;  %4521 = vrsqrt.f32 %v5184_v1  ;;  %v837_v44 = vadd.f32 %v5101_v24, %v806_v2  ;;  %vm946_vm8 = vcmp.eq.f32.partialorder %v5177_v51, inf }
 0x14c   :  { %v850_v53 = vmul.f32 2.0, %v699_v5  ;;  %v4516_v37 = vpop.eup %4515  ;;  %4142 = vmatprep.mubr.bf16.mxu0 %v1140_v7  ;;  %v3731_v47 = vpop.f32.mrb[24].mxu0  ;;  %vm948_vm9 = vcmp.eq.f32.partialorder %v5177_v51, 0.0  ;;  %v949_v56 = vand.u32 2147483648, %v5177_v51  ;;  %vm953_vm10 = vcmp.eq.f32.partialorder %v5184_v1, inf }
 0x14d   :  { %v4518_v61 = vpop.eup %4517  ;;  %v851_v4 = vmul.f32 2.0, %v702_v14  ;;  %v3795_v17 = vpop.f32.mrb[24].mxu1  ;;  %v931_v13 = vmul.f32 %v4516_v37, %v5155_v18  ;;  %v956_v63 = vand.u32 2147483648, %v5184_v1  ;;  %vm955_vm11 = vcmp.eq.f32.partialorder %v5184_v1, 0.0 }
 0x14e   :  { %v866_v16 = vsub.f32 %v834_v8, %v850_v53  ;;  %v3732_v60 = vpop.f32.mrb[25].mxu0  ;;  %v3796_v22 = vpop.f32.mrb[25].mxu1  ;;  %v938_v12 = vmul.f32 %v4518_v61, %v5162_v29 }
 0x14f   :  { %v3733_v21 = vadd.f32 %v3732_v60, %v3731_v47  ;;  %v3734_v23 = vpop.f32.mrb[26].mxu0  ;;  %v867_v27 = vsub.f32 %v835_v15, %v851_v4  ;;  %v3797_v28 = vadd.f32 %v3796_v22, %v3795_v17  ;;  %v3798_v30 = vpop.f32.mrb[26].mxu1  ;;  %v933_v32 = vsel %vm932_vm4, %v5155_v18, %v931_v13 }
 0x150   :  { %v5199_v26 = vmax.f32 %v866_v16, 0.0  ;;  %v3735_v31 = vpop.f32.mrb[27].mxu0  ;;  %v3799_v34 = vpop.f32.mrb[27].mxu1  ;;  %v936_v35 = vsel %vm934_vm5, %v935_v20, %v933_v32  ;;  %v940_v36 = vsel %vm939_vm6, %v5162_v29, %v938_v12 }
 0x151   :  { %v3736_v33 = vadd.f32 %v3735_v31, %v3734_v23  ;;  %v5208_v3 = vmax.f32 %v867_v27, 0.0  ;;  %v707_v9 = vadd.f32 %v3797_v28, %v3733_v21  ;;  %v3800_v19 = vadd.f32 %v3799_v34, %v3798_v30  ;;  %v811_v17 = vpop.permute.xlu0 %810  ;;  %v816_v23 = vpop.permute.xlu1 %815 }
 0x152   :  { %v943_v38 = vsel %vm941_vm7, %v942_v25, %v940_v36  ;;  %4523 = vrsqrt.f32 %v5199_v26  ;;  %v838_v13 = vadd.f32 %v5101_v24, %v811_v17  ;;  %v839_v12 = vadd.f32 %v5101_v24, %v816_v23 }
 0x153   :  { %v1141_v40 = vpack.c.bf16 %v943_v38, %v936_v35  ;;  %v852_v43 = vmul.f32 2.0, %v707_v9  ;;  %v710_v11 = vadd.f32 %v3800_v19, %v3736_v33  ;;  %4525 = vrsqrt.f32 %v5208_v3 }
 0x154   :  { %v4520_v18 = vpop.eup %4519  ;;  %v3737_v29 = vpop.f32.mrb[28].mxu0  ;;  %vm960_vm12 = vcmp.eq.f32.partialorder %v5199_v26, inf  ;;  %v963_v28 = vand.u32 2147483648, %v5199_v26  ;;  %vm967_vm13 = vcmp.eq.f32.partialorder %v5208_v3, inf  ;;  %v970_v34 = vand.u32 2147483648, %v5208_v3 }
 0x155   :  { %4143 = vmatmul.mubr.bf16.gmra.mrb[36].mxu0 %v1141_v40  ;;  %v4522_v45 = vpop.eup %4521  ;;  %v868_v46 = vsub.f32 %v836_v41, %v852_v43  ;;  %v853_v10 = vmul.f32 2.0, %v710_v11  ;;  %v3801_v48 = vpop.f32.mrb[28].mxu1  ;;  %v945_v54 = vmul.f32 %v4520_v18, %v5177_v51  ;;  %vm962_vm14 = vcmp.eq.f32.partialorder %v5199_v26, 0.0 }
 0x156   :  { %v3738_v52 = vpop.f32.mrb[29].mxu0  ;;  %v3802_v58 = vpop.f32.mrb[29].mxu1  ;;  %v952_v62 = vmul.f32 %v4522_v45, %v5184_v1  ;;  %vm969_vm15 = vcmp.eq.f32.partialorder %v5208_v3, 0.0 }
 0x157   :  { %v3739_v57 = vadd.f32 %v3738_v52, %v3737_v29  ;;  %v3740_v59 = vpop.f32.mrb[30].mxu0  ;;  %v884_v0 = vmax.f32 %v868_v46, 0.0  ;;  %v869_v5 = vsub.f32 %v837_v44, %v853_v10  ;;  %v3803_v42 = vadd.f32 %v3802_v58, %v3801_v48  ;;  %v3804_v6 = vpop.f32.mrb[30].mxu1 }
 0x158   :  { %v3741_v7 = vpop.f32.mrb[31].mxu0  ;;  %v947_v8 = vsel %vm946_vm8, %v5177_v51, %v945_v54  ;;  %v3805_v14 = vpop.f32.mrb[31].mxu1  ;;  %v954_v15 = vsel %vm953_vm10, %v5184_v1, %v952_v62 }
 0x159   :  { %v3742_v53 = vadd.f32 %v3741_v7, %v3740_v59  ;;  %v950_v37 = vsel %vm948_vm9, %v949_v56, %v947_v8  ;;  %v885_v47 = vmax.f32 %v869_v5, 0.0  ;;  %v715_v61 = vadd.f32 %v3803_v42, %v3739_v57  ;;  %v5240_v62 = vpop.permute.xlu0 %1295  ;;  %v4375_v8 = vld [vmem:[#allocation6] sm:$0xff]  }
 0x15a   :  { %v3806_v16 = vadd.f32 %v3805_v14, %v3804_v6  ;;  %v957_v4 = vsel %vm955_vm11, %v956_v63, %v954_v15  ;;  %4527 = vrsqrt.f32 %v884_v0  ;;  %vm974_vm0 = vcmp.eq.f32.partialorder %v884_v0, inf  ;;  %v5242_v63 = vpop.permute.xlu1 %1298 }
 0x15b   :  { %v1142_v60 = vpack.c.bf16 %v957_v4, %v950_v37  ;;  %v854_v20 = vmul.f32 2.0, %v715_v61  ;;  %4529 = vrsqrt.f32 %v885_v47  ;;  %v977_v43 = vand.u32 2147483648, %v884_v0 }
 0x15c   :  { %v718_v21 = vadd.f32 %v3806_v16, %v3742_v53  ;;  %v4524_v22 = vpop.eup %4523  ;;  %vm981_vm1 = vcmp.eq.f32.partialorder %v885_v47, inf  ;;  %vm976_vm2 = vcmp.eq.f32.partialorder %v884_v0, 0.0  ;;  %vm983_vm3 = vcmp.eq.f32.partialorder %v885_v47, 0.0  ;;  %v4376_v53 = vld [vmem:[#allocation6 + $0x50] sm:$0xff]  }
 0x15d   :  { %4146 = vmatprep.mubr.bf16.mxu0 %v1142_v60  ;;  %v4526_v51 = vpop.eup %4525  ;;  %v870_v25 = vsub.f32 %v838_v13, %v854_v20  ;;  %v959_v27 = vmul.f32 %v4524_v22, %v5199_v26  ;;  %v5244_v6 = vpop.permute.xlu0 %1301  ;;  %4190 = vmatprep.mubr.bf16.mxu1 %v4376_v53  ;;  %vm6280_vm8 = vcmp.eq.s32.totalorder %v5242_v63, %v5042_v50 }
 0x15e   :  { %v855_v1 = vmul.f32 2.0, %v718_v21  ;;  %v966_v30 = vmul.f32 %v4526_v51, %v5208_v3  ;;  %v5246_v14 = vpop.permute.xlu1 %1304  ;;  %vm6281_vm9 = vcmp.eq.s32.totalorder %v5240_v62, %v5042_v50  ;;  %vm6279_vm10 = vcmp.eq.s32.totalorder %v5244_v6, %v5042_v50 }
 0x15f   :  { %v886_v31 = vmax.f32 %v870_v25, 0.0  ;;  %v961_v33 = vsel %vm960_vm12, %v5199_v26, %v959_v27  ;;  %v984_v26 = vand.u32 2147483648, %v885_v47  ;;  %vm6278_vm12 = vcmp.eq.s32.totalorder %v5246_v14, %v5042_v50 }
 0x160   :  { %v871_v32 = vsub.f32 %v839_v12, %v855_v1  ;;  %v968_v24 = vsel %vm967_vm13, %v5208_v3, %v966_v30  ;;  %v964_v36 = vsel %vm962_vm14, %v963_v28, %v961_v33 }
 0x161   :  { %v971_v9 = vsel %vm969_vm15, %v970_v34, %v968_v24  ;;  %4531 = vrsqrt.f32 %v886_v31  ;;  %vm988_vm4 = vcmp.eq.f32.partialorder %v886_v31, inf  ;;  %v991_v52 = vand.u32 2147483648, %v886_v31  ;;  %v5248_v37 = vpop.permute.xlu0 %1307 }
 0x162   :  { %v887_v35 = vmax.f32 %v871_v32, 0.0  ;;  %v1143_v19 = vpack.c.bf16 %v971_v9, %v964_v36  ;;  %vm990_vm6 = vcmp.eq.f32.partialorder %v886_v31, 0.0  ;;  %v5250_v15 = vpop.permute.xlu1 %1310  ;;  %vm6277_vm13 = vcmp.eq.s32.totalorder %v5248_v37, %v5042_v50 }
 0x163   :  { %vm6276_vm15 = vcmp.eq.s32.totalorder %v5250_v15, %v5042_v50 }
 0x164   :  { %4533 = vrsqrt.f32 %v887_v35  ;;  %v4528_v38 = vpop.eup %4527  ;;  %4147 = vmatmul.mubr.bf16.gmra.mrb[40].mxu0 %v1143_v19  ;;  %vm995_vm5 = vcmp.eq.f32.partialorder %v887_v35, inf  ;;  %v998_v54 = vand.u32 2147483648, %v887_v35  ;;  %vm997_vm7 = vcmp.eq.f32.partialorder %v887_v35, 0.0 }
 0x165   :  { %v4530_v39 = vpop.eup %4529  ;;  %v973_v40 = vmul.f32 %v4528_v38, %v884_v0 }
 0x166   :  { %v980_v2 = vmul.f32 %v4530_v39, %v885_v47  ;;  %v5266_v16 = vpop.permute.xlu1 %1316 }
 0x167   :  { %v975_v41 = vsel %vm974_vm0, %v884_v0, %v973_v40  ;;  %vm6274_vm14 = vcmp.eq.s32.totalorder %v5266_v16, %v5042_v50 }
 0x168   :  { %v982_v11 = vsel %vm981_vm1, %v885_v47, %v980_v2  ;;  %v978_v3 = vsel %vm976_vm2, %v977_v43, %v975_v41  ;;  %v5252_v47 = vpop.permute.xlu0 %1313 }
 0x169   :  { %v985_v18 = vsel %vm983_vm3, %v984_v26, %v982_v11  ;;  %vm6275_vm11 = vcmp.eq.s32.totalorder %v5252_v47, %v5042_v50 }
 0x16a   :  { %v1144_v44 = vpack.c.bf16 %v985_v18, %v978_v3  ;;  %v5322_v32 = vpop.permute.xlu1 %1322 }
 0x16b   :  { %v4532_v29 = vpop.eup %4531  ;;  %vm6272_vm3 = vcmp.eq.s32.totalorder %v5322_v32, %v5042_v50 }
 0x16c   :  { %4150 = vmatprep.mubr.bf16.mxu0 %v1144_v44  ;;  %v987_v45 = vmul.f32 %v4532_v29, %v886_v31 }
 0x16e   :  { %v4534_v46 = vpop.eup %4533  ;;  %v989_v10 = vsel %vm988_vm4, %v886_v31, %v987_v45  ;;  %v5320_v31 = vpop.permute.xlu0 %1319 }
 0x16f   :  { %v994_v48 = vmul.f32 %v4534_v46, %v887_v35  ;;  %v992_v57 = vsel %vm990_vm6, %v991_v52, %v989_v10  ;;  %vm6273_vm1 = vcmp.eq.s32.totalorder %v5320_v31, %v5042_v50  ;;  %v5330_v24 = vpop.permute.xlu1 %1328 }
 0x170   :  { %vm6270_vm2 = vcmp.eq.s32.totalorder %v5330_v24, %v5042_v50 }
 0x171   :  { %v996_v56 = vsel %vm995_vm5, %v887_v35, %v994_v48 }
 0x172   :  { %v999_v58 = vsel %vm997_vm7, %v998_v54, %v996_v56  ;;  %v5324_v33 = vpop.permute.xlu0 %1325 }
 0x173   :  { %v1145_v59 = vpack.c.bf16 %v999_v58, %v992_v57  ;;  %vm6271_vm0 = vcmp.eq.s32.totalorder %v5324_v33, %v5042_v50  ;;  %v5362_v3 = vpop.permute.xlu1 %1334 }
 0x174   :  { %vm6268_vm7 = vcmp.eq.s32.totalorder %v5362_v3, %v5042_v50 }
 0x175   :  { %4151 = vmatmul.mubr.bf16.gmra.mrb[44].mxu0 %v1145_v59 }
 0x176   :  { %4170 = vmatprep.mubr.bf16.mxu0 %v4375_v8  ;;  %v5360_v11 = vpop.permute.xlu0 %1331 }
 0x177   :  { %v5366_v44 = vpop.permute.xlu1 %1340  ;;  %vm6269_vm5 = vcmp.eq.s32.totalorder %v5360_v11, %v5042_v50 }
 0x178   :  { %vm6266_vm6 = vcmp.eq.s32.totalorder %v5366_v44, %v5042_v50 }
 0x17a   :  { %v5364_v18 = vpop.permute.xlu0 %1337 }
 0x17b   :  { %vm6267_vm4 = vcmp.eq.s32.totalorder %v5364_v18, %v5042_v50 }
 0x218   :  { %v4140_v0 = vpop.f32.mrb[32].mxu0 }
 0x219   :  { %v1180_v5 = vpop.f32.mrb[33].mxu0  ;;  %v5271_v4 = vsel %vm6279_vm10, %v4140_v0, 1e+30 }
 0x21a   :  { %v4141_v42 = vpop.f32.mrb[34].mxu0  ;;  %v5283_v13 = vsel %vm6281_vm9, %v1180_v5, 1e+30 }
 0x21b   :  { %v1183_v7 = vpop.f32.mrb[35].mxu0  ;;  %v5297_v23 = vsel %vm6278_vm12, %v4141_v42, 1e+30 }
 0x21c   :  { %v5309_v1 = vsel %vm6280_vm8, %v1183_v7, 1e+30 }
 0x228   :  { %v4144_v61 = vpop.f32.mrb[36].mxu0 }
 0x229   :  { %v5276_v17 = vsel %vm6275_vm11, %v4144_v61, 1e+30  ;;  %v1196_v60 = vpop.f32.mrb[37].mxu0  ;;  %v5395_v61 = vshrl.u32 %v1000_v49, 7 }
 0x22a   :  { %v1392_v20 = vmin.f32 %v5271_v4, %v5276_v17  ;;  %v5290_v21 = vsel %vm6277_vm13, %v1196_v60, 1e+30  ;;  %v4145_v22 = vpop.f32.mrb[38].mxu0 }
 0x22b   :  { %v1390_v51 = vmin.f32 %v5283_v13, %v5290_v21  ;;  %v5304_v12 = vsel %vm6274_vm14, %v4145_v22, 1e+30  ;;  %v1199_v25 = vpop.f32.mrb[39].mxu0  ;;  %6294 = vst [vmem:[#allocation12_spill] sm:$0xff] %v5395_v61  ;;  %v5398_v22 = vadd.s32 8, %v5395_v61  ;;  %v5413_v49 = vadd.s32 48, %v5395_v61 }
 0x22c   :  { %v1393_v27 = vmin.f32 %v5297_v23, %v5304_v12  ;;  %v5316_v28 = vsel %vm6276_vm15, %v1199_v25, 1e+30  ;;  %v5401_v25 = vadd.s32 16, %v5395_v61 }
 0x22d   :  { %v1391_v30 = vmin.f32 %v5309_v1, %v5316_v28 }
 0x237   :  { %v4148_v34 = vpop.f32.mrb[40].mxu0 }
 0x238   :  { %v5335_v35 = vsel %vm6271_vm0, %v4148_v34, 1e+30  ;;  %v1212_v36 = vpop.f32.mrb[41].mxu0  ;;  %v5410_v34 = vadd.s32 40, %v5395_v61 }
 0x239   :  { %v1396_v9 = vmin.f32 %v1392_v20, %v5335_v35  ;;  %v5343_v19 = vsel %vm6273_vm1, %v1212_v36, 1e+30  ;;  %v4149_v38 = vpop.f32.mrb[42].mxu0  ;;  %v5416_v36 = vadd.s32 56, %v5395_v61 }
 0x23a   :  { %v1394_v39 = vmin.f32 %v1390_v51, %v5343_v19  ;;  %v5351_v40 = vsel %vm6270_vm2, %v4149_v38, 1e+30  ;;  %v1215_v2 = vpop.f32.mrb[43].mxu0 }
 0x23b   :  { %v1397_v41 = vmin.f32 %v1393_v27, %v5351_v40  ;;  %v5357_v43 = vsel %vm6272_vm3, %v1215_v2, 1e+30  ;;  %v5404_v27 = vadd.s32 24, %v5395_v61  ;;  %v5425_v2 = vadd.s32 80, %v5395_v61 }
 0x23c   :  { %v1395_v26 = vmin.f32 %v1391_v30, %v5357_v43  ;;  %v5407_v30 = vadd.s32 32, %v5395_v61 }
 0x248   :  { %v4152_v29 = vpop.f32.mrb[44].mxu0 }
 0x249   :  { %v5375_v45 = vsel %vm6267_vm4, %v4152_v29, 1e+30  ;;  %v1228_v46 = vpop.f32.mrb[45].mxu0  ;;  %v5434_v29 = vadd.s32 104, %v5395_v61 }
 0x24a   :  { %v1400_v10 = vmin.f32 %v1396_v9, %v5375_v45  ;;  %v5383_v48 = vsel %vm6269_vm5, %v1228_v46, 1e+30  ;;  %v4153_v52 = vpop.f32.mrb[46].mxu0  ;;  %v5419_v9 = vadd.s32 64, %v5395_v61  ;;  %v5437_v46 = vadd.s32 112, %v5395_v61 }
 0x24b   :  { %v1398_v54 = vmin.f32 %v1394_v39, %v5383_v48  ;;  %v1389_v56 = vsel %vm6266_vm6, %v4153_v52, 1e+30  ;;  %v1231_v57 = vpop.f32.mrb[47].mxu0  ;;  %v5422_v39 = vadd.s32 72, %v5395_v61 }
 0x24c   :  { %v1401_v58 = vmin.f32 %v1397_v41, %v1389_v56  ;;  %v1387_v59 = vsel %vm6268_vm7, %v1231_v57, 1e+30  ;;  %v5428_v41 = vadd.s32 88, %v5395_v61 }
 0x24d   :  { %v1399_v0 = vmin.f32 %v1395_v26, %v1387_v59  ;;  %v5431_v26 = vadd.s32 96, %v5395_v61 }
 0x24e   :  { %v1403_v5 = vmin.f32 %v1400_v10, %v1401_v58  ;;  %v5440_v10 = vadd.s32 120, %v5395_v61 }
 0x24f   :  { %v1402_v42 = vmin.f32 %v1398_v54, %v1399_v0 }
 0x251   :  { %v1404_v7 = vmin.f32 %v1402_v42, %v1403_v5 }
 0x253   :  { %v1405_v8 = vrot.slane %v1404_v7, 4 }
 0x255   :  { %v1406_v53 = vmin.f32 %v1404_v7, %v1405_v8 }
 0x257   :  { %v1407_v60 = vrot.slane %v1406_v53, 2 }
 0x259   :  { %v1408_v20 = vmin.f32 %v1406_v53, %v1407_v60 }
 0x25b   :  { %v1409_v51 = vrot.slane %v1408_v20, 1 }
 0x25d   :  { %v1410_v38 = vmin.f32 %v1408_v20, %v1409_v51 }
 0x25f   :  { %vm1428_vm6 = vcmp.le.f32.partialorder %v5283_v13, %v1410_v38  ;;  %vm1429_vm4 = vcmp.le.f32.partialorder %v5309_v1, %v1410_v38  ;;  %vm1430_vm7 = vcmp.le.f32.partialorder %v5271_v4, %v1410_v38  ;;  %vm1431_vm5 = vcmp.le.f32.partialorder %v5297_v23, %v1410_v38 }
 0x260   :  { %vm1432_vm2 = vcmp.le.f32.partialorder %v5290_v21, %v1410_v38  ;;  %vm1433_vm0 = vcmp.le.f32.partialorder %v5316_v28, %v1410_v38  ;;  %vm1434_vm3 = vcmp.le.f32.partialorder %v5276_v17, %v1410_v38  ;;  %vm1435_vm1 = vcmp.le.f32.partialorder %v5304_v12, %v1410_v38 }
 0x261   :  { %vm1436_vm14 = vcmp.le.f32.partialorder %v5343_v19, %v1410_v38  ;;  %vm1437_vm11 = vcmp.le.f32.partialorder %v5357_v43, %v1410_v38  ;;  %vm1438_vm15 = vcmp.le.f32.partialorder %v5335_v35, %v1410_v38  ;;  %vm1439_vm13 = vcmp.le.f32.partialorder %v5351_v40, %v1410_v38 }
 0x262   :  { %vm1440_vm12 = vcmp.le.f32.partialorder %v5383_v48, %v1410_v38  ;;  %vm1441_vm10 = vcmp.le.f32.partialorder %v1387_v59, %v1410_v38  ;;  %vm1442_vm8 = vcmp.le.f32.partialorder %v5375_v45, %v1410_v38  ;;  %vm1443_vm9 = vcmp.le.f32.partialorder %v1389_v56, %v1410_v38 }
 0x263   :  { %v1444_v52 = vsel %vm1428_vm6, %v5395_v61, 128  ;;  %v1445_v54 = vsel %vm1429_vm4, %v5398_v22, 128  ;;  %v1446_v57 = vsel %vm1430_vm7, %v5401_v25, 128  ;;  %v1447_v58 = vsel %vm1431_vm5, %v5404_v27, 128 }
 0x264   :  { %v1448_v0 = vsel %vm1432_vm2, %v5407_v30, 128  ;;  %v1449_v13 = vsel %vm1433_vm0, %v5410_v34, 128  ;;  %v1450_v1 = vsel %vm1434_vm3, %v5413_v49, 128  ;;  %v1451_v4 = vsel %vm1435_vm1, %v5416_v36, 128 }
 0x265   :  { %v1452_v23 = vsel %vm1436_vm14, %v5419_v9, 128  ;;  %v1453_v21 = vsel %vm1437_vm11, %v5422_v39, 128  ;;  %v1454_v28 = vsel %vm1438_vm15, %v5425_v2, 128  ;;  %v1455_v17 = vsel %vm1439_vm13, %v5428_v41, 128 }
 0x266   :  { %v1456_v12 = vsel %vm1440_vm12, %v5431_v26, 128  ;;  %v1457_v19 = vsel %vm1441_vm10, %v5434_v29, 128  ;;  %v1458_v43 = vsel %vm1442_vm8, %v5437_v46, 128  ;;  %v1459_v5 = vsel %vm1443_vm9, %v5440_v10, 128 }
 0x267   :  { %vm1460_vm11 = vcmp.lt.s32.totalorder %v1444_v52, %v1448_v0  ;;  %vm1462_vm14 = vcmp.lt.s32.totalorder %v1445_v54, %v1449_v13  ;;  %vm1464_vm15 = vcmp.lt.s32.totalorder %v1446_v57, %v1450_v1  ;;  %vm1466_vm0 = vcmp.lt.s32.totalorder %v1447_v58, %v1451_v4 }
 0x268   :  { %v1461_v35 = vsel %vm1460_vm11, %v1444_v52, %v1448_v0  ;;  %v1463_v40 = vsel %vm1462_vm14, %v1445_v54, %v1449_v13  ;;  %v1465_v42 = vsel %vm1464_vm15, %v1446_v57, %v1450_v1  ;;  %v1467_v7 = vsel %vm1466_vm0, %v1447_v58, %v1451_v4  ;;  %v4393_v4 = vld [vmem:[#allocation6 + $0x48] sm:$0xff]  }
 0x269   :  { %vm1468_vm13 = vcmp.lt.s32.totalorder %v1461_v35, %v1452_v23  ;;  %vm1470_vm12 = vcmp.lt.s32.totalorder %v1463_v40, %v1453_v21  ;;  %vm1472_vm1 = vcmp.lt.s32.totalorder %v1465_v42, %v1454_v28  ;;  %vm1474_vm2 = vcmp.lt.s32.totalorder %v1467_v7, %v1455_v17 }
 0x26a   :  { %v1469_v48 = vsel %vm1468_vm13, %v1461_v35, %v1452_v23  ;;  %v1471_v59 = vsel %vm1470_vm12, %v1463_v40, %v1453_v21  ;;  %v1473_v8 = vsel %vm1472_vm1, %v1465_v42, %v1454_v28  ;;  %v1475_v45 = vsel %vm1474_vm2, %v1467_v7, %v1455_v17  ;;  %v4394_v23 = vld [vmem:[#allocation6 + $0x98] sm:$0xff]   ;;  %v4395_v21 = vld [vmem:[#allocation6 + $0xa0] sm:$0xff]   ;;  %v4396_v28 = vld [vmem:[#allocation6 + $0xa8] sm:$0xff]  }
 0x26b   :  { %vm1476_vm8 = vcmp.lt.s32.totalorder %v1469_v48, %v1456_v12  ;;  %vm1478_vm10 = vcmp.lt.s32.totalorder %v1471_v59, %v1457_v19  ;;  %vm1480_vm3 = vcmp.lt.s32.totalorder %v1473_v8, %v1458_v43  ;;  %vm1482_vm9 = vcmp.lt.s32.totalorder %v1475_v45, %v1459_v5  ;;  %v4397_v17 = vld [vmem:[#allocation6 + $0xb0] sm:$0xff]   ;;  %v4402_v35 = vld [vmem:[#allocation6 + $0xd8] sm:$0xff]   ;;  %v4403_v40 = vld [vmem:[#allocation6 + $0xe0] sm:$0xff]  }
 0x26c   :  { %v1477_v56 = vsel %vm1476_vm8, %v1469_v48, %v1456_v12  ;;  %v1479_v53 = vsel %vm1478_vm10, %v1471_v59, %v1457_v19  ;;  %v1481_v60 = vsel %vm1480_vm3, %v1473_v8, %v1458_v43  ;;  %v1483_v20 = vsel %vm1482_vm9, %v1475_v45, %v1459_v5  ;;  %v4398_v12 = vld [vmem:[#allocation6 + $0xb8] sm:$0xff]   ;;  %v4399_v19 = vld [vmem:[#allocation6 + $0xc0] sm:$0xff]   ;;  %v4400_v43 = vld [vmem:[#allocation6 + $0xc8] sm:$0xff]  }
 0x26d   :  { %vm1484_vm4 = vcmp.lt.s32.totalorder %v1477_v56, %v1479_v53  ;;  %vm1486_vm5 = vcmp.lt.s32.totalorder %v1481_v60, %v1483_v20  ;;  %v4401_v5 = vld [vmem:[#allocation6 + $0xd0] sm:$0xff]   ;;  %v4404_v42 = vld [vmem:[#allocation6 + $0xe8] sm:$0xff]   ;;  %v4406_v48 = vld [vmem:[#allocation6 + $0xf8] sm:$0xff]  }
 0x26e   :  { %v1485_v51 = vsel %vm1484_vm4, %v1477_v56, %v1479_v53  ;;  %v1487_v38 = vsel %vm1486_vm5, %v1481_v60, %v1483_v20  ;;  %v4405_v7 = vld [vmem:[#allocation6 + $0xf0] sm:$0xff]   ;;  %v4412_v8 = vld [vmem:[#allocation3 + $0xc] ss:$16 sps:$4 sm:$0xff]  }
 0x26f   :  { %vm1488_vm6 = vcmp.lt.s32.totalorder %v1485_v51, %v1487_v38  ;;  %v4409_v59 = vld [vmem:[#allocation3 + $0x4] ss:$16 sps:$4 sm:$0xff]  }
 0x270   :  { %v1489_v52 = vsel %vm1488_vm6, %v1485_v51, %v1487_v38 }
 0x271   :  { %v1490_v54 = vrot.slane %v1489_v52, 4 }
 0x273   :  { %vm1491_vm7 = vcmp.lt.s32.totalorder %v1489_v52, %v1490_v54 }
 0x274   :  { %v1492_v57 = vsel %vm1491_vm7, %v1489_v52, %v1490_v54 }
 0x275   :  { %v1493_v58 = vrot.slane %v1492_v57, 2 }
 0x277   :  { %vm1494_vm11 = vcmp.lt.s32.totalorder %v1492_v57, %v1493_v58 }
 0x278   :  { %v1495_v0 = vsel %vm1494_vm11, %v1492_v57, %v1493_v58 }
 0x279   :  { %v1496_v13 = vrot.slane %v1495_v0, 1 }
 0x27b   :  { %vm1497_vm14 = vcmp.lt.s32.totalorder %v1495_v0, %v1496_v13 }
 0x27c   :  { %v1498_v1 = vsel %vm1497_vm14, %v1495_v0, %v1496_v13 }
 0x27d   :  { %vm1499_vm15 = vcmp.eq.s32.totalorder %v5395_v61, %v1498_v1  ;;  %vm1500_vm0 = vcmp.eq.s32.totalorder %v5398_v22, %v1498_v1  ;;  %vm1501_vm13 = vcmp.eq.s32.totalorder %v5401_v25, %v1498_v1  ;;  %vm1502_vm12 = vcmp.eq.s32.totalorder %v5404_v27, %v1498_v1  ;;  %v4377_v22 = vld [vmem:[#allocation6 + $0x8] sm:$0xff]   ;;  %v4378_v25 = vld [vmem:[#allocation6 + $0x58] sm:$0xff]   ;;  %v4379_v27 = vld [vmem:[#allocation6 + $0x10] sm:$0xff]  }
 0x27e   :  { %vm3599_vm1 = vmpackc.low %vm1500_vm0, %vm1499_vm15  ;;  %vm1503_vm8 = vcmp.eq.s32.totalorder %v5407_v30, %v1498_v1  ;;  %vm1504_vm10 = vcmp.eq.s32.totalorder %v5410_v34, %v1498_v1  ;;  %vm1505_vm9 = vcmp.eq.s32.totalorder %v5413_v49, %v1498_v1  ;;  %vm1506_vm4 = vcmp.eq.s32.totalorder %v5416_v36, %v1498_v1  ;;  %v4380_v30 = vld [vmem:[#allocation6 + $0x60] sm:$0xff]   ;;  %v4381_v34 = vld [vmem:[#allocation6 + $0x18] sm:$0xff]  }
 0x27f   :  { %4154 = vmatprep.subr.msk.bf16.mxu0 %vm3599_vm1, %v4730_v55  ;;  %4266 = vmatprep.subr.msk.bf16.mxu1 %vm3599_vm1, %v4730_v55  ;;  %vm3601_vm2 = vmpackc.low %vm1502_vm12, %vm1501_vm13  ;;  %vm1507_vm6 = vcmp.eq.s32.totalorder %v5419_v9, %v1498_v1  ;;  %vm1508_vm7 = vcmp.eq.s32.totalorder %v5422_v39, %v1498_v1  ;;  %vm1509_vm14 = vcmp.eq.s32.totalorder %v5425_v2, %v1498_v1  ;;  %v4382_v49 = vld [vmem:[#allocation6 + $0x68] sm:$0xff]   ;;  %v4383_v36 = vld [vmem:[#allocation6 + $0x20] sm:$0xff]  }
 0x280   :  { %4155 = vmatpush3.bf16.msk.msra.mxu0 %vm3599_vm1, %v4730_v55  ;;  %4274 = vmatpush3.bf16.msk.msra.mxu1 %vm3599_vm1, %v4730_v55  ;;  %vm3603_vm3 = vmpackc.low %vm1504_vm10, %vm1503_vm8  ;;  %vm1510_vm15 = vcmp.eq.s32.totalorder %v5428_v41, %v1498_v1  ;;  %vm1511_vm13 = vcmp.eq.s32.totalorder %v5431_v26, %v1498_v1  ;;  %vm1512_vm12 = vcmp.eq.s32.totalorder %v5434_v29, %v1498_v1  ;;  %v4384_v9 = vld [vmem:[#allocation6 + $0x70] sm:$0xff]   ;;  %v4385_v39 = vld [vmem:[#allocation6 + $0x28] sm:$0xff]  }
 0x281   :  { %4156 = vmatprep.subr.msk.bf16.mxu0 %vm3601_vm2, %v4730_v55  ;;  %4267 = vmatprep.subr.msk.bf16.mxu1 %vm3601_vm2, %v4730_v55  ;;  %vm3605_vm5 = vmpackc.low %vm1506_vm4, %vm1505_vm9  ;;  %vm1514_vm8 = vcmp.eq.s32.totalorder %v5440_v10, %v1498_v1  ;;  %v4386_v2 = vld [vmem:[#allocation6 + $0x78] sm:$0xff]   ;;  %v4387_v41 = vld [vmem:[#allocation6 + $0x30] sm:$0xff]   ;;  %vm6295_vm9 = vcmp.eq.s32.totalorder %v5240_v62, %v5042_v50  ;;  %vm6296_vm4 = vcmp.eq.s32.totalorder %v5242_v63, %v5042_v50 }
 0x282   :  { %vm3607_vm11 = vmpackc.low %vm1508_vm7, %vm1507_vm6  ;;  %v4388_v26 = vld [vmem:[#allocation6 + $0x80] sm:$0xff]   ;;  %v4390_v29 = vld [vmem:[#allocation6 + $0x88] sm:$0xff]   ;;  %vm6298_vm6 = vcmp.eq.s32.totalorder %v5246_v14, %v5042_v50  ;;  %vm6299_vm7 = vcmp.eq.s32.totalorder %v5248_v37, %v5042_v50 }
 0x283   :  { %vm3609_vm0 = vmpackc.low %vm1510_vm15, %vm1509_vm14  ;;  %v4392_v10 = vld [vmem:[#allocation6 + $0x90] sm:$0xff]  }
 0x284   :  { %4157 = vmatpush3.bf16.msk.msra.mxu0 %vm3601_vm2, %v4730_v55  ;;  %4275 = vmatpush3.bf16.msk.msra.mxu1 %vm3601_vm2, %v4730_v55  ;;  %vm3611_vm1 = vmpackc.low %vm1512_vm12, %vm1511_vm13  ;;  %vm1513_vm2 = vcmp.eq.s32.totalorder %v5437_v46, %v1498_v1  ;;  %v4391_v46 = vld [vmem:[#allocation6 + $0x40] sm:$0xff]  }
 0x285   :  { %4158 = vmatprep.subr.msk.bf16.mxu0 %vm3603_vm3, %v4730_v55  ;;  %4268 = vmatprep.subr.msk.bf16.mxu1 %vm3603_vm3, %v4730_v55  ;;  %vm3613_vm10 = vmpackc.low %vm1514_vm8, %vm1513_vm2  ;;  %vm6307_vm2 = vcmp.eq.s32.totalorder %v5252_v47, %v5042_v50  ;;  %vm6308_vm8 = vcmp.eq.s32.totalorder %v5266_v16, %v5042_v50 }
 0x286   :  { %vm6301_vm14 = vmmov %vm6295_vm9 }
 0x287   :  { %vm6302_vm15 = vmmov %vm6296_vm4 }
 0x288   :  { %4159 = vmatpush3.bf16.msk.msra.mxu0 %vm3603_vm3, %v4730_v55  ;;  %4276 = vmatpush3.bf16.msk.msra.mxu1 %vm3603_vm3, %v4730_v55  ;;  %vm2870_vm3 = vcmp.lt.s32.totalorder %v5042_v50, 4  ;;  %vm6304_vm13 = vmmov %vm6298_vm6 }
 0x289   :  { %4160 = vmatprep.subr.msk.bf16.mxu0 %vm3605_vm5, %v4730_v55  ;;  %4269 = vmatprep.subr.msk.bf16.mxu1 %vm3605_vm5, %v4730_v55  ;;  %vm6305_vm12 = vmmov %vm6299_vm7 }
 0x28c   :  { %4161 = vmatpush3.bf16.msk.msra.mxu0 %vm3605_vm5, %v4730_v55  ;;  %4277 = vmatpush3.bf16.msk.msra.mxu1 %vm3605_vm5, %v4730_v55  ;;  %vm6297_vm5 = vcmp.eq.s32.totalorder %v5244_v6, %v5042_v50 }
 0x28d   :  { %4162 = vmatprep.subr.msk.bf16.mxu0 %vm3607_vm11, %v4730_v55  ;;  %4270 = vmatprep.subr.msk.bf16.mxu1 %vm3607_vm11, %v4730_v55 }
 0x290   :  { %4163 = vmatpush3.bf16.msk.msra.mxu0 %vm3607_vm11, %v4730_v55  ;;  %4278 = vmatpush3.bf16.msk.msra.mxu1 %vm3607_vm11, %v4730_v55  ;;  %vm6300_vm11 = vcmp.eq.s32.totalorder %v5250_v15, %v5042_v50 }
 0x291   :  { %4164 = vmatprep.subr.msk.bf16.mxu0 %vm3609_vm0, %v4730_v55  ;;  %4271 = vmatprep.subr.msk.bf16.mxu1 %vm3609_vm0, %v4730_v55 }
 0x294   :  { %4165 = vmatpush3.bf16.msk.msra.mxu0 %vm3609_vm0, %v4730_v55  ;;  %4279 = vmatpush3.bf16.msk.msra.mxu1 %vm3609_vm0, %v4730_v55  ;;  %vm6303_vm0 = vmmov %vm6297_vm5 }
 0x295   :  { %4166 = vmatprep.subr.msk.bf16.mxu0 %vm3611_vm1, %v4730_v55  ;;  %4272 = vmatprep.subr.msk.bf16.mxu1 %vm3611_vm1, %v4730_v55 }
 0x298   :  { %4167 = vmatpush3.bf16.msk.msra.mxu0 %vm3611_vm1, %v4730_v55  ;;  %4280 = vmatpush3.bf16.msk.msra.mxu1 %vm3611_vm1, %v4730_v55  ;;  %vm6306_vm1 = vmmov %vm6300_vm11 }
 0x299   :  { %4168 = vmatprep.subr.msk.bf16.mxu0 %vm3613_vm10, %v4730_v55  ;;  %4273 = vmatprep.subr.msk.bf16.mxu1 %vm3613_vm10, %v4730_v55 }
 0x29c   :  { %4169 = vmatpush3.bf16.msk.msra.mxu0 %vm3613_vm10, %v4730_v55  ;;  %4281 = vmatpush3.bf16.msk.msra.mxu1 %vm3613_vm10, %v4730_v55  ;;  %v4389_v55 = vld [vmem:[#allocation6 + $0x38] sm:$0xff]   ;;  %vm6309_vm10 = vmmov %vm6307_vm2 }
 0x29f   :  { %4171 = vmatmul.mubr.bf16.vlgmr.msra.gmra.mrb[48].mxu0 %v4377_v22  ;;  %4191 = vmatmul.mubr.bf16.vlgmr.msra.gmra.mrb[32].mxu1 %v4378_v25 }
 0x2a0   :  { %4174 = vmatprep.mubr.bf16.mxu0 %v4379_v27  ;;  %4194 = vmatprep.mubr.bf16.mxu1 %v4380_v30 }
 0x2a7   :  { %4175 = vmatmul.mubr.bf16.gmra.mrb[52].mxu0 %v4381_v34  ;;  %4195 = vmatmul.mubr.bf16.gmra.mrb[36].mxu1 %v4382_v49 }
 0x2a8   :  { %4178 = vmatprep.mubr.bf16.mxu0 %v4383_v36  ;;  %4198 = vmatprep.mubr.bf16.mxu1 %v4384_v9 }
 0x2af   :  { %4179 = vmatmul.mubr.bf16.gmra.mrb[56].mxu0 %v4385_v39  ;;  %4199 = vmatmul.mubr.bf16.gmra.mrb[40].mxu1 %v4386_v2 }
 0x2b0   :  { %4182 = vmatprep.mubr.bf16.mxu0 %v4387_v41  ;;  %4202 = vmatprep.mubr.bf16.mxu1 %v4388_v26 }
 0x2b7   :  { %4183 = vmatmul.mubr.bf16.gmra.mrb[60].mxu0 %v4389_v55  ;;  %4203 = vmatmul.mubr.bf16.gmra.mrb[44].mxu1 %v4390_v29 }
 0x2b8   :  { %4186 = vmatprep.mubr.bf16.mxu0 %v4391_v46  ;;  %4206 = vmatprep.mubr.bf16.mxu1 %v4392_v10 }
 0x2bf   :  { %4187 = vmatmul.mubr.bf16.gmra.mrb[64].mxu0 %v4393_v4  ;;  %4207 = vmatmul.mubr.bf16.gmra.mrb[48].mxu1 %v4394_v23 }
 0x2c0   :  { %4210 = vmatprep.mubr.bf16.mxu1 %v4395_v21  ;;  %2548 = vmatprep.mubr.bf16.mxu0 %v4409_v59 }
 0x2c7   :  { %4211 = vmatmul.mubr.bf16.gmra.mrb[52].mxu1 %v4396_v28 }
 0x2c8   :  { %4214 = vmatprep.mubr.bf16.mxu1 %v4397_v17 }
 0x2cf   :  { %4215 = vmatmul.mubr.bf16.gmra.mrb[56].mxu1 %v4398_v12 }
 0x2d0   :  { %4218 = vmatprep.mubr.bf16.mxu1 %v4399_v19 }
 0x2d7   :  { %4219 = vmatmul.mubr.bf16.gmra.mrb[60].mxu1 %v4400_v43 }
 0x2d8   :  { %4222 = vmatprep.mubr.bf16.mxu1 %v4401_v5 }
 0x2df   :  { %4223 = vmatmul.mubr.bf16.gmra.mrb[64].mxu1 %v4402_v35 }
 0x2e0   :  { %4226 = vmatprep.mubr.bf16.mxu1 %v4403_v40 }
 0x2e7   :  { %4227 = vmatmul.mubr.bf16.gmra.mrb[68].mxu1 %v4404_v42 }
 0x2e8   :  { %4230 = vmatprep.mubr.bf16.mxu1 %v4405_v7 }
 0x2ef   :  { %4231 = vmatmul.mubr.bf16.gmra.mrb[72].mxu1 %v4406_v48 }
 0x2f0   :  { %2709 = vmatprep.mubr.bf16.mxu1 %v4412_v8 }
 0x372   :  { %v5550_v45 = vpop.f32.mrb[32].mxu1  ;;  %v5552_v56 = vpop.f32.mrb[48].mxu0 }
 0x373   :  { %v5554_v53 = vpop.f32.mrb[33].mxu1  ;;  %v1845_v60 = vpop.f32.mrb[49].mxu0 }
 0x374   :  { %v5556_v20 = vpop.f32.mrb[34].mxu1  ;;  %v5558_v51 = vpop.f32.mrb[50].mxu0 }
 0x375   :  { %v2111_v38 = vpack.c.bf16 %v5556_v20, %v5550_v45  ;;  %v5562_v52 = vpop.f32.mrb[35].mxu1  ;;  %v2101_v54 = vpack.c.bf16 %v5558_v51, %v5552_v56  ;;  %v1848_v57 = vpop.f32.mrb[51].mxu0 }
 0x376   :  { %v2110_v58 = vpack.c.bf16 %v5562_v52, %v5554_v53  ;;  %v2100_v0 = vpack.c.bf16 %v1848_v57, %v1845_v60 }
 0x37a   :  { %v5568_v13 = vpop.f32.mrb[36].mxu1  ;;  %v5570_v1 = vpop.f32.mrb[52].mxu0 }
 0x37b   :  { %v5572_v22 = vpop.f32.mrb[37].mxu1  ;;  %v1861_v25 = vpop.f32.mrb[53].mxu0 }
 0x37c   :  { %v5574_v27 = vpop.f32.mrb[38].mxu1  ;;  %v4177_v30 = vpop.f32.mrb[54].mxu0 }
 0x37d   :  { %v2113_v34 = vpack.c.bf16 %v5574_v27, %v5568_v13  ;;  %v1944_v49 = vpop.f32.mrb[39].mxu1  ;;  %v2103_v36 = vpack.c.bf16 %v4177_v30, %v5570_v1  ;;  %v1864_v9 = vpop.f32.mrb[55].mxu0  ;;  %v4407_v13 = vld [vmem:[#allocation3] ss:$16 sps:$4 sm:$0xff]  }
 0x37e   :  { %v2112_v39 = vpack.c.bf16 %v1944_v49, %v5572_v22  ;;  %v2102_v2 = vpack.c.bf16 %v1864_v9, %v1861_v25 }
 0x382   :  { %v5580_v41 = vpop.f32.mrb[40].mxu1  ;;  %v5582_v26 = vpop.f32.mrb[56].mxu0 }
 0x383   :  { %v5584_v55 = vpop.f32.mrb[41].mxu1  ;;  %v1877_v29 = vpop.f32.mrb[57].mxu0 }
 0x384   :  { %v5586_v46 = vpop.f32.mrb[42].mxu1  ;;  %v4181_v10 = vpop.f32.mrb[58].mxu0 }
 0x385   :  { %v2115_v4 = vpack.c.bf16 %v5586_v46, %v5580_v41  ;;  %v1960_v23 = vpop.f32.mrb[43].mxu1  ;;  %v2105_v21 = vpack.c.bf16 %v4181_v10, %v5582_v26  ;;  %v1880_v28 = vpop.f32.mrb[59].mxu0  ;;  %v4415_v41 = vld [vmem:[#allocation3 + $0x20] ss:$16 sps:$4 sm:$0xff]  }
 0x386   :  { %v2114_v17 = vpack.c.bf16 %v1960_v23, %v5584_v55  ;;  %v2104_v12 = vpack.c.bf16 %v1880_v28, %v1877_v29 }
 0x38a   :  { %v5592_v19 = vpop.f32.mrb[44].mxu1  ;;  %v5594_v43 = vpop.f32.mrb[60].mxu0 }
 0x38b   :  { %v1973_v5 = vpop.f32.mrb[45].mxu1  ;;  %v1893_v35 = vpop.f32.mrb[61].mxu0 }
 0x38c   :  { %v5596_v40 = vpop.f32.mrb[46].mxu1  ;;  %v4185_v42 = vpop.f32.mrb[62].mxu0 }
 0x38d   :  { %v2117_v7 = vpack.c.bf16 %v5596_v40, %v5592_v19  ;;  %v1976_v48 = vpop.f32.mrb[47].mxu1  ;;  %v2107_v59 = vpack.c.bf16 %v4185_v42, %v5594_v43  ;;  %v1896_v8 = vpop.f32.mrb[63].mxu0 }
 0x38e   :  { %v2116_v56 = vpack.c.bf16 %v1976_v48, %v1973_v5  ;;  %v2106_v53 = vpack.c.bf16 %v1896_v8, %v1893_v35 }
 0x392   :  { %v4188_v60 = vpop.f32.mrb[64].mxu0  ;;  %v5601_v51 = vpop.f32.mrb[48].mxu1 }
 0x393   :  { %v1909_v52 = vpop.f32.mrb[65].mxu0  ;;  %v1989_v57 = vpop.f32.mrb[49].mxu1 }
 0x394   :  { %v4189_v1 = vpop.f32.mrb[66].mxu0  ;;  %v5603_v22 = vpop.f32.mrb[50].mxu1 }
 0x395   :  { %v2109_v25 = vpack.c.bf16 %v4189_v1, %v4188_v60  ;;  %v2119_v30 = vpack.c.bf16 %v5603_v22, %v5601_v51  ;;  %v1912_v49 = vpop.f32.mrb[67].mxu0  ;;  %v1992_v9 = vpop.f32.mrb[51].mxu1  ;;  %v4419_v60 = vld [vmem:[#allocation3 + $0x44] ss:$16 sps:$4 sm:$0xff]  }
 0x396   :  { %v2108_v26 = vpack.c.bf16 %v1912_v49, %v1909_v52  ;;  %v2118_v55 = vpack.c.bf16 %v1992_v9, %v1989_v57  ;;  %v4421_v57 = vld [vmem:[#allocation3 + $0x40] ss:$16 sps:$4 sm:$0xff]  }
 0x397   :  { %v4427_v9 = vld [vmem:[#allocation3 + $0x60] ss:$16 sps:$4 sm:$0xff]  }
 0x398   :  { %3863 = vmatprep.subr.bf16.mxu0 %v2108_v26  ;;  %v4416_v26 = vld [vmem:[#allocation3 + $0x2c] ss:$16 sps:$4 sm:$0xff]  }
 0x399   :  { %3864 = vmatpush3.bf16.msra.mxu0 %v2100_v0 }
 0x39a   :  { %v5607_v29 = vpop.f32.mrb[52].mxu1  ;;  %3865 = vmatprep.subr.bf16.mxu0 %v2109_v25  ;;  %v4425_v25 = vld [vmem:[#allocation3 + $0x64] ss:$16 sps:$4 sm:$0xff]  }
 0x39b   :  { %v2005_v10 = vpop.f32.mrb[53].mxu1 }
 0x39c   :  { %v5609_v23 = vpop.f32.mrb[54].mxu1 }
 0x39d   :  { %v2121_v28 = vpack.c.bf16 %v5609_v23, %v5607_v29  ;;  %v2008_v19 = vpop.f32.mrb[55].mxu1  ;;  %3866 = vmatpush3.bf16.msra.mxu0 %v2101_v54  ;;  %v4418_v29 = vld [vmem:[#allocation3 + $0x28] ss:$16 sps:$4 sm:$0xff]   ;;  %v4422_v23 = vld [vmem:[#allocation3 + $0x4c] ss:$16 sps:$4 sm:$0xff]  }
 0x39e   :  { %v2120_v43 = vpack.c.bf16 %v2008_v19, %v2005_v10  ;;  %3867 = vmatprep.subr.bf16.mxu0 %v2110_v58  ;;  %v4433_v10 = vld [vmem:[#allocation3 + $0x80] ss:$16 sps:$4 sm:$0xff]   ;;  %v4424_v19 = vld [vmem:[#allocation3 + $0x48] ss:$16 sps:$4 sm:$0xff]  }
 0x3a1   :  { %3868 = vmatpush3.bf16.msra.mxu0 %v2102_v2 }
 0x3a2   :  { %v5613_v5 = vpop.f32.mrb[56].mxu1  ;;  %3869 = vmatprep.subr.bf16.mxu0 %v2111_v38 }
 0x3a3   :  { %v2021_v0 = vpop.f32.mrb[57].mxu1 }
 0x3a4   :  { %v5618_v35 = vpop.f32.mrb[58].mxu1 }
 0x3a5   :  { %v2123_v40 = vpack.c.bf16 %v5618_v35, %v5613_v5  ;;  %v2024_v42 = vpop.f32.mrb[59].mxu1  ;;  %3870 = vmatpush3.bf16.msra.mxu0 %v2103_v36  ;;  %v4430_v5 = vld [vmem:[#allocation3 + $0x68] ss:$16 sps:$4 sm:$0xff]   ;;  %v4445_v35 = vld [vmem:[#allocation3 + $0xc0] ss:$16 sps:$4 sm:$0xff]  }
 0x3a6   :  { %v2122_v48 = vpack.c.bf16 %v2024_v42, %v2021_v0  ;;  %3871 = vmatprep.subr.bf16.mxu0 %v2112_v39  ;;  %v4428_v0 = vld [vmem:[#allocation3 + $0x6c] ss:$16 sps:$4 sm:$0xff]   ;;  %v4443_v42 = vld [vmem:[#allocation3 + $0xc4] ss:$16 sps:$4 sm:$0xff]  }
 0x3a9   :  { %3872 = vmatpush3.bf16.msra.mxu0 %v2104_v12  ;;  %v4413_v12 = vld [vmem:[#allocation3 + $0x24] ss:$16 sps:$4 sm:$0xff]  }
 0x3aa   :  { %v4220_v54 = vpop.f32.mrb[60].mxu1  ;;  %3873 = vmatprep.subr.bf16.mxu0 %v2113_v34 }
 0x3ab   :  { %v2037_v58 = vpop.f32.mrb[61].mxu1 }
 0x3ac   :  { %v4221_v2 = vpop.f32.mrb[62].mxu1 }
 0x3ad   :  { %v2125_v45 = vpack.c.bf16 %v4221_v2, %v4220_v54  ;;  %v2040_v20 = vpop.f32.mrb[63].mxu1  ;;  %3874 = vmatpush3.bf16.msra.mxu0 %v2105_v21  ;;  %v4436_v54 = vld [vmem:[#allocation3 + $0x88] ss:$16 sps:$4 sm:$0xff]   ;;  %v4440_v2 = vld [vmem:[#allocation3 + $0xac] ss:$16 sps:$4 sm:$0xff]  }
 0x3ae   :  { %v2124_v38 = vpack.c.bf16 %v2040_v20, %v2037_v58  ;;  %3875 = vmatprep.subr.bf16.mxu0 %v2114_v17  ;;  %v4451_v58 = vld [vmem:[#allocation3 + $0xe0] ss:$16 sps:$4 sm:$0xff]   ;;  %v4442_v20 = vld [vmem:[#allocation3 + $0xa8] ss:$16 sps:$4 sm:$0xff]  }
 0x3b0   :  { %3975 = vmatprep.subr.bf16.mxu1 %v2124_v38  ;;  %v4457_v38 = vld [vmem:[#allocation3 + $0x100] ss:$16 sps:$4 sm:$0xff]  }
 0x3b1   :  { %3876 = vmatpush3.bf16.msra.mxu0 %v2106_v53  ;;  %3976 = vmatpush3.bf16.msra.mxu1 %v2116_v56 }
 0x3b2   :  { %v4224_v8 = vpop.f32.mrb[64].mxu1  ;;  %3877 = vmatprep.subr.bf16.mxu0 %v2115_v4  ;;  %3977 = vmatprep.subr.bf16.mxu1 %v2125_v45  ;;  %v4455_v45 = vld [vmem:[#allocation3 + $0x104] ss:$16 sps:$4 sm:$0xff]  }
 0x3b3   :  { %v2053_v36 = vpop.f32.mrb[65].mxu1 }
 0x3b4   :  { %v4225_v39 = vpop.f32.mrb[66].mxu1 }
 0x3b5   :  { %v2127_v27 = vpack.c.bf16 %v4225_v39, %v4224_v8  ;;  %v2056_v34 = vpop.f32.mrb[67].mxu1  ;;  %3878 = vmatpush3.bf16.msra.mxu0 %v2107_v59  ;;  %3978 = vmatpush3.bf16.msra.mxu1 %v2117_v7  ;;  %v4446_v8 = vld [vmem:[#allocation3 + $0xcc] ss:$16 sps:$4 sm:$0xff]   ;;  %v4448_v39 = vld [vmem:[#allocation3 + $0xc8] ss:$16 sps:$4 sm:$0xff]  }
 0x3b6   :  { %v2126_v21 = vpack.c.bf16 %v2056_v34, %v2053_v36  ;;  %v4461_v36 = vld [vmem:[#allocation3 + $0x124] ss:$16 sps:$4 sm:$0xff]  }
 0x3b7   :  { %v4467_v34 = vld [vmem:[#allocation3 + $0x144] ss:$16 sps:$4 sm:$0xff]  }
 0x3b8   :  { %3979 = vmatprep.subr.bf16.mxu1 %v2126_v21  ;;  %2549 = vmatmul.mubr.bf16.vlgmr.msra.gmra.mrb[68].mxu0 %v4407_v13  ;;  %v4465_v13 = vld [vmem:[#allocation3 + $0x120] ss:$16 sps:$4 sm:$0xff]  }
 0x3b9   :  { %3980 = vmatpush3.bf16.msra.mxu1 %v2118_v55  ;;  %2556 = vmatprep.mubr.bf16.mxu0 %v4413_v12  ;;  %v4431_v55 = vld [vmem:[#allocation3 + $0x84] ss:$16 sps:$4 sm:$0xff]   ;;  %v4454_v12 = vld [vmem:[#allocation3 + $0xe8] ss:$16 sps:$4 sm:$0xff]   ;;  %v4471_v21 = vld [vmem:[#allocation3 + $0x140] ss:$16 sps:$4 sm:$0xff]  }
 0x3ba   :  { %v4228_v17 = vpop.f32.mrb[68].mxu1  ;;  %3981 = vmatprep.subr.bf16.mxu1 %v2127_v27  ;;  %v4452_v27 = vld [vmem:[#allocation3 + $0xec] ss:$16 sps:$4 sm:$0xff]  }
 0x3bb   :  { %v2069_v56 = vpop.f32.mrb[69].mxu1 }
 0x3bc   :  { %v4229_v53 = vpop.f32.mrb[70].mxu1 }
 0x3bd   :  { %v2129_v46 = vpack.c.bf16 %v4229_v53, %v4228_v17  ;;  %v2072_v4 = vpop.f32.mrb[71].mxu1  ;;  %3982 = vmatpush3.bf16.msra.mxu1 %v2119_v30  ;;  %v4410_v30 = vld [vmem:[#allocation3 + $0x8] ss:$16 sps:$4 sm:$0xff]   ;;  %v4458_v17 = vld [vmem:[#allocation3 + $0x10c] ss:$16 sps:$4 sm:$0xff]  }
 0x3be   :  { %v2128_v51 = vpack.c.bf16 %v2072_v4, %v2069_v56  ;;  %v4473_v56 = vld [vmem:[#allocation3 + $0x164] ss:$16 sps:$4 sm:$0xff]   ;;  %v4460_v53 = vld [vmem:[#allocation3 + $0x108] ss:$16 sps:$4 sm:$0xff]  }
 0x3bf   :  { %v4479_v4 = vld [vmem:[#allocation3 + $0x184] ss:$16 sps:$4 sm:$0xff]  }
 0x3c0   :  { %3983 = vmatprep.subr.bf16.mxu1 %v2128_v51  ;;  %2557 = vmatmul.mubr.bf16.gmra.mrb[72].mxu0 %v4415_v41  ;;  %v4477_v41 = vld [vmem:[#allocation3 + $0x160] ss:$16 sps:$4 sm:$0xff]  }
 0x3c1   :  { %3984 = vmatpush3.bf16.msra.mxu1 %v2120_v43  ;;  %2564 = vmatprep.mubr.bf16.mxu0 %v4419_v60  ;;  %v4439_v43 = vld [vmem:[#allocation3 + $0xa0] ss:$16 sps:$4 sm:$0xff]   ;;  %v4466_v60 = vld [vmem:[#allocation3 + $0x128] ss:$16 sps:$4 sm:$0xff]  }
 0x3c2   :  { %v4232_v7 = vpop.f32.mrb[72].mxu1  ;;  %3985 = vmatprep.subr.bf16.mxu1 %v2129_v46  ;;  %v4463_v46 = vld [vmem:[#allocation3 + $0x12c] ss:$16 sps:$4 sm:$0xff]   ;;  %v4483_v51 = vld [vmem:[#allocation3 + $0x180] ss:$16 sps:$4 sm:$0xff]  }
 0x3c3   :  { %v2085_v59 = vpop.f32.mrb[73].mxu1 }
 0x3c4   :  { %v4233_v52 = vpop.f32.mrb[74].mxu1 }
 0x3c5   :  { %v2131_v1 = vpack.c.bf16 %v4233_v52, %v4232_v7  ;;  %v2088_v22 = vpop.f32.mrb[75].mxu1  ;;  %3986 = vmatpush3.bf16.msra.mxu1 %v2121_v28  ;;  %v4437_v28 = vld [vmem:[#allocation3 + $0xa4] ss:$16 sps:$4 sm:$0xff]   ;;  %v4469_v7 = vld [vmem:[#allocation3 + $0x14c] ss:$16 sps:$4 sm:$0xff]  }
 0x3c6   :  { %v2130_v49 = vpack.c.bf16 %v2088_v22, %v2085_v59  ;;  %v4485_v59 = vld [vmem:[#allocation3 + $0x1a4] ss:$16 sps:$4 sm:$0xff]   ;;  %v4472_v52 = vld [vmem:[#allocation3 + $0x148] ss:$16 sps:$4 sm:$0xff]  }
 0x3c7   :  { %v4491_v22 = vld [vmem:[#allocation3 + $0x1c4] ss:$16 sps:$4 sm:$0xff]  }
 0x3c8   :  { %3987 = vmatprep.subr.bf16.mxu1 %v2130_v49  ;;  %2565 = vmatmul.mubr.bf16.gmra.mrb[76].mxu0 %v4421_v57  ;;  %v4489_v57 = vld [vmem:[#allocation3 + $0x1a0] ss:$16 sps:$4 sm:$0xff]  }
 0x3c9   :  { %3988 = vmatpush3.bf16.msra.mxu1 %v2122_v48  ;;  %2572 = vmatprep.mubr.bf16.mxu0 %v4425_v25  ;;  %v4449_v48 = vld [vmem:[#allocation3 + $0xe4] ss:$16 sps:$4 sm:$0xff]   ;;  %v4478_v25 = vld [vmem:[#allocation3 + $0x168] ss:$16 sps:$4 sm:$0xff]   ;;  %v4495_v49 = vld [vmem:[#allocation3 + $0x1c0] ss:$16 sps:$4 sm:$0xff]  }
 0x3ca   :  { %3989 = vmatprep.subr.bf16.mxu1 %v2131_v1  ;;  %v4475_v1 = vld [vmem:[#allocation3 + $0x16c] ss:$16 sps:$4 sm:$0xff]  }
 0x3cd   :  { %3990 = vmatpush3.bf16.msra.mxu1 %v2123_v40  ;;  %v4434_v40 = vld [vmem:[#allocation3 + $0x8c] ss:$16 sps:$4 sm:$0xff]  }
 0x3d0   :  { %2710 = vmatmul.mubr.bf16.vlgmr.msra.gmra.mrb[76].mxu1 %v4410_v30  ;;  %2573 = vmatmul.mubr.bf16.gmra.mrb[80].mxu0 %v4427_v9  ;;  %v4481_v30 = vld [vmem:[#allocation3 + $0x18c] ss:$16 sps:$4 sm:$0xff]   ;;  %v4497_v9 = vld [vmem:[#allocation3 + $0x1e4] ss:$16 sps:$4 sm:$0xff]  }
 0x3d1   :  { %2717 = vmatprep.mubr.bf16.mxu1 %v4416_v26  ;;  %2580 = vmatprep.mubr.bf16.mxu0 %v4431_v55  ;;  %v4484_v26 = vld [vmem:[#allocation3 + $0x188] ss:$16 sps:$4 sm:$0xff]   ;;  %v4501_v55 = vld [vmem:[#allocation3 + $0x1e0] ss:$16 sps:$4 sm:$0xff]  }
 0x3d8   :  { %2718 = vmatmul.mubr.bf16.gmra.mrb[80].mxu1 %v4418_v29  ;;  %2581 = vmatmul.mubr.bf16.gmra.mrb[84].mxu0 %v4433_v10  ;;  %v4487_v29 = vld [vmem:[#allocation3 + $0x1ac] ss:$16 sps:$4 sm:$0xff]   ;;  %v4490_v10 = vld [vmem:[#allocation3 + $0x1a8] ss:$16 sps:$4 sm:$0xff]  }
 0x3d9   :  { %2725 = vmatprep.mubr.bf16.mxu1 %v4422_v23  ;;  %2588 = vmatprep.mubr.bf16.mxu0 %v4437_v28  ;;  %v4493_v23 = vld [vmem:[#allocation3 + $0x1cc] ss:$16 sps:$4 sm:$0xff]   ;;  %v4496_v28 = vld [vmem:[#allocation3 + $0x1c8] ss:$16 sps:$4 sm:$0xff]  }
 0x3e0   :  { %2726 = vmatmul.mubr.bf16.gmra.mrb[84].mxu1 %v4424_v19  ;;  %2589 = vmatmul.mubr.bf16.gmra.mrb[88].mxu0 %v4439_v43  ;;  %v4499_v19 = vld [vmem:[#allocation3 + $0x1ec] ss:$16 sps:$4 sm:$0xff]   ;;  %v4502_v43 = vld [vmem:[#allocation3 + $0x1e8] ss:$16 sps:$4 sm:$0xff]  }
 0x3e1   :  { %2733 = vmatprep.mubr.bf16.mxu1 %v4428_v0  ;;  %2596 = vmatprep.mubr.bf16.mxu0 %v4443_v42 }
 0x3e8   :  { %2734 = vmatmul.mubr.bf16.gmra.mrb[88].mxu1 %v4430_v5  ;;  %2597 = vmatmul.mubr.bf16.gmra.mrb[92].mxu0 %v4445_v35 }
 0x3e9   :  { %2741 = vmatprep.mubr.bf16.mxu1 %v4434_v40  ;;  %2604 = vmatprep.mubr.bf16.mxu0 %v4449_v48 }
 0x3f0   :  { %2742 = vmatmul.mubr.bf16.gmra.mrb[92].mxu1 %v4436_v54  ;;  %2605 = vmatmul.mubr.bf16.gmra.mrb[96].mxu0 %v4451_v58 }
 0x3f1   :  { %2749 = vmatprep.mubr.bf16.mxu1 %v4440_v2  ;;  %2612 = vmatprep.mubr.bf16.mxu0 %v4455_v45 }
 0x3f8   :  { %2750 = vmatmul.mubr.bf16.gmra.mrb[96].mxu1 %v4442_v20  ;;  %2613 = vmatmul.mubr.bf16.gmra.mrb[100].mxu0 %v4457_v38 }
 0x3f9   :  { %2757 = vmatprep.mubr.bf16.mxu1 %v4446_v8  ;;  %2620 = vmatprep.mubr.bf16.mxu0 %v4461_v36 }
 0x400   :  { %2758 = vmatmul.mubr.bf16.gmra.mrb[100].mxu1 %v4448_v39  ;;  %2621 = vmatmul.mubr.bf16.gmra.mrb[104].mxu0 %v4465_v13 }
 0x401   :  { %2765 = vmatprep.mubr.bf16.mxu1 %v4452_v27  ;;  %2628 = vmatprep.mubr.bf16.mxu0 %v4467_v34 }
 0x408   :  { %2766 = vmatmul.mubr.bf16.gmra.mrb[104].mxu1 %v4454_v12  ;;  %2629 = vmatmul.mubr.bf16.gmra.mrb[108].mxu0 %v4471_v21 }
 0x409   :  { %2773 = vmatprep.mubr.bf16.mxu1 %v4458_v17  ;;  %2636 = vmatprep.mubr.bf16.mxu0 %v4473_v56 }
 0x410   :  { %2774 = vmatmul.mubr.bf16.gmra.mrb[108].mxu1 %v4460_v53  ;;  %2637 = vmatmul.mubr.bf16.gmra.mrb[112].mxu0 %v4477_v41 }
 0x411   :  { %2781 = vmatprep.mubr.bf16.mxu1 %v4463_v46  ;;  %2644 = vmatprep.mubr.bf16.mxu0 %v4479_v4 }
 0x418   :  { %2782 = vmatmul.mubr.bf16.gmra.mrb[112].mxu1 %v4466_v60  ;;  %2645 = vmatmul.mubr.bf16.gmra.mrb[116].mxu0 %v4483_v51 }
 0x419   :  { %2789 = vmatprep.mubr.bf16.mxu1 %v4469_v7  ;;  %2652 = vmatprep.mubr.bf16.mxu0 %v4485_v59 }
 0x420   :  { %2790 = vmatmul.mubr.bf16.gmra.mrb[116].mxu1 %v4472_v52  ;;  %2653 = vmatmul.mubr.bf16.gmra.mrb[120].mxu0 %v4489_v57 }
 0x421   :  { %2797 = vmatprep.mubr.bf16.mxu1 %v4475_v1  ;;  %2660 = vmatprep.mubr.bf16.mxu0 %v4491_v22 }
 0x428   :  { %2798 = vmatmul.mubr.bf16.gmra.mrb[120].mxu1 %v4478_v25  ;;  %2661 = vmatmul.mubr.bf16.gmra.mrb[124].mxu0 %v4495_v49 }
 0x429   :  { %2805 = vmatprep.mubr.bf16.mxu1 %v4481_v30  ;;  %2668 = vmatprep.mubr.bf16.mxu0 %v4497_v9 }
 0x430   :  { %2806 = vmatmul.mubr.bf16.gmra.mrb[124].mxu1 %v4484_v26  ;;  %2669 = vmatmul.mubr.bf16.gmra.mrb[128].mxu0 %v4501_v55 }
 0x431   :  { %2813 = vmatprep.mubr.bf16.mxu1 %v4487_v29 }
 0x438   :  { %2814 = vmatmul.mubr.bf16.gmra.mrb[128].mxu1 %v4490_v10 }
 0x439   :  { %2821 = vmatprep.mubr.bf16.mxu1 %v4493_v23 }
 0x440   :  { %2822 = vmatmul.mubr.bf16.gmra.mrb[132].mxu1 %v4496_v28 }
 0x441   :  { %2829 = vmatprep.mubr.bf16.mxu1 %v4499_v19 }
 0x448   :  { %2830 = vmatmul.mubr.bf16.gmra.mrb[136].mxu1 %v4502_v43 }
 0x48b   :  { %v3879_v0 = vpop.f32.mrb[68].mxu0 }
 0x48c   :  { %v3880_v42 = vpop.f32.mrb[69].mxu0 }
 0x48d   :  { %v3881_v5 = vadd.f32 %v3880_v42, %v3879_v0  ;;  %v3882_v35 = vpop.f32.mrb[70].mxu0 }
 0x48e   :  { %v3883_v40 = vpop.f32.mrb[71].mxu0 }
 0x48f   :  { %v3884_v48 = vadd.f32 %v3883_v40, %v3882_v35 }
 0x493   :  { %v3885_v54 = vpop.f32.mrb[72].mxu0 }
 0x494   :  { %v3886_v58 = vpop.f32.mrb[73].mxu0 }
 0x495   :  { %v3887_v2 = vadd.f32 %v3886_v58, %v3885_v54  ;;  %v3888_v45 = vpop.f32.mrb[74].mxu0 }
 0x496   :  { %v3889_v20 = vpop.f32.mrb[75].mxu0 }
 0x497   :  { %v3890_v38 = vadd.f32 %v3889_v20, %v3888_v45 }
 0x49b   :  { %v3891_v8 = vpop.f32.mrb[76].mxu0 }
 0x49c   :  { %v3892_v36 = vpop.f32.mrb[77].mxu0 }
 0x49d   :  { %v3893_v39 = vadd.f32 %v3892_v36, %v3891_v8  ;;  %v3894_v13 = vpop.f32.mrb[78].mxu0 }
 0x49e   :  { %v3895_v27 = vpop.f32.mrb[79].mxu0 }
 0x49f   :  { %v3896_v34 = vadd.f32 %v3895_v27, %v3894_v13 }
 0x4a3   :  { %v3991_v12 = vpop.f32.mrb[76].mxu1  ;;  %v3897_v21 = vpop.f32.mrb[80].mxu0 }
 0x4a4   :  { %v3992_v17 = vpop.f32.mrb[77].mxu1  ;;  %v3898_v56 = vpop.f32.mrb[81].mxu0 }
 0x4a5   :  { %v3993_v53 = vadd.f32 %v3992_v17, %v3991_v12  ;;  %v3994_v41 = vpop.f32.mrb[78].mxu1  ;;  %v5634_v46 = vadd.f32 %v3898_v56, %v3897_v21  ;;  %v3900_v4 = vpop.f32.mrb[82].mxu0 }
 0x4a6   :  { %v3995_v60 = vpop.f32.mrb[79].mxu1  ;;  %v3901_v51 = vpop.f32.mrb[83].mxu0 }
 0x4a7   :  { %v2712_v7 = vadd.f32 %v3993_v53, %v3881_v5  ;;  %v3996_v59 = vadd.f32 %v3995_v60, %v3994_v41  ;;  %v5636_v52 = vadd.f32 %v3901_v51, %v3900_v4 }
 0x4a9   :  { %v2838_v57 = vmul.f32 14.285714, %v2712_v7  ;;  %v2715_v1 = vadd.f32 %v3996_v59, %v3884_v48 }
 0x4ab   :  { %v2839_v22 = vmul.f32 14.285714, %v2715_v1  ;;  %v3997_v25 = vpop.f32.mrb[80].mxu1  ;;  %v5641_v49 = vsel %vm2870_vm3, %v2838_v57, -1e+30  ;;  %v3903_v30 = vpop.f32.mrb[84].mxu0 }
 0x4ac   :  { %v3998_v9 = vpop.f32.mrb[81].mxu1  ;;  %2905 = vmax.xlane.f32.xlu0 %v5641_v49  ;;  %v3225_v26 = vsel %vm6295_vm9, %v5641_v49, 0.0  ;;  %v3904_v55 = vpop.f32.mrb[85].mxu0  ;;  %vm6311_vm9 = vcmp.eq.s32.totalorder %v5320_v31, %v5042_v50 }
 0x4ad   :  { %v3999_v29 = vadd.f32 %v3998_v9, %v3997_v25  ;;  %v4000_v10 = vpop.f32.mrb[82].mxu1  ;;  %3241 = vadd.xlane.f32.xlu1 %v3225_v26  ;;  %v5648_v23 = vadd.f32 %v3904_v55, %v3903_v30  ;;  %v3906_v28 = vpop.f32.mrb[86].mxu0  ;;  %v5652_v5 = vsel %vm2870_vm3, %v2839_v22, -1e+30 }
 0x4ae   :  { %v4001_v19 = vpop.f32.mrb[83].mxu1  ;;  %v3907_v43 = vpop.f32.mrb[87].mxu0  ;;  %v3226_v54 = vsel %vm6296_vm4, %v5652_v5, 0.0  ;;  %vm6312_vm4 = vcmp.eq.s32.totalorder %v5322_v32, %v5042_v50 }
 0x4af   :  { %v2720_v0 = vadd.f32 %v3999_v29, %v3887_v2  ;;  %v4002_v42 = vadd.f32 %v4001_v19, %v4000_v10  ;;  %v5654_v35 = vadd.f32 %v3907_v43, %v3906_v28 }
 0x4b0   :  { %2907 = vmax.xlane.f32.xlu0 %v5652_v5 }
 0x4b1   :  { %v2840_v40 = vmul.f32 14.285714, %v2720_v0  ;;  %v2723_v48 = vadd.f32 %v4002_v42, %v3890_v38 }
 0x4b3   :  { %v2841_v58 = vmul.f32 14.285714, %v2723_v48  ;;  %v4003_v45 = vpop.f32.mrb[84].mxu1  ;;  %v5663_v2 = vsel %vm2870_vm3, %v2840_v40, -1e+30  ;;  %v3909_v20 = vpop.f32.mrb[88].mxu0 }
 0x4b4   :  { %v4004_v8 = vpop.f32.mrb[85].mxu1  ;;  %3243 = vadd.xlane.f32.xlu0 %v3226_v54  ;;  %2909 = vmax.xlane.f32.xlu1 %v5663_v2  ;;  %v3910_v36 = vpop.f32.mrb[89].mxu0  ;;  %v3227_v17 = vsel %vm6297_vm5, %v5663_v2, 0.0  ;;  %vm6313_vm5 = vmmov %vm6311_vm9 }
 0x4b5   :  { %v4005_v13 = vadd.f32 %v4004_v8, %v4003_v45  ;;  %v4006_v27 = vpop.f32.mrb[86].mxu1  ;;  %v5666_v38 = vadd.f32 %v3910_v36, %v3909_v20  ;;  %v3912_v12 = vpop.f32.mrb[90].mxu0  ;;  %v5674_v4 = vsel %vm2870_vm3, %v2841_v58, -1e+30 }
 0x4b6   :  { %v4007_v21 = vpop.f32.mrb[87].mxu1  ;;  %v3913_v56 = vpop.f32.mrb[91].mxu0  ;;  %v3228_v59 = vsel %vm6298_vm6, %v5674_v4, 0.0  ;;  %vm6314_vm6 = vmmov %vm6312_vm4 }
 0x4b7   :  { %v2728_v53 = vadd.f32 %v4005_v13, %v3893_v39  ;;  %v4008_v41 = vadd.f32 %v4007_v21, %v4006_v27  ;;  %v5676_v60 = vadd.f32 %v3913_v56, %v3912_v12 }
 0x4b8   :  { %2911 = vmax.xlane.f32.xlu0 %v5674_v4  ;;  %3245 = vadd.xlane.f32.xlu1 %v3227_v17 }
 0x4b9   :  { %v2842_v51 = vmul.f32 14.285714, %v2728_v53  ;;  %v2731_v7 = vadd.f32 %v4008_v41, %v3896_v34 }
 0x4bb   :  { %v2843_v57 = vmul.f32 14.285714, %v2731_v7  ;;  %v4009_v1 = vpop.f32.mrb[88].mxu1  ;;  %v5685_v39 = vsel %vm2870_vm3, %v2842_v51, -1e+30  ;;  %v3915_v22 = vpop.f32.mrb[92].mxu0 }
 0x4bc   :  { %v4010_v25 = vpop.f32.mrb[89].mxu1  ;;  %3247 = vadd.xlane.f32.xlu0 %v3228_v59  ;;  %2913 = vmax.xlane.f32.xlu1 %v5685_v39  ;;  %v3916_v30 = vpop.f32.mrb[93].mxu0  ;;  %v3229_v10 = vsel %vm6299_vm7, %v5685_v39, 0.0  ;;  %vm6315_vm7 = vcmp.eq.s32.totalorder %v5324_v33, %v5042_v50 }
 0x4bd   :  { %v4011_v9 = vadd.f32 %v4010_v25, %v4009_v1  ;;  %v4012_v26 = vpop.f32.mrb[90].mxu1  ;;  %v5688_v34 = vadd.f32 %v3916_v30, %v3915_v22  ;;  %v3918_v55 = vpop.f32.mrb[94].mxu0  ;;  %v5697_v0 = vsel %vm2870_vm3, %v2843_v57, -1e+30 }
 0x4be   :  { %v4013_v29 = vpop.f32.mrb[91].mxu1  ;;  %v3919_v28 = vpop.f32.mrb[95].mxu0  ;;  %v3230_v54 = vsel %vm6300_vm11, %v5697_v0, 0.0  ;;  %vm6316_vm11 = vcmp.eq.s32.totalorder %v5330_v24, %v5042_v50 }
 0x4bf   :  { %v2736_v19 = vadd.f32 %v4011_v9, %v5634_v46  ;;  %v4014_v43 = vadd.f32 %v4013_v29, %v4012_v26  ;;  %v5699_v42 = vadd.f32 %v3919_v28, %v3918_v55 }
 0x4c0   :  { %2915 = vmax.xlane.f32.xlu0 %v5697_v0  ;;  %3249 = vadd.xlane.f32.xlu1 %v3229_v10 }
 0x4c1   :  { %v2844_v40 = vmul.f32 14.285714, %v2736_v19  ;;  %v2739_v48 = vadd.f32 %v4014_v43, %v5636_v52 }
 0x4c3   :  { %v2845_v58 = vmul.f32 14.285714, %v2739_v48  ;;  %v4015_v46 = vpop.f32.mrb[92].mxu1  ;;  %v5709_v45 = vsel %vm2870_vm3, %v2844_v40, -1e+30  ;;  %v3921_v20 = vpop.f32.mrb[96].mxu0 }
 0x4c4   :  { %v4016_v8 = vpop.f32.mrb[93].mxu1  ;;  %3251 = vadd.xlane.f32.xlu0 %v3230_v54  ;;  %2917 = vmax.xlane.f32.xlu1 %v5709_v45  ;;  %v3922_v36 = vpop.f32.mrb[97].mxu0 }
 0x4c5   :  { %v4017_v13 = vadd.f32 %v4016_v8, %v4015_v46  ;;  %v4018_v27 = vpop.f32.mrb[94].mxu1  ;;  %v5712_v52 = vadd.f32 %v3922_v36, %v3921_v20  ;;  %v3924_v12 = vpop.f32.mrb[98].mxu0  ;;  %v5717_v41 = vsel %vm2870_vm3, %v2845_v58, -1e+30 }
 0x4c6   :  { %v4019_v21 = vpop.f32.mrb[95].mxu1  ;;  %v3925_v17 = vpop.f32.mrb[99].mxu0 }
 0x4c7   :  { %v2744_v56 = vadd.f32 %v4017_v13, %v5648_v23  ;;  %v4020_v53 = vadd.f32 %v4019_v21, %v4018_v27  ;;  %v5719_v51 = vadd.f32 %v3925_v17, %v3924_v12 }
 0x4c8   :  { %2919 = vmax.xlane.f32.xlu0 %v5717_v41 }
 0x4c9   :  { %v2846_v7 = vmul.f32 14.285714, %v2744_v56  ;;  %v2747_v59 = vadd.f32 %v4020_v53, %v5654_v35 }
 0x4cb   :  { %v2847_v57 = vmul.f32 14.285714, %v2747_v59  ;;  %v4021_v1 = vpop.f32.mrb[96].mxu1  ;;  %v5725_v22 = vsel %vm2870_vm3, %v2846_v7, -1e+30  ;;  %v3927_v25 = vpop.f32.mrb[100].mxu0 }
 0x4cc   :  { %v4022_v23 = vpop.f32.mrb[97].mxu1  ;;  %2921 = vmax.xlane.f32.xlu1 %v5725_v22  ;;  %v3928_v30 = vpop.f32.mrb[101].mxu0  ;;  %v3233_v47 = vsel %vm6313_vm5, %v5725_v22, 0.0 }
 0x4cd   :  { %v4023_v9 = vadd.f32 %v4022_v23, %v4021_v1  ;;  %v4024_v26 = vpop.f32.mrb[98].mxu1  ;;  %v5730_v55 = vsel %vm2870_vm3, %v2847_v57, -1e+30  ;;  %v5732_v29 = vadd.f32 %v3928_v30, %v3927_v25  ;;  %v3930_v35 = vpop.f32.mrb[102].mxu0 }
 0x4ce   :  { %v4025_v10 = vpop.f32.mrb[99].mxu1  ;;  %2923 = vmax.xlane.f32.xlu0 %v5730_v55  ;;  %v3931_v28 = vpop.f32.mrb[103].mxu0  ;;  %v3234_v16 = vsel %vm6314_vm6, %v5730_v55, 0.0 }
 0x4cf   :  { %v2752_v19 = vadd.f32 %v4023_v9, %v5666_v38  ;;  %v4026_v43 = vadd.f32 %v4025_v10, %v4024_v26  ;;  %v3932_v40 = vadd.f32 %v3931_v28, %v3930_v35 }
 0x4d1   :  { %v2848_v48 = vmul.f32 14.285714, %v2752_v19  ;;  %v2755_v54 = vadd.f32 %v4026_v43, %v5676_v60 }
 0x4d3   :  { %v2849_v58 = vmul.f32 14.285714, %v2755_v54  ;;  %v4027_v46 = vpop.f32.mrb[100].mxu1  ;;  %v5739_v20 = vsel %vm2870_vm3, %v2848_v48, -1e+30  ;;  %v3933_v8 = vpop.f32.mrb[104].mxu0 }
 0x4d4   :  { %v4028_v36 = vpop.f32.mrb[101].mxu1  ;;  %2925 = vmax.xlane.f32.xlu1 %v5739_v20  ;;  %v3934_v13 = vpop.f32.mrb[105].mxu0 }
 0x4d5   :  { %v4029_v27 = vadd.f32 %v4028_v36, %v4027_v46  ;;  %v4030_v12 = vpop.f32.mrb[102].mxu1  ;;  %v5744_v38 = vsel %vm2870_vm3, %v2849_v58, -1e+30  ;;  %v5746_v21 = vadd.f32 %v3934_v13, %v3933_v8  ;;  %v3936_v60 = vpop.f32.mrb[106].mxu0 }
 0x4d6   :  { %v4031_v17 = vpop.f32.mrb[103].mxu1  ;;  %2927 = vmax.xlane.f32.xlu0 %v5744_v38  ;;  %v3937_v56 = vpop.f32.mrb[107].mxu0 }
 0x4d7   :  { %v2760_v53 = vadd.f32 %v4029_v27, %v5688_v34  ;;  %v4032_v7 = vadd.f32 %v4031_v17, %v4030_v12  ;;  %v5750_v59 = vadd.f32 %v3937_v56, %v3936_v60 }
 0x4d9   :  { %v2850_v57 = vmul.f32 14.285714, %v2760_v53  ;;  %v2763_v1 = vadd.f32 %v4032_v7, %v5699_v42 }
 0x4db   :  { %v2851_v25 = vmul.f32 14.285714, %v2763_v1  ;;  %v4033_v23 = vpop.f32.mrb[104].mxu1  ;;  %v5755_v30 = vsel %vm2870_vm3, %v2850_v57, -1e+30  ;;  %v3939_v9 = vpop.f32.mrb[108].mxu0 }
 0x4dc   :  { %v4034_v26 = vpop.f32.mrb[105].mxu1  ;;  %2929 = vmax.xlane.f32.xlu1 %v5755_v30  ;;  %v3940_v35 = vpop.f32.mrb[109].mxu0 }
 0x4dd   :  { %v4035_v10 = vadd.f32 %v4034_v26, %v4033_v23  ;;  %v4036_v28 = vpop.f32.mrb[106].mxu1  ;;  %v5760_v34 = vsel %vm2870_vm3, %v2851_v25, -1e+30  ;;  %v5762_v19 = vadd.f32 %v3940_v35, %v3939_v9  ;;  %v3942_v42 = vpop.f32.mrb[110].mxu0 }
 0x4de   :  { %v4037_v43 = vpop.f32.mrb[107].mxu1  ;;  %2931 = vmax.xlane.f32.xlu0 %v5760_v34  ;;  %v3943_v48 = vpop.f32.mrb[111].mxu0 }
 0x4df   :  { %v2768_v54 = vadd.f32 %v4035_v10, %v5712_v52  ;;  %v4038_v58 = vadd.f32 %v4037_v43, %v4036_v28  ;;  %v5766_v46 = vadd.f32 %v3943_v48, %v3942_v42 }
 0x4e1   :  { %v2852_v8 = vmul.f32 14.285714, %v2768_v54  ;;  %v2771_v36 = vadd.f32 %v4038_v58, %v5719_v51 }
 0x4e3   :  { %v2853_v13 = vmul.f32 14.285714, %v2771_v36  ;;  %v4039_v27 = vpop.f32.mrb[108].mxu1  ;;  %v5771_v12 = vsel %vm2870_vm3, %v2852_v8, -1e+30  ;;  %v3945_v60 = vpop.f32.mrb[112].mxu0 }
 0x4e4   :  { %v4040_v17 = vpop.f32.mrb[109].mxu1  ;;  %2933 = vmax.xlane.f32.xlu1 %v5771_v12  ;;  %v3946_v56 = vpop.f32.mrb[113].mxu0 }
 0x4e5   :  { %v4041_v53 = vadd.f32 %v4040_v17, %v4039_v27  ;;  %v4042_v7 = vpop.f32.mrb[110].mxu1  ;;  %v5776_v52 = vsel %vm2870_vm3, %v2853_v13, -1e+30  ;;  %v5778_v57 = vadd.f32 %v3946_v56, %v3945_v60  ;;  %v3948_v51 = vpop.f32.mrb[114].mxu0 }
 0x4e6   :  { %v4043_v1 = vpop.f32.mrb[111].mxu1  ;;  %2935 = vmax.xlane.f32.xlu0 %v5776_v52  ;;  %v3949_v25 = vpop.f32.mrb[115].mxu0 }
 0x4e7   :  { %v2776_v23 = vadd.f32 %v4041_v53, %v5732_v29  ;;  %v4044_v9 = vadd.f32 %v4043_v1, %v4042_v7  ;;  %v5782_v26 = vadd.f32 %v3949_v25, %v3948_v51 }
 0x4e9   :  { %v2854_v35 = vmul.f32 14.285714, %v2776_v23  ;;  %v2779_v10 = vadd.f32 %v4044_v9, %v3932_v40 }
 0x4eb   :  { %v2855_v28 = vmul.f32 14.285714, %v2779_v10  ;;  %v4045_v42 = vpop.f32.mrb[112].mxu1  ;;  %v5786_v43 = vsel %vm2870_vm3, %v2854_v35, -1e+30  ;;  %v3951_v48 = vpop.f32.mrb[116].mxu0 }
 0x4ec   :  { %v4046_v54 = vpop.f32.mrb[113].mxu1  ;;  %2937 = vmax.xlane.f32.xlu0 %v5786_v43  ;;  %v3273_v29 = vsel %vm6301_vm14, %v5786_v43, 0.0  ;;  %v3952_v58 = vpop.f32.mrb[117].mxu0  ;;  %vm6317_vm14 = vmmov %vm6315_vm7 }
 0x4ed   :  { %v4047_v8 = vadd.f32 %v4046_v54, %v4045_v42  ;;  %v4048_v36 = vpop.f32.mrb[114].mxu1  ;;  %3289 = vadd.xlane.f32.xlu1 %v3273_v29  ;;  %v5795_v40 = vsel %vm2870_vm3, %v2855_v28, -1e+30  ;;  %v5797_v13 = vadd.f32 %v3952_v58, %v3951_v48  ;;  %v3954_v27 = vpop.f32.mrb[118].mxu0  ;;  %v3235_v32 = vsel %vm6317_vm14, %v5739_v20, 0.0 }
 0x4ee   :  { %v4049_v60 = vpop.f32.mrb[115].mxu1  ;;  %v3274_v17 = vsel %vm6302_vm15, %v5795_v40, 0.0  ;;  %v3955_v56 = vpop.f32.mrb[119].mxu0  ;;  %vm6318_vm15 = vmmov %vm6316_vm11 }
 0x4ef   :  { %v2784_v62 = vadd.f32 %v4047_v8, %v5746_v21  ;;  %v4050_v53 = vadd.f32 %v4049_v60, %v4048_v36  ;;  %v5804_v7 = vadd.f32 %v3955_v56, %v3954_v27 }
 0x4f0   :  { %3291 = vadd.xlane.f32.xlu0 %v3274_v17 }
 0x4f1   :  { %v2856_v51 = vmul.f32 14.285714, %v2784_v62  ;;  %v2787_v1 = vadd.f32 %v4050_v53, %v5750_v59  ;;  %2939 = vmax.xlane.f32.xlu1 %v5795_v40 }
 0x4f3   :  { %v2857_v25 = vmul.f32 14.285714, %v2787_v1  ;;  %v4051_v23 = vpop.f32.mrb[116].mxu1  ;;  %v5810_v9 = vsel %vm2870_vm3, %v2856_v51, -1e+30  ;;  %v3957_v63 = vpop.f32.mrb[120].mxu0 }
 0x4f4   :  { %v4052_v35 = vpop.f32.mrb[117].mxu1  ;;  %v3958_v10 = vpop.f32.mrb[121].mxu0  ;;  %v3275_v27 = vsel %vm6303_vm0, %v5810_v9, 0.0  ;;  %vm6329_vm0 = vcmp.eq.s32.totalorder %v5360_v11, %v5042_v50 }
 0x4f5   :  { %v4053_v28 = vadd.f32 %v4052_v35, %v4051_v23  ;;  %v4054_v21 = vpop.f32.mrb[118].mxu1  ;;  %2941 = vmax.xlane.f32.xlu1 %v5810_v9  ;;  %v5815_v42 = vsel %vm2870_vm3, %v2857_v25, -1e+30  ;;  %v5817_v59 = vadd.f32 %v3958_v10, %v3957_v63  ;;  %v3960_v48 = vpop.f32.mrb[122].mxu0 }
 0x4f6   :  { %v4055_v54 = vpop.f32.mrb[119].mxu1  ;;  %2943 = vmax.xlane.f32.xlu0 %v5815_v42  ;;  %v3961_v29 = vpop.f32.mrb[123].mxu0  ;;  %v3276_v56 = vsel %vm6304_vm13, %v5815_v42, 0.0  ;;  %vm6330_vm13 = vcmp.eq.s32.totalorder %v5362_v3, %v5042_v50 }
 0x4f7   :  { %v2792_v58 = vadd.f32 %v4053_v28, %v5762_v19  ;;  %v4056_v8 = vadd.f32 %v4055_v54, %v4054_v21  ;;  %v5821_v36 = vadd.f32 %v3961_v29, %v3960_v48 }
 0x4f9   :  { %v2858_v60 = vmul.f32 14.285714, %v2792_v58  ;;  %v2795_v17 = vadd.f32 %v4056_v8, %v5766_v46  ;;  %3293 = vadd.xlane.f32.xlu1 %v3275_v27 }
 0x4fa   :  { %3295 = vadd.xlane.f32.xlu0 %v3276_v56 }
 0x4fb   :  { %v2859_v62 = vmul.f32 14.285714, %v2795_v17  ;;  %v4057_v19 = vpop.f32.mrb[120].mxu1  ;;  %v5834_v53 = vsel %vm2870_vm3, %v2858_v60, -1e+30  ;;  %v3963_v51 = vpop.f32.mrb[124].mxu0 }
 0x4fc   :  { %v4058_v1 = vpop.f32.mrb[121].mxu1  ;;  %v3964_v6 = vpop.f32.mrb[125].mxu0  ;;  %v3277_v54 = vsel %vm6305_vm12, %v5834_v53, 0.0  ;;  %vm6331_vm12 = vmmov %vm6329_vm0 }
 0x4fd   :  { %v4059_v25 = vadd.f32 %v4058_v1, %v4057_v19  ;;  %v4060_v23 = vpop.f32.mrb[122].mxu1  ;;  %2945 = vmax.xlane.f32.xlu1 %v5834_v53  ;;  %v5839_v46 = vsel %vm2870_vm3, %v2859_v62, -1e+30  ;;  %v3965_v14 = vadd.f32 %v3964_v6, %v3963_v51  ;;  %v3966_v63 = vpop.f32.mrb[126].mxu0 }
 0x4fe   :  { %v4061_v35 = vpop.f32.mrb[123].mxu1  ;;  %2947 = vmax.xlane.f32.xlu0 %v5839_v46  ;;  %v3967_v10 = vpop.f32.mrb[127].mxu0  ;;  %v3278_v8 = vsel %vm6306_vm1, %v5839_v46, 0.0  ;;  %vm6332_vm1 = vmmov %vm6330_vm13 }
 0x4ff   :  { %v2800_v28 = vadd.f32 %v4059_v25, %v5778_v57  ;;  %v4062_v21 = vadd.f32 %v4061_v35, %v4060_v23  ;;  %v3968_v48 = vadd.f32 %v3967_v10, %v3966_v63 }
 0x501   :  { %v2860_v29 = vmul.f32 14.285714, %v2800_v28  ;;  %v2803_v58 = vadd.f32 %v4062_v21, %v5782_v26  ;;  %3297 = vadd.xlane.f32.xlu1 %v3277_v54 }
 0x502   :  { %3299 = vadd.xlane.f32.xlu0 %v3278_v8 }
 0x503   :  { %v2861_v27 = vmul.f32 14.285714, %v2803_v58  ;;  %v4063_v60 = vpop.f32.mrb[124].mxu1  ;;  %v5854_v57 = vsel %vm2870_vm3, %v2860_v29, -1e+30  ;;  %v3969_v17 = vpop.f32.mrb[128].mxu0 }
 0x504   :  { %v4064_v56 = vpop.f32.mrb[125].mxu1  ;;  %v3970_v37 = vpop.f32.mrb[129].mxu0 }
 0x505   :  { %v4065_v62 = vadd.f32 %v4064_v56, %v4063_v60  ;;  %v4066_v19 = vpop.f32.mrb[126].mxu1  ;;  %2949 = vmax.xlane.f32.xlu1 %v5854_v57  ;;  %v5859_v26 = vsel %vm2870_vm3, %v2861_v27, -1e+30  ;;  %v3971_v15 = vadd.f32 %v3970_v37, %v3969_v17  ;;  %v3972_v51 = vpop.f32.mrb[130].mxu0 }
 0x506   :  { %v4067_v1 = vpop.f32.mrb[127].mxu1  ;;  %2951 = vmax.xlane.f32.xlu0 %v5859_v26  ;;  %v3973_v6 = vpop.f32.mrb[131].mxu0 }
 0x507   :  { %v2808_v25 = vadd.f32 %v4065_v62, %v5797_v13  ;;  %v4068_v23 = vadd.f32 %v4067_v1, %v4066_v19  ;;  %v3974_v63 = vadd.f32 %v3973_v6, %v3972_v51 }
 0x509   :  { %v2862_v35 = vmul.f32 14.285714, %v2808_v25  ;;  %v2811_v10 = vadd.f32 %v4068_v23, %v5804_v7 }
 0x50b   :  { %v2863_v28 = vmul.f32 14.285714, %v2811_v10  ;;  %v4069_v21 = vpop.f32.mrb[128].mxu1  ;;  %v5866_v54 = vsel %vm2870_vm3, %v2862_v35, -1e+30 }
 0x50c   :  { %v4070_v29 = vpop.f32.mrb[129].mxu1  ;;  %2953 = vmax.xlane.f32.xlu1 %v5866_v54 }
 0x50d   :  { %v4071_v58 = vadd.f32 %v4070_v29, %v4069_v21  ;;  %v4072_v8 = vpop.f32.mrb[130].mxu1  ;;  %v5871_v27 = vsel %vm2870_vm3, %v2863_v28, -1e+30 }
 0x50e   :  { %v4073_v13 = vpop.f32.mrb[131].mxu1  ;;  %2955 = vmax.xlane.f32.xlu0 %v5871_v27 }
 0x50f   :  { %v2816_v7 = vadd.f32 %v4071_v58, %v5817_v59  ;;  %v4074_v60 = vadd.f32 %v4073_v13, %v4072_v8 }
 0x511   :  { %v2864_v17 = vmul.f32 14.285714, %v2816_v7  ;;  %v2819_v56 = vadd.f32 %v4074_v60, %v5821_v36 }
 0x513   :  { %v2865_v37 = vmul.f32 14.285714, %v2819_v56  ;;  %v4075_v62 = vpop.f32.mrb[132].mxu1  ;;  %v5878_v19 = vsel %vm2870_vm3, %v2864_v17, -1e+30 }
 0x514   :  { %v4076_v51 = vpop.f32.mrb[133].mxu1  ;;  %2957 = vmax.xlane.f32.xlu1 %v5878_v19 }
 0x515   :  { %v4077_v1 = vadd.f32 %v4076_v51, %v4075_v62  ;;  %v4078_v6 = vpop.f32.mrb[134].mxu1  ;;  %v5883_v25 = vsel %vm2870_vm3, %v2865_v37, -1e+30 }
 0x516   :  { %v4079_v59 = vpop.f32.mrb[135].mxu1  ;;  %2959 = vmax.xlane.f32.xlu0 %v5883_v25  ;;  %v3284_v31 = vsel %vm6316_vm11, %v5883_v25, 0.0 }
 0x517   :  { %v2824_v23 = vadd.f32 %v4077_v1, %v3965_v14  ;;  %v4080_v36 = vadd.f32 %v4079_v59, %v4078_v6  ;;  %v3231_v1 = vsel %vm6309_vm10, %v5709_v45, 0.0  ;;  %v3281_v59 = vsel %vm6311_vm9, %v5866_v54, 0.0 }
 0x519   :  { %v2866_v35 = vmul.f32 14.285714, %v2824_v23  ;;  %v2827_v10 = vadd.f32 %v4080_v36, %v3968_v48  ;;  %v3282_v23 = vsel %vm6312_vm4, %v5871_v27, 0.0  ;;  %v3283_v36 = vsel %vm6315_vm7, %v5878_v19, 0.0 }
 0x51b   :  { %v2867_v28 = vmul.f32 14.285714, %v2827_v10  ;;  %v4081_v21 = vpop.f32.mrb[136].mxu1  ;;  %v5888_v29 = vsel %vm2870_vm3, %v2866_v35, -1e+30 }
 0x51c   :  { %v4082_v58 = vpop.f32.mrb[137].mxu1  ;;  %2961 = vmax.xlane.f32.xlu1 %v5888_v29 }
 0x51d   :  { %v4083_v8 = vadd.f32 %v4082_v58, %v4081_v21  ;;  %v4084_v13 = vpop.f32.mrb[138].mxu1  ;;  %v5893_v7 = vsel %vm2870_vm3, %v2867_v28, -1e+30 }
 0x51e   :  { %v4085_v60 = vpop.f32.mrb[139].mxu1  ;;  %2963 = vmax.xlane.f32.xlu0 %v5893_v7 }
 0x51f   :  { %v2832_v14 = vadd.f32 %v4083_v8, %v3971_v15  ;;  %v4086_v48 = vadd.f32 %v4085_v60, %v4084_v13  ;;  %v3279_v15 = vsel %vm6307_vm2, %v5854_v57, 0.0  ;;  %v3236_v8 = vsel %vm6318_vm15, %v5744_v38, 0.0 }
 0x520   :  { %vm6333_vm2 = vcmp.eq.s32.totalorder %v5364_v18, %v5042_v50  ;;  %v6161_v18 = vld [vmem:[%s6264_s7] sm:$0x3] }
 0x521   :  { %v2868_v17 = vmul.f32 14.285714, %v2832_v14  ;;  %v2835_v56 = vadd.f32 %v4086_v48, %v3974_v63  ;;  %v3280_v63 = vsel %vm6308_vm8, %v5859_v26, 0.0  ;;  %vm6335_vm10 = vmmov %vm6333_vm2  ;;  %6343 = vst [vmem:[#allocation29_spill] sm:$0xff] %v6161_v18 }
 0x522   :  { %v3239_v3 = vsel %vm6335_vm10, %v5771_v12, 0.0 }
 0x523   :  { %v2869_v37 = vmul.f32 14.285714, %v2835_v56  ;;  %v5898_v62 = vsel %vm2870_vm3, %v2868_v17, -1e+30 }
 0x524   :  { %2965 = vmax.xlane.f32.xlu1 %v5898_v62 }
 0x525   :  { %v5903_v51 = vsel %vm2870_vm3, %v2869_v37, -1e+30  ;;  %vm6310_vm3 = vmmov %vm6308_vm8  ;;  %vm6334_vm8 = vcmp.eq.s32.totalorder %v5366_v44, %v5042_v50  ;;  %v3361_v50 = vsub.s32 1, %v5395_v61 }
 0x526   :  { %2967 = vmax.xlane.f32.xlu0 %v5903_v51  ;;  %v3232_v6 = vsel %vm6310_vm3, %v5717_v41, 0.0  ;;  %v3288_v11 = vsel %vm6334_vm8, %v5903_v51, 0.0  ;;  %vm6336_vm3 = vmmov %vm6334_vm8 }
 0x528   :  { %3301 = vadd.xlane.f32.xlu1 %v3279_v15 }
 0x52a   :  { %3303 = vadd.xlane.f32.xlu0 %v3280_v63 }
 0x52c   :  { %3253 = vadd.xlane.f32.xlu1 %v3231_v1 }
 0x52e   :  { %3255 = vadd.xlane.f32.xlu0 %v3232_v6 }
 0x530   :  { %3305 = vadd.xlane.f32.xlu1 %v3281_v59 }
 0x532   :  { %3307 = vadd.xlane.f32.xlu0 %v3282_v23 }
 0x534   :  { %3257 = vadd.xlane.f32.xlu1 %v3233_v47 }
 0x536   :  { %3259 = vadd.xlane.f32.xlu0 %v3234_v16 }
 0x538   :  { %3309 = vadd.xlane.f32.xlu1 %v3283_v36 }
 0x539   :  { %v5942_v35 = vpop.xlane.xlu0 %2905 }
 0x53a   :  { %v2969_v10 = vsub.f32 %v5641_v49, %v5942_v35  ;;  %3311 = vadd.xlane.f32.xlu0 %v3284_v31  ;;  %v5954_v21 = vpop.xlane.xlu1 %3241 }
 0x53c   :  { %v3001_v28 = vmul.f32 1.442695, %v2969_v10  ;;  %3261 = vadd.xlane.f32.xlu1 %v3235_v32 }
 0x53d   :  { %v5956_v58 = vpop.xlane.xlu0 %2907 }
 0x53e   :  { %4535 = vpow2.f32 %v3001_v28  ;;  %v2970_v49 = vsub.f32 %v5652_v5, %v5956_v58  ;;  %3263 = vadd.xlane.f32.xlu0 %v3236_v8 }
 0x540   :  { %v3003_v13 = vmul.f32 1.442695, %v2970_v49 }
 0x541   :  { %v5964_v60 = vpop.xlane.xlu0 %3243  ;;  %v5966_v33 = vpop.xlane.xlu1 %2909 }
 0x542   :  { %4537 = vpow2.f32 %v3003_v13  ;;  %v2971_v14 = vsub.f32 %v5663_v2, %v5966_v33 }
 0x544   :  { %v3005_v48 = vmul.f32 1.442695, %v2971_v14 }
 0x545   :  { %v5970_v17 = vpop.xlane.xlu0 %2911  ;;  %v5972_v56 = vpop.xlane.xlu1 %3245 }
 0x546   :  { %4539 = vpow2.f32 %v3005_v48  ;;  %v2972_v24 = vsub.f32 %v5674_v4, %v5970_v17 }
 0x548   :  { %v4536_v5 = vpop.eup %4535  ;;  %v3007_v37 = vmul.f32 1.442695, %v2972_v24 }
 0x549   :  { %v5976_v15 = vpop.xlane.xlu0 %3247  ;;  %3065 = vadd.xlane.f32.xlu1 %v4536_v5  ;;  %v5978_v63 = vpop.xlane.xlu1 %2913 }
 0x54a   :  { %4541 = vpow2.f32 %v3007_v37  ;;  %v2973_v2 = vsub.f32 %v5685_v39, %v5978_v63 }
 0x54c   :  { %v4538_v1 = vpop.eup %4537  ;;  %v3009_v6 = vmul.f32 1.442695, %v2973_v2 }
 0x54d   :  { %3067 = vadd.xlane.f32.xlu0 %v4538_v1  ;;  %v5982_v59 = vpop.xlane.xlu0 %2915  ;;  %v5984_v23 = vpop.xlane.xlu1 %3249 }
 0x54e   :  { %4543 = vpow2.f32 %v3009_v6  ;;  %v2974_v4 = vsub.f32 %v5697_v0, %v5982_v59 }
 0x550   :  { %v4540_v47 = vpop.eup %4539  ;;  %v3011_v16 = vmul.f32 1.442695, %v2974_v4 }
 0x551   :  { %v5988_v36 = vpop.xlane.xlu0 %3251  ;;  %3069 = vadd.xlane.f32.xlu1 %v4540_v47  ;;  %v5990_v31 = vpop.xlane.xlu1 %2917 }
 0x552   :  { %4545 = vpow2.f32 %v3011_v16  ;;  %v2975_v39 = vsub.f32 %v5709_v45, %v5990_v31 }
 0x554   :  { %v4542_v10 = vpop.eup %4541  ;;  %v3013_v32 = vmul.f32 1.442695, %v2975_v39 }
 0x555   :  { %3071 = vadd.xlane.f32.xlu0 %v4542_v10  ;;  %v5994_v28 = vpop.xlane.xlu0 %2919 }
 0x556   :  { %4547 = vpow2.f32 %v3013_v32  ;;  %v2976_v0 = vsub.f32 %v5717_v41, %v5994_v28 }
 0x558   :  { %v4544_v8 = vpop.eup %4543  ;;  %v3015_v49 = vmul.f32 1.442695, %v2976_v0 }
 0x559   :  { %3073 = vadd.xlane.f32.xlu1 %v4544_v8  ;;  %v5998_v13 = vpop.xlane.xlu1 %2921 }
 0x55a   :  { %4549 = vpow2.f32 %v3015_v49  ;;  %v2977_v14 = vsub.f32 %v5725_v22, %v5998_v13 }
 0x55b   :  { %v6002_v48 = vpop.xlane.xlu0 %2923 }
 0x55c   :  { %v4546_v45 = vpop.eup %4545  ;;  %v3017_v24 = vmul.f32 1.442695, %v2977_v14  ;;  %v2978_v5 = vsub.f32 %v5730_v55, %v6002_v48 }
 0x55d   :  { %3075 = vadd.xlane.f32.xlu0 %v4546_v45 }
 0x55e   :  { %4551 = vpow2.f32 %v3017_v24  ;;  %v3019_v37 = vmul.f32 1.442695, %v2978_v5 }
 0x560   :  { %v4548_v41 = vpop.eup %4547  ;;  %4553 = vpow2.f32 %v3019_v37 }
 0x561   :  { %3077 = vadd.xlane.f32.xlu1 %v4548_v41  ;;  %v6006_v2 = vpop.xlane.xlu1 %2925 }
 0x562   :  { %v2979_v1 = vsub.f32 %v5739_v20, %v6006_v2 }
 0x563   :  { %v6010_v6 = vpop.xlane.xlu0 %2927 }
 0x564   :  { %v4550_v22 = vpop.eup %4549  ;;  %v3021_v4 = vmul.f32 1.442695, %v2979_v1  ;;  %v2980_v47 = vsub.f32 %v5744_v38, %v6010_v6 }
 0x565   :  { %3079 = vadd.xlane.f32.xlu0 %v4550_v22 }
 0x566   :  { %4555 = vpow2.f32 %v3021_v4  ;;  %v3023_v55 = vmul.f32 1.442695, %v2980_v47 }
 0x568   :  { %v4552_v16 = vpop.eup %4551  ;;  %4557 = vpow2.f32 %v3023_v55 }
 0x569   :  { %3081 = vadd.xlane.f32.xlu1 %v4552_v16  ;;  %v6014_v39 = vpop.xlane.xlu1 %2929 }
 0x56a   :  { %6319 = vst [vmem:[#allocation13_spill] sm:$0xff] %v6014_v39  ;;  %v4554_v10 = vpop.eup %4553  ;;  %v2981_v32 = vsub.f32 %v5755_v30, %v6014_v39 }
 0x56b   :  { %3083 = vadd.xlane.f32.xlu0 %v4554_v10  ;;  %v6018_v20 = vpop.xlane.xlu0 %2931 }
 0x56c   :  { %6320 = vst [vmem:[#allocation14_spill] sm:$0xff] %v6018_v20  ;;  %v3025_v0 = vmul.f32 1.442695, %v2981_v32  ;;  %v2982_v8 = vsub.f32 %v5760_v34, %v6018_v20 }
 0x56e   :  { %4559 = vpow2.f32 %v3025_v0  ;;  %v3027_v38 = vmul.f32 1.442695, %v2982_v8 }
 0x570   :  { %v4556_v49 = vpop.eup %4555  ;;  %4561 = vpow2.f32 %v3027_v38 }
 0x571   :  { %3085 = vadd.xlane.f32.xlu1 %v4556_v49  ;;  %v6022_v14 = vpop.xlane.xlu1 %2933 }
 0x572   :  { %6321 = vst [vmem:[#allocation15_spill] sm:$0xff] %v6022_v14  ;;  %v4558_v45 = vpop.eup %4557  ;;  %v2983_v24 = vsub.f32 %v5771_v12, %v6022_v14  ;;  %v3362_v12 = vrot.slane %v6161_v18, %v3361_v50 }
 0x573   :  { %3087 = vadd.xlane.f32.xlu0 %v4558_v45  ;;  %v6026_v5 = vpop.xlane.xlu0 %2935 }
 0x574   :  { %6322 = vst [vmem:[#allocation16_spill] sm:$0xff] %v6026_v5  ;;  %v3029_v37 = vmul.f32 1.442695, %v2983_v24  ;;  %v2984_v41 = vsub.f32 %v5776_v52, %v6026_v5  ;;  %3429 = vmatprep.mubr.f32.mxu0 %v3362_v12 }
 0x576   :  { %4563 = vpow2.f32 %v3029_v37  ;;  %v3031_v1 = vmul.f32 1.442695, %v2984_v41 }
 0x578   :  { %v4560_v22 = vpop.eup %4559  ;;  %4565 = vpow2.f32 %v3031_v1 }
 0x579   :  { %v6030_v4 = vpop.xlane.xlu0 %2937  ;;  %3089 = vadd.xlane.f32.xlu1 %v4560_v22 }
 0x57a   :  { %v4562_v47 = vpop.eup %4561  ;;  %v2985_v55 = vsub.f32 %v5786_v43, %v6030_v4  ;;  %v6034_v16 = vpop.xlane.xlu1 %3289 }
 0x57b   :  { %3091 = vadd.xlane.f32.xlu0 %v4562_v47 }
 0x57c   :  { %v3033_v10 = vmul.f32 1.442695, %v2985_v55 }
 0x57d   :  { %v6038_v0 = vpop.xlane.xlu0 %3291 }
 0x57e   :  { %4567 = vpow2.f32 %v3033_v10  ;;  %v6036_v32 = vpop.xlane.xlu1 %2939 }
 0x57f   :  { %v2986_v8 = vsub.f32 %v5795_v40, %v6036_v32 }
 0x580   :  { %v4564_v38 = vpop.eup %4563 }
 0x581   :  { %v3035_v49 = vmul.f32 1.442695, %v2986_v8  ;;  %3093 = vadd.xlane.f32.xlu1 %v4564_v38 }
 0x582   :  { %v4566_v45 = vpop.eup %4565  ;;  %v6042_v24 = vpop.xlane.xlu1 %2941 }
 0x583   :  { %4569 = vpow2.f32 %v3035_v49  ;;  %v2987_v43 = vsub.f32 %v5810_v9, %v6042_v24  ;;  %3095 = vadd.xlane.f32.xlu0 %v4566_v45  ;;  %v6046_v37 = vpop.xlane.xlu0 %2943 }
 0x584   :  { %v2988_v41 = vsub.f32 %v5815_v42, %v6046_v37 }
 0x585   :  { %v3037_v1 = vmul.f32 1.442695, %v2987_v43 }
 0x586   :  { %v3039_v22 = vmul.f32 1.442695, %v2988_v41  ;;  %v6050_v47 = vpop.xlane.xlu1 %3293 }
 0x587   :  { %4571 = vpow2.f32 %v3037_v1  ;;  %v6052_v40 = vpop.xlane.xlu0 %3295 }
 0x588   :  { %v4568_v55 = vpop.eup %4567  ;;  %4573 = vpow2.f32 %v3039_v22 }
 0x589   :  { %3097 = vadd.xlane.f32.xlu1 %v4568_v55 }
 0x58a   :  { %v6054_v10 = vpop.xlane.xlu1 %2945 }
 0x58b   :  { %v2989_v9 = vsub.f32 %v5834_v53, %v6054_v10  ;;  %v6058_v8 = vpop.xlane.xlu0 %2947 }
 0x58c   :  { %v2990_v42 = vsub.f32 %v5839_v46, %v6058_v8 }
 0x58d   :  { %v4570_v38 = vpop.eup %4569  ;;  %v3041_v49 = vmul.f32 1.442695, %v2989_v9 }
 0x58e   :  { %v3043_v45 = vmul.f32 1.442695, %v2990_v42  ;;  %3099 = vadd.xlane.f32.xlu0 %v4570_v38  ;;  %v6062_v43 = vpop.xlane.xlu1 %3297 }
 0x58f   :  { %4575 = vpow2.f32 %v3041_v49  ;;  %v6064_v41 = vpop.xlane.xlu0 %3299 }
 0x590   :  { %4577 = vpow2.f32 %v3043_v45 }
 0x591   :  { %v4572_v1 = vpop.eup %4571 }
 0x592   :  { %v4574_v22 = vpop.eup %4573  ;;  %3101 = vadd.xlane.f32.xlu1 %v4572_v1  ;;  %v6066_v55 = vpop.xlane.xlu1 %2949 }
 0x593   :  { %v2991_v53 = vsub.f32 %v5854_v57, %v6066_v55  ;;  %v6070_v5 = vpop.xlane.xlu0 %2951  ;;  %3103 = vadd.xlane.f32.xlu0 %v4574_v22 }
 0x594   :  { %v2992_v46 = vsub.f32 %v5859_v26, %v6070_v5 }
 0x595   :  { %v3045_v9 = vmul.f32 1.442695, %v2991_v53 }
 0x596   :  { %v3047_v42 = vmul.f32 1.442695, %v2992_v46 }
 0x597   :  { %4579 = vpow2.f32 %v3045_v9 }
 0x598   :  { %4581 = vpow2.f32 %v3047_v42 }
 0x599   :  { %v4576_v38 = vpop.eup %4575  ;;  %v6074_v49 = vpop.xlane.xlu1 %2953 }
 0x59a   :  { %v4578_v45 = vpop.eup %4577  ;;  %v2993_v1 = vsub.f32 %v5866_v54, %v6074_v49  ;;  %3105 = vadd.xlane.f32.xlu1 %v4576_v38 }
 0x59b   :  { %v6078_v14 = vpop.xlane.xlu0 %2955  ;;  %3107 = vadd.xlane.f32.xlu0 %v4578_v45 }
 0x59c   :  { %v3049_v57 = vmul.f32 1.442695, %v2993_v1  ;;  %v2994_v22 = vsub.f32 %v5871_v27, %v6078_v14 }
 0x59e   :  { %4583 = vpow2.f32 %v3049_v57  ;;  %v3051_v26 = vmul.f32 1.442695, %v2994_v22 }
 0x5a0   :  { %4585 = vpow2.f32 %v3051_v26 }
 0x5a1   :  { %v4580_v53 = vpop.eup %4579  ;;  %v6082_v46 = vpop.xlane.xlu1 %2957 }
 0x5a2   :  { %6323 = vst [vmem:[#allocation17_spill] sm:$0xff] %v6082_v46  ;;  %v4582_v9 = vpop.eup %4581  ;;  %v2995_v42 = vsub.f32 %v5878_v19, %v6082_v46  ;;  %3109 = vadd.xlane.f32.xlu1 %v4580_v53 }
 0x5a3   :  { %v6086_v54 = vpop.xlane.xlu0 %2959  ;;  %3111 = vadd.xlane.f32.xlu0 %v4582_v9 }
 0x5a4   :  { %6324 = vst [vmem:[#allocation18_spill] sm:$0xff] %v6086_v54  ;;  %v3053_v38 = vmul.f32 1.442695, %v2995_v42  ;;  %v2996_v45 = vsub.f32 %v5883_v25, %v6086_v54 }
 0x5a6   :  { %4587 = vpow2.f32 %v3053_v38  ;;  %v3055_v27 = vmul.f32 1.442695, %v2996_v45 }
 0x5a8   :  { %v4584_v1 = vpop.eup %4583  ;;  %4589 = vpow2.f32 %v3055_v27 }
 0x5a9   :  { %3113 = vadd.xlane.f32.xlu1 %v4584_v1  ;;  %v6090_v57 = vpop.xlane.xlu1 %2961 }
 0x5aa   :  { %6325 = vst [vmem:[#allocation19_spill] sm:$0xff] %v6090_v57  ;;  %v4586_v22 = vpop.eup %4585  ;;  %v2997_v26 = vsub.f32 %v5888_v29, %v6090_v57 }
 0x5ab   :  { %v6094_v19 = vpop.xlane.xlu0 %2963  ;;  %3115 = vadd.xlane.f32.xlu0 %v4586_v22 }
 0x5ac   :  { %6326 = vst [vmem:[#allocation20_spill] sm:$0xff] %v6094_v19  ;;  %v3057_v53 = vmul.f32 1.442695, %v2997_v26  ;;  %v2998_v9 = vsub.f32 %v5893_v7, %v6094_v19 }
 0x5ae   :  { %4591 = vpow2.f32 %v3057_v53  ;;  %v3059_v25 = vmul.f32 1.442695, %v2998_v9 }
 0x5b0   :  { %v4588_v42 = vpop.eup %4587  ;;  %4593 = vpow2.f32 %v3059_v25 }
 0x5b1   :  { %3117 = vadd.xlane.f32.xlu1 %v4588_v42  ;;  %v6098_v38 = vpop.xlane.xlu1 %2965 }
 0x5b2   :  { %6327 = vst [vmem:[#allocation21_spill] sm:$0xff] %v6098_v38  ;;  %v4590_v45 = vpop.eup %4589  ;;  %v2999_v27 = vsub.f32 %v5898_v62, %v6098_v38 }
 0x5b3   :  { %v6102_v1 = vpop.xlane.xlu0 %2967  ;;  %3119 = vadd.xlane.f32.xlu0 %v4590_v45  ;;  %v3285_v45 = vsel %vm6329_vm0, %v5888_v29, 0.0  ;;  %v3238_v29 = vsel %vm6332_vm1, %v5760_v34, 0.0  ;;  %v3240_v34 = vsel %vm6336_vm3, %v5776_v52, 0.0 }
 0x5b4   :  { %6328 = vst [vmem:[#allocation22_spill] sm:$0xff] %v6102_v1  ;;  %v3061_v20 = vmul.f32 1.442695, %v2999_v27  ;;  %v3000_v22 = vsub.f32 %v5903_v51, %v6102_v1 }
 0x5b5   :  { %v6114_v27 = vpop.xlane.xlu1 %3301 }
 0x5b6   :  { %4595 = vpow2.f32 %v3061_v20  ;;  %v3063_v26 = vmul.f32 1.442695, %v3000_v22  ;;  %v3286_v20 = vsel %vm6330_vm13, %v5893_v7, 0.0  ;;  %v3237_v22 = vsel %vm6331_vm12, %v5755_v30, 0.0 }
 0x5b7   :  { %v3287_v7 = vsel %vm6333_vm2, %v5898_v62, 0.0 }
 0x5b8   :  { %v4592_v53 = vpop.eup %4591  ;;  %4597 = vpow2.f32 %v3063_v26  ;;  %v6120_v26 = vpop.xlane.xlu0 %3303 }
 0x5b9   :  { %3121 = vadd.xlane.f32.xlu1 %v4592_v53  ;;  %v6130_v53 = vpop.xlane.xlu1 %3253 }
 0x5ba   :  { %v4594_v9 = vpop.eup %4593 }
 0x5bb   :  { %3123 = vadd.xlane.f32.xlu0 %v4594_v9 }
 0x5bc   :  { %v6136_v30 = vpop.xlane.xlu0 %3255 }
 0x5bd   :  { %v6146_v62 = vpop.xlane.xlu1 %3305 }
 0x5be   :  { %6337 = vst [vmem:[#allocation23_spill] sm:$0xff] %v6146_v62 }
 0x5c0   :  { %v4596_v25 = vpop.eup %4595  ;;  %v6148_v9 = vpop.xlane.xlu0 %3307 }
 0x5c1   :  { %3125 = vadd.xlane.f32.xlu1 %v4596_v25  ;;  %6338 = vst [vmem:[#allocation24_spill] sm:$0xff] %v6148_v9  ;;  %v6150_v51 = vpop.xlane.xlu1 %3257 }
 0x5c2   :  { %v4598_v42 = vpop.eup %4597  ;;  %6339 = vst [vmem:[#allocation25_spill] sm:$0xff] %v6150_v51 }
 0x5c3   :  { %3127 = vadd.xlane.f32.xlu0 %v4598_v42 }
 0x5c4   :  { %v6152_v25 = vpop.xlane.xlu0 %3259 }
 0x5c5   :  { %3313 = vadd.xlane.f32.xlu1 %v3285_v45  ;;  %6340 = vst [vmem:[#allocation26_spill] sm:$0xff] %v6152_v25  ;;  %v6154_v42 = vpop.xlane.xlu1 %3309 }
 0x5c6   :  { %6341 = vst [vmem:[#allocation27_spill] sm:$0xff] %v6154_v42 }
 0x5c7   :  { %3315 = vadd.xlane.f32.xlu0 %v3286_v20 }
 0x5c8   :  { %v6156_v45 = vpop.xlane.xlu0 %3311 }
 0x5c9   :  { %3265 = vadd.xlane.f32.xlu1 %v3237_v22  ;;  %6342 = vst [vmem:[#allocation28_spill] sm:$0xff] %v6156_v45  ;;  %v3262_v44 = vpop.xlane.xlu1 %3261 }
 0x5cb   :  { %3267 = vadd.xlane.f32.xlu0 %v3238_v29 }
 0x5cc   :  { %v3264_v52 = vpop.xlane.xlu0 %3263 }
 0x5cd   :  { %3317 = vadd.xlane.f32.xlu1 %v3287_v7 }
 0x5cf   :  { %3319 = vadd.xlane.f32.xlu0 %v3288_v11 }
 0x5d1   :  { %3269 = vadd.xlane.f32.xlu1 %v3239_v3 }
 0x5d3   :  { %3271 = vadd.xlane.f32.xlu0 %v3240_v34 }
 0x5d6   :  { %v3066_v20 = vpop.xlane.xlu1 %3065 }
 0x5da   :  { %v3068_v22 = vpop.xlane.xlu0 %3067 }
 0x5de   :  { %v3070_v29 = vpop.xlane.xlu1 %3069 }
 0x5e2   :  { %v3072_v7 = vpop.xlane.xlu0 %3071 }
 0x5e6   :  { %v3074_v11 = vpop.xlane.xlu1 %3073 }
 0x5ea   :  { %v3076_v3 = vpop.xlane.xlu0 %3075 }
 0x5ee   :  { %v6165_v34 = vpop.xlane.xlu1 %3077 }
 0x5f2   :  { %v3080_v1 = vpop.xlane.xlu0 %3079 }
 0x5f6   :  { %v6167_v38 = vpop.xlane.xlu1 %3081 }
 0x5f8   :  { %v6169_v39 = vpop.xlane.xlu0 %3083 }
 0x5fe   :  { %v3086_v19 = vpop.xlane.xlu1 %3085 }
 0x5ff   :  { %4599 = vlog2.f32 %v3086_v19 }
 0x600   :  { %v3088_v61 = vpop.xlane.xlu0 %3087 }
 0x601   :  { %4601 = vlog2.f32 %v3088_v61 }
 0x602   :  { %4603 = vlog2.f32 %v3068_v22 }
 0x603   :  { %4605 = vlog2.f32 %v3066_v20 }
 0x606   :  { %v6173_v54 = vpop.xlane.xlu1 %3089 }
 0x608   :  { %v6179_v25 = vpop.xlane.xlu0 %3091 }
 0x609   :  { %v4600_v50 = vpop.eup %4599 }
 0x60a   :  { %v3150_v18 = vmul.f32 0.6931472, %v4600_v50 }
 0x60b   :  { %v4602_v12 = vpop.eup %4601 }
 0x60c   :  { %v3203_v57 = vadd.f32 %v3150_v18, %v6006_v2  ;;  %v3152_v45 = vmul.f32 0.6931472, %v4602_v12 }
 0x60e   :  { %v3204_v42 = vadd.f32 %v3152_v45, %v6010_v6  ;;  %v3331_v46 = vsub.f32 %v3203_v57, %v3262_v44  ;;  %v6175_v9 = vpop.xlane.xlu1 %3093  ;;  %v4604_v6 = vpop.eup %4603 }
 0x60f   :  { %v4606_v57 = vpop.eup %4605 }
 0x610   :  { %v3332_v51 = vsub.f32 %v3204_v42, %v3264_v52  ;;  %v6181_v19 = vpop.xlane.xlu0 %3095  ;;  %v3130_v52 = vmul.f32 0.6931472, %v4606_v57 }
 0x612   :  { %v6177_v62 = vpack.c.bf16 %v3332_v51, %v3331_v46  ;;  %v3132_v46 = vmul.f32 0.6931472, %v4604_v6 }
 0x616   :  { %v3098_v61 = vpop.xlane.xlu1 %3097 }
 0x617   :  { %4607 = vlog2.f32 %v3098_v61 }
 0x618   :  { %4609 = vlog2.f32 %v3072_v7  ;;  %v3194_v7 = vadd.f32 %v3132_v46, %v5956_v58 }
 0x619   :  { %4611 = vlog2.f32 %v3070_v29 }
 0x61b   :  { %v3100_v2 = vpop.xlane.xlu0 %3099 }
 0x61c   :  { %4613 = vlog2.f32 %v3100_v2  ;;  %v3193_v2 = vadd.f32 %v3130_v52, %v5942_v35 }
 0x61e   :  { %v3321_v35 = vsub.f32 %v3193_v2, %v5954_v21 }
 0x61f   :  { %v3102_v45 = vpop.xlane.xlu1 %3101 }
 0x620   :  { %4615 = vlog2.f32 %v3102_v45  ;;  %v3104_v42 = vpop.xlane.xlu0 %3103 }
 0x621   :  { %v4608_v18 = vpop.eup %4607  ;;  %4617 = vlog2.f32 %v3104_v42 }
 0x622   :  { %4619 = vlog2.f32 %v3076_v3  ;;  %v3162_v51 = vmul.f32 0.6931472, %v4608_v18  ;;  %v4610_v44 = vpop.eup %4609 }
 0x623   :  { %4621 = vlog2.f32 %v3074_v11  ;;  %v4612_v20 = vpop.eup %4611  ;;  %v3136_v29 = vmul.f32 0.6931472, %v4610_v44  ;;  %v3322_v11 = vsub.f32 %v3194_v7, %v5964_v60 }
 0x624   :  { %v3209_v50 = vadd.f32 %v3162_v51, %v6030_v4  ;;  %v3134_v42 = vmul.f32 0.6931472, %v4612_v20 }
 0x625   :  { %v3196_v58 = vadd.f32 %v3136_v29, %v5970_v17  ;;  %v4236_v17 = vpack.c.bf16 %v3322_v11, %v3321_v35 }
 0x626   :  { %v4614_v22 = vpop.eup %4613  ;;  %v3337_v4 = vsub.f32 %v3209_v50, %v6034_v16 }
 0x627   :  { %v3164_v12 = vmul.f32 0.6931472, %v4614_v22  ;;  %v3106_v61 = vpop.xlane.xlu1 %3105  ;;  %v3324_v22 = vsub.f32 %v3196_v58, %v5976_v15 }
 0x628   :  { %4623 = vlog2.f32 %v3106_v61  ;;  %v3108_v45 = vpop.xlane.xlu0 %3107 }
 0x629   :  { %v3210_v3 = vadd.f32 %v3164_v12, %v6036_v32  ;;  %4625 = vlog2.f32 %v3108_v45  ;;  %v3195_v32 = vadd.f32 %v3134_v42, %v5966_v33 }
 0x62a   :  { %v4616_v6 = vpop.eup %4615  ;;  %4627 = vlog2.f32 %v3080_v1 }
 0x62b   :  { %v4618_v57 = vpop.eup %4617  ;;  %v3166_v18 = vmul.f32 0.6931472, %v4616_v6  ;;  %v3338_v46 = vsub.f32 %v3210_v3, %v6038_v0  ;;  %4629 = vlog2.f32 %v6165_v34  ;;  %v3323_v33 = vsub.f32 %v3195_v32, %v5972_v56 }
 0x62c   :  { %v4620_v51 = vpop.eup %4619  ;;  %v3168_v44 = vmul.f32 0.6931472, %v4618_v57 }
 0x62d   :  { %v3211_v52 = vadd.f32 %v3166_v18, %v6042_v24  ;;  %v4234_v60 = vpack.c.bf16 %v3338_v46, %v3337_v4  ;;  %v4622_v1 = vpop.eup %4621  ;;  %v3140_v16 = vmul.f32 0.6931472, %v4620_v51  ;;  %v4240_v61 = vpack.c.bf16 %v3324_v22, %v3323_v33 }
 0x62e   :  { %v3212_v20 = vadd.f32 %v3168_v44, %v6046_v37  ;;  %v3138_v24 = vmul.f32 0.6931472, %v4622_v1 }
 0x62f   :  { %4235 = vmatprep.subr.bf16.mxu0 %v4234_v60  ;;  %v3110_v0 = vpop.xlane.xlu1 %3109  ;;  %v3339_v7 = vsub.f32 %v3211_v52, %v6050_v47  ;;  %v3198_v15 = vadd.f32 %v3140_v16, %v5982_v59 }
 0x630   :  { %4631 = vlog2.f32 %v3110_v0  ;;  %v3112_v21 = vpop.xlane.xlu0 %3111  ;;  %4237 = vmatpush3.bf16.msra.mxu0 %v4236_v17  ;;  %v3340_v34 = vsub.f32 %v3212_v20, %v6052_v40  ;;  %v3197_v40 = vadd.f32 %v3138_v24, %v5978_v63 }
 0x631   :  { %4633 = vlog2.f32 %v3112_v21  ;;  %v3326_v3 = vsub.f32 %v3198_v15, %v5988_v36  ;;  %v6344_v21 = vld [vmem:[#allocation26_spill] sm:$0xff] }
 0x632   :  { %v4624_v29 = vpop.eup %4623  ;;  %4635 = vlog2.f32 %v6169_v39  ;;  %v4238_v37 = vpack.c.bf16 %v3340_v34, %v3339_v7  ;;  %v3325_v57 = vsub.f32 %v3197_v40, %v5984_v23 }
 0x633   :  { %v4626_v50 = vpop.eup %4625  ;;  %v3170_v12 = vmul.f32 0.6931472, %v4624_v29  ;;  %4637 = vlog2.f32 %v6167_v38  ;;  %v6346_v29 = vld [vmem:[#allocation24_spill] sm:$0xff] }
 0x634   :  { %v4628_v2 = vpop.eup %4627  ;;  %v3172_v47 = vmul.f32 0.6931472, %v4626_v50  ;;  %4239 = vmatprep.subr.bf16.mxu0 %v4238_v37  ;;  %v4244_v46 = vpack.c.bf16 %v3326_v3, %v3325_v57  ;;  %v6347_v50 = vld [vmem:[#allocation25_spill] sm:$0xff]  ;;  %v6350_v3 = vld [vmem:[#allocation27_spill] sm:$0xff] }
 0x635   :  { %v3213_v56 = vadd.f32 %v3170_v12, %v6054_v10  ;;  %4241 = vmatpush3.bf16.msra.mxu0 %v4240_v61  ;;  %v4630_v45 = vpop.eup %4629  ;;  %v3144_v6 = vmul.f32 0.6931472, %v4628_v2 }
 0x636   :  { %v3214_v42 = vadd.f32 %v3172_v47, %v6058_v8  ;;  %v3114_v39 = vpop.xlane.xlu1 %3113  ;;  %v3142_v58 = vmul.f32 0.6931472, %v4630_v45  ;;  %v6349_v47 = vld [vmem:[#allocation18_spill] sm:$0xff] }
 0x637   :  { %4639 = vlog2.f32 %v3114_v39  ;;  %v3341_v59 = vsub.f32 %v3213_v56, %v6062_v43  ;;  %v3200_v4 = vadd.f32 %v3144_v6, %v5994_v28 }
 0x638   :  { %v3116_v11 = vpop.xlane.xlu0 %3115  ;;  %v3342_v38 = vsub.f32 %v3214_v42, %v6064_v41  ;;  %v3199_v35 = vadd.f32 %v3142_v58, %v5990_v31 }
 0x639   :  { %4641 = vlog2.f32 %v3116_v11  ;;  %v3328_v32 = vsub.f32 %v3200_v4, %v6136_v30  ;;  %v6352_v4 = vld [vmem:[#allocation19_spill] sm:$0xff] }
 0x63a   :  { %v4632_v63 = vpop.eup %4631  ;;  %v4242_v10 = vpack.c.bf16 %v3342_v38, %v3341_v59  ;;  %v3327_v17 = vsub.f32 %v3199_v35, %v6130_v53  ;;  %v6351_v59 = vld [vmem:[#allocation28_spill] sm:$0xff] }
 0x63b   :  { %v4634_v18 = vpop.eup %4633  ;;  %v3174_v8 = vmul.f32 0.6931472, %v4632_v63 }
 0x63c   :  { %v4636_v51 = vpop.eup %4635  ;;  %v3176_v36 = vmul.f32 0.6931472, %v4634_v18  ;;  %4243 = vmatprep.subr.bf16.mxu0 %v4242_v10  ;;  %v4248_v0 = vpack.c.bf16 %v3328_v32, %v3327_v17 }
 0x63d   :  { %v3215_v43 = vadd.f32 %v3174_v8, %v6066_v55  ;;  %4245 = vmatpush3.bf16.msra.mxu0 %v4244_v46  ;;  %v4638_v41 = vpop.eup %4637  ;;  %v3148_v52 = vmul.f32 0.6931472, %v4636_v51  ;;  %v6353_v51 = vld [vmem:[#allocation20_spill] sm:$0xff] }
 0x63e   :  { %v3216_v23 = vadd.f32 %v3176_v36, %v6070_v5  ;;  %v3118_v44 = vpop.xlane.xlu1 %3117  ;;  %v3146_v31 = vmul.f32 0.6931472, %v4638_v41  ;;  %v6354_v41 = vld [vmem:[#allocation13_spill] sm:$0xff] }
 0x63f   :  { %4643 = vlog2.f32 %v3118_v44  ;;  %v3343_v28 = vsub.f32 %v3215_v43, %v6114_v27  ;;  %v3202_v5 = vadd.f32 %v3148_v52, %v6002_v48  ;;  %v6345_v48 = vld [vmem:[#allocation23_spill] sm:$0xff]  ;;  %v6355_v44 = vld [vmem:[#allocation14_spill] sm:$0xff] }
 0x640   :  { %v3120_v60 = vpop.xlane.xlu0 %3119  ;;  %v3344_v1 = vsub.f32 %v3216_v23, %v6120_v26  ;;  %v3201_v27 = vadd.f32 %v3146_v31, %v5998_v13 }
 0x641   :  { %v4640_v20 = vpop.eup %4639  ;;  %4645 = vlog2.f32 %v3120_v60  ;;  %v3330_v34 = vsub.f32 %v3202_v5, %v6344_v21  ;;  %v6357_v21 = vld [vmem:[#allocation22_spill] sm:$0xff] }
 0x642   :  { %v3178_v55 = vmul.f32 0.6931472, %v4640_v20  ;;  %v4246_v22 = vpack.c.bf16 %v3344_v1, %v3343_v28  ;;  %4647 = vlog2.f32 %v6173_v54  ;;  %v3329_v15 = vsub.f32 %v3201_v27, %v6347_v50  ;;  %v6356_v27 = vld [vmem:[#allocation21_spill] sm:$0xff] }
 0x643   :  { %v4642_v16 = vpop.eup %4641  ;;  %4649 = vlog2.f32 %v6179_v25  ;;  %v6348_v25 = vld [vmem:[#allocation17_spill] sm:$0xff] }
 0x644   :  { %v3217_v30 = vadd.f32 %v3178_v55, %v6074_v49  ;;  %v3180_v7 = vmul.f32 0.6931472, %v4642_v16  ;;  %4247 = vmatprep.subr.bf16.mxu0 %v4246_v22  ;;  %v4252_v61 = vpack.c.bf16 %v3330_v34, %v3329_v15 }
 0x645   :  { %4249 = vmatpush3.bf16.msra.mxu0 %v4248_v0 }
 0x646   :  { %v3218_v26 = vadd.f32 %v3180_v7, %v6078_v14  ;;  %v3122_v53 = vpop.xlane.xlu1 %3121  ;;  %v3345_v24 = vsub.f32 %v3217_v30, %v6345_v48  ;;  %v6358_v48 = vld [vmem:[#allocation15_spill] sm:$0xff] }
 0x647   :  { %4651 = vlog2.f32 %v3122_v53 }
 0x648   :  { %v3124_v33 = vpop.xlane.xlu0 %3123  ;;  %v3346_v49 = vsub.f32 %v3218_v26, %v6346_v29  ;;  %v6359_v29 = vld [vmem:[#allocation16_spill] sm:$0xff] }
 0x649   :  { %v4644_v37 = vpop.eup %4643  ;;  %4653 = vlog2.f32 %v3124_v33 }
 0x64a   :  { %v3182_v13 = vmul.f32 0.6931472, %v4644_v37  ;;  %v4250_v54 = vpack.c.bf16 %v3346_v49, %v3345_v24  ;;  %4655 = vlog2.f32 %v6175_v9 }
 0x64b   :  { %v4646_v12 = vpop.eup %4645  ;;  %4657 = vlog2.f32 %v6181_v19 }
 0x64c   :  { %v3219_v2 = vadd.f32 %v3182_v13, %v6348_v25  ;;  %v3184_v14 = vmul.f32 0.6931472, %v4646_v12  ;;  %4251 = vmatprep.subr.bf16.mxu0 %v4250_v54  ;;  %v4648_v45 = vpop.eup %4647  ;;  %v6360_v13 = vld [vmem:[#allocation12_spill] sm:$0xff] }
 0x64d   :  { %4253 = vmatpush3.bf16.msra.mxu0 %v4252_v61  ;;  %v4650_v42 = vpop.eup %4649  ;;  %v3154_v10 = vmul.f32 0.6931472, %v4648_v45  ;;  %v3357_v54 = vsub.s32 0, %v6360_v13 }
 0x64e   :  { %v3220_v40 = vadd.f32 %v3184_v14, %v6349_v47  ;;  %v3126_v56 = vpop.xlane.xlu1 %3125  ;;  %v3347_v6 = vsub.f32 %v3219_v2, %v6350_v3  ;;  %v3156_v18 = vmul.f32 0.6931472, %v4650_v42  ;;  %v6361_v14 = vld [vmem:[#allocation29_spill] sm:$0xff] }
 0x64f   :  { %4659 = vlog2.f32 %v3126_v56  ;;  %v3205_v23 = vadd.f32 %v3154_v10, %v6354_v41  ;;  %v3358_v47 = vrot.slane %v6361_v14, %v3357_v54 }
 0x650   :  { %v3128_v39 = vpop.xlane.xlu0 %3127  ;;  %v3348_v11 = vsub.f32 %v3220_v40, %v6351_v59  ;;  %v3206_v32 = vadd.f32 %v3156_v18, %v6355_v44 }
 0x651   :  { %v4652_v38 = vpop.eup %4651  ;;  %4661 = vlog2.f32 %v3128_v39 }
 0x652   :  { %v3186_v57 = vmul.f32 0.6931472, %v4652_v38  ;;  %v3314_v58 = vpop.xlane.xlu1 %3313  ;;  %v4254_v63 = vpack.c.bf16 %v3348_v11, %v3347_v6 }
 0x653   :  { %v4654_v9 = vpop.eup %4653 }
 0x654   :  { %v3188_v19 = vmul.f32 0.6931472, %v4654_v9  ;;  %v3221_v8 = vadd.f32 %v3186_v57, %v6352_v4  ;;  %v3316_v46 = vpop.xlane.xlu0 %3315  ;;  %4255 = vmatprep.subr.bf16.mxu0 %v4254_v63  ;;  %v4656_v43 = vpop.eup %4655 }
 0x655   :  { %4257 = vmatpush3.bf16.msra.mxu0 %v6177_v62  ;;  %v4658_v52 = vpop.eup %4657  ;;  %v3158_v62 = vmul.f32 0.6931472, %v4656_v43 }
 0x656   :  { %v3222_v36 = vadd.f32 %v3188_v19, %v6353_v51  ;;  %v3266_v35 = vpop.xlane.xlu1 %3265  ;;  %v3349_v28 = vsub.f32 %v3221_v8, %v3314_v58  ;;  %v3160_v0 = vmul.f32 0.6931472, %v4658_v52 }
 0x657   :  { %v3333_v17 = vsub.f32 %v3205_v23, %v3266_v35  ;;  %v3207_v24 = vadd.f32 %v3158_v62, %v6358_v48 }
 0x658   :  { %v3350_v60 = vsub.f32 %v3222_v36, %v3316_v46  ;;  %v3268_v1 = vpop.xlane.xlu0 %3267  ;;  %v3208_v49 = vadd.f32 %v3160_v0, %v6359_v29 }
 0x659   :  { %v4660_v20 = vpop.eup %4659  ;;  %v3334_v31 = vsub.f32 %v3206_v32, %v3268_v1 }
 0x65a   :  { %v3190_v55 = vmul.f32 0.6931472, %v4660_v20  ;;  %v4258_v22 = vpack.c.bf16 %v3350_v60, %v3349_v28  ;;  %v3318_v16 = vpop.xlane.xlu1 %3317 }
 0x65b   :  { %v4662_v5 = vpop.eup %4661  ;;  %v4260_v30 = vpack.c.bf16 %v3334_v31, %v3333_v17 }
 0x65c   :  { %v3192_v7 = vmul.f32 0.6931472, %v4662_v5  ;;  %v3223_v26 = vadd.f32 %v3190_v55, %v6356_v27  ;;  %v3320_v53 = vpop.xlane.xlu0 %3319  ;;  %4259 = vmatprep.subr.bf16.mxu0 %v4258_v22 }
 0x65d   :  { %4261 = vmatpush3.bf16.msra.mxu0 %v4260_v30 }
 0x65e   :  { %v3224_v34 = vadd.f32 %v3192_v7, %v6357_v21  ;;  %v3270_v33 = vpop.xlane.xlu1 %3269  ;;  %v3351_v37 = vsub.f32 %v3223_v26, %v3318_v16 }
 0x65f   :  { %v3335_v12 = vsub.f32 %v3207_v24, %v3270_v33 }
 0x660   :  { %v3352_v50 = vsub.f32 %v3224_v34, %v3320_v53  ;;  %v3272_v15 = vpop.xlane.xlu0 %3271 }
 0x661   :  { %v3336_v61 = vsub.f32 %v3208_v49, %v3272_v15 }
 0x662   :  { %v4262_v25 = vpack.c.bf16 %v3352_v50, %v3351_v37 }
 0x663   :  { %v4264_v2 = vpack.c.bf16 %v3336_v61, %v3335_v12 }
 0x664   :  { %4263 = vmatprep.subr.bf16.mxu0 %v4262_v25 }
 0x665   :  { %4265 = vmatpush3.bf16.msra.mxu0 %v4264_v2 }
 0x668   :  { %3430 = vmatmul.mubr.f32.vlgmr.msra.gmra.mrb[132].mxu0 %v3358_v47 }
 0x73b   :  { %v4119_v40 = vpop.f32.mrb[132].mxu0 }
 0x73c   :  { %v4120_v56 = vpop.f32.mrb[133].mxu0 }
 0x73d   :  { %v4121_v45 = vadd.f32 %v4120_v56, %v4119_v40 }
 0x73f   :  { %4282 = vpush %v4121_v45 }
 0x770   :  { %s4283_s7 = spop %4282 }
 0x771   :  { %3438 = sst [smem:[#allocation8]] %s4283_s7 }
 0x772   :  { %4716 = shalt.err (!%p4713_p4)
}
 0x773   :  { %s4731_s26 = smov [#allocation8]  }
 0x774   :  { %3446 = dma.smem_to_hbm %s4731_s26, 16, %s6265_s8, [#allocation5]  }
 0x775   :  { %4721 = dma.done.wait [#allocation5], 16  }
 0x776   :  { %4722 = vsyncadd [#allocation5], 4294967280 }
 0x777   :  { %3450 = sfence }
 0x778   :  { %3451 = vsyncpa [#allocation4], 1 }
 0x779   :  { %3452 = vsyncpa [#allocation7], 1 }
 0x77a   :  { %3453 = vsyncpa [#allocation5], 1 }

</bundles_post_ra>
